<compile_context>
chip_gen: v7x
topology: tpu7x:2x2x1
jax: 0.10.0
libtpu: 0.0.40
codegen_flags: <defaults>
</compile_context>

<pallas_src>
import functools

import jax
import jax.numpy as jnp
from jax.experimental import pallas as pl
from jax.experimental.pallas import tpu as pltpu


# --------------------------------------------------------------------------
# Pallas kernel: fused transposed GEMM + bias + activation (the conv hot path)
# --------------------------------------------------------------------------
def _gemm_bias_act_kernel(w_ref, x_ref, b_ref, o_ref, *, act):
    # (O, K) bf16 @ (K, tm) bf16 -> (O, tm) f32 accumulate on the MXU.
    acc = jnp.dot(w_ref[...], x_ref[...], preferred_element_type=jnp.float32)
    acc = acc + b_ref[...]                      # (O, tm) + (O, 1) lane-broadcast
    if act == "lrelu":                          # nn.LeakyReLU(0.2)
        acc = jnp.maximum(acc, 0.2 * acc)
    elif act == "tanh":
        acc = jnp.tanh(acc)
    o_ref[...] = acc.astype(o_ref.dtype)


def _gemm_bias_act(w_t, x_t, b_col, act, out_dtype):
    """y_t = act(w_t @ x_t + b_col); w_t:(O,K) bf16, x_t:(K,M) bf16, b:(O,1) f32."""
    O, K = w_t.shape
    M = x_t.shape[1]
    # Split the lane (M) axis only when each half stays 128-aligned and big,
    # so the large encoder layer(s) expose >=2 parallel grid steps (keeps both
    # v7x TensorCores busy); all other layers collapse to one full-array step
    # (no padding, no slicing, negligible pipeline overhead).  Total VMEM use
    # is < 2 MiB per call on every layer, far under every generation's budget.
    n_split = 2 if (M % 256 == 0 and M >= 4096) else 1
    tm = M // n_split
    return pl.pallas_call(
        functools.partial(_gemm_bias_act_kernel, act=act),
        out_shape=jax.ShapeDtypeStruct((O, M), out_dtype),
        grid=(n_split,),
        in_specs=[
            pl.BlockSpec((O, K), lambda i: (0, 0)),   # weight (bf16), constant
            pl.BlockSpec((K, tm), lambda i: (0, 0 if tm == M else i)
                         if False else (lambda i: (0, i)))  # placeholder
            if False else pl.BlockSpec((K, tm), lambda i: (0, i)),  # patches^T
            pl.BlockSpec((O, 1), lambda i: (0, 0)),   # bias column (f32)
        ],
        out_specs=pl.BlockSpec((O, tm), lambda i: (0, i)),
        compiler_params=pltpu.CompilerParams(
            dimension_semantics=("parallel",),
            vmem_limit_bytes=32 * 1024 * 1024,        # safe on v5e/v6e/v7x
        ),
    )(w_t, x_t, b_col)


# --------------------------------------------------------------------------
# JAX glue (fused by jit): zero pad + im2col (transposed) + Pallas GEMM = Conv2d
# Activations are channel-major: a[c, n, h, w].
# --------------------------------------------------------------------------
def conv2d_cm(a_cnhw, w_t, b_col, k, stride, padding, act, out_dtype):
    C, N, H, W = a_cnhw.shape
    O = w_t.shape[0]
    ap = jnp.pad(a_cnhw, ((0, 0), (0, 0), (padding, padding), (padding, padding)))
    Ho = (H + 2 * padding - k) // stride + 1
    Wo = (W + 2 * padding - k) // stride + 1
    taps = []
    for di in range(k):
        for dj in range(k):
            taps.append(ap[:, :, di:di + stride * (Ho - 1) + 1:stride,
                                 dj:dj + stride * (Wo - 1) + 1:stride])
    # patches^T with K ordered (kh, kw, C) — matches the (0,2,3,1) weight
    # transpose below — and M = (n, oh, ow) on the lane axis.  No transpose
    # is needed because activations are already channel-major.
    patches_t = jnp.stack(taps, axis=0).reshape(k * k * C, N * Ho * Wo)
    y_t = _gemm_bias_act(w_t, patches_t, b_col, act, out_dtype)      # (O, M)
    return y_t.reshape(O, N, Ho, Wo)                                 # channel-major


def upsample_nearest_2x_cm(a_cnhw):
    # F.interpolate(scale_factor=2, mode='nearest') inside TransposeConv2dLayer
    return jnp.repeat(jnp.repeat(a_cnhw, 2, axis=2), 2, axis=3)


# --------------------------------------------------------------------------
# Generator config, parameters (deterministic init) and forward
# --------------------------------------------------------------------------
def make_layer_cfg(in_ch, out_ch, start_ch, bottleneck_ch):
    assert bottleneck_ch == start_ch * 4, "needed so B1 output feeds D1"
    return (
        # (name, cin, cout, k, stride, pad, activation, pre_upsample)
        ("E1", in_ch,         start_ch,      4, 2, 1, "lrelu", False),
        ("E2", start_ch,      start_ch,      4, 2, 1, "lrelu", False),
        ("E3", start_ch,      start_ch * 2,  4, 2, 1, "lrelu", False),
        ("E4", start_ch * 2,  start_ch * 4,  4, 2, 1, "lrelu", False),
        ("E5", start_ch * 4,  start_ch * 8,  4, 2, 1, "lrelu", False),
        ("B1", start_ch * 8,  bottleneck_ch, 4, 1, 0, "lrelu", False),
        # final values of D1/D2 after the duplicate assignments in __init__:
        ("D1", start_ch * 4,  start_ch * 2,  4, 2, 1, "lrelu", True),
        ("D2", start_ch * 2,  start_ch,      4, 2, 1, "lrelu", True),
        ("D3", start_ch,      out_ch,        4, 2, 1, "tanh",  False),
    )


def init_params(key, cfg):
    params = {}
    for (name, ci, co, k, _s, _p, _act, _up) in cfg:
        key, wk = jax.random.split(key)
        w = 0.05 * jax.random.normal(wk, (co, ci, k, k), dtype=jnp.float32)
        # GEMM-ready transposed weight precomputed once:
        # (O,I,kh,kw) -> (O,kh,kw,I) -> (O, K) with K = (kh,kw,I), I fastest.
        w_t = jnp.transpose(w, (0, 2, 3, 1)).reshape(co, k * k * ci)
        params[name] = dict(
            w_t=w_t.astype(jnp.bfloat16),
            b_col=jnp.zeros((co, 1), dtype=jnp.float32),
        )
    return params


def generator_forward(cfg, params, x_nchw):
    # NCHW -> channel-major (C, N, H, W); intermediates kept in bf16 (the f32
    # accumulation / bias / activation happen inside the Pallas kernel).
    a = jnp.transpose(x_nchw, (1, 0, 2, 3)).astype(jnp.bfloat16)
    n_layers = len(cfg)
    for idx, (name, _ci, _co, k, s, p, act, up) in enumerate(cfg):
        if up:
            a = upsample_nearest_2x_cm(a)
        out_dtype = jnp.float32 if idx == n_layers - 1 else jnp.bfloat16
        layer = params[name]
        a = conv2d_cm(a, layer["w_t"], layer["b_col"], k, s, p, act, out_dtype)
    return jnp.transpose(a, (1, 0, 2, 3))   # (O, N, H, W) -> NCHW


if __name__ == "__main__":
    key = jax.random.PRNGKey(0)
    # opt: in_channels=3, out_channels=3, start_channels=4,
    #      bottleneck_channels=16, pad='zero', norm='none'
    in_ch, out_ch, start_ch, bottleneck_ch = 3, 3, 4, 16
    cfg = make_layer_cfg(in_ch, out_ch, start_ch, bottleneck_ch)

    pkey, xkey = jax.random.split(key)
    params = init_params(pkey, cfg)

    # 160 is the smallest spatial size for which 5 stride-2 convs followed by
    # the kernel-4 / pad-0 bottleneck and the decoder are all valid.
    x = jax.random.normal(xkey, (2, in_ch, 160, 160), dtype=jnp.float32)

    fwd = jax.jit(functools.partial(generator_forward, cfg))
    y = fwd(params, x)
    jax.block_until_ready(y)
    assert y.shape == (2, out_ch, 1, 1), y.shape
    assert bool(jnp.all(jnp.isfinite(y)))
    print("KERNEL_OK")
</pallas_src>

<mosaic_0001>
module attributes {stable_mosaic.version = 11 : i64} {
  func.func @_gemm_bias_act_kernel(%arg0: i32, %arg1: memref<4x48xbf16, #tpu.memory_space<vmem>>, %arg2: memref<48x6400xbf16, #tpu.memory_space<vmem>>, %arg3: memref<4x1xf32, #tpu.memory_space<vmem>>, %arg4: memref<4x6400xbf16, #tpu.memory_space<vmem>>) attributes {dimension_semantics = [#tpu.dimension_semantics<parallel>], iteration_bounds = array<i64: 2>, scalar_prefetch = 0 : i64, scratch_operands = 0 : i64, tpu.core_type = #tpu.core_type<tc>, window_params = [{pipeline_mode = #tpu.pipeline_mode<synchronous>, transform_indices = @transform_0, window_bounds = array<i64: 4, 48>}, {transform_indices = @transform_1, window_bounds = array<i64: 48, 6400>}, {pipeline_mode = #tpu.pipeline_mode<synchronous>, transform_indices = @transform_2, window_bounds = array<i64: 4, 1>}, {transform_indices = @transform_3, window_bounds = array<i64: 4, 6400>}]} {
    %c0 = arith.constant 0 : index
    %c0_0 = arith.constant 0 : index
    %0 = vector.load %arg1[%c0, %c0_0] : memref<4x48xbf16, #tpu.memory_space<vmem>>, vector<4x48xbf16>
    %c0_1 = arith.constant 0 : index
    %c0_2 = arith.constant 0 : index
    %1 = vector.load %arg2[%c0_1, %c0_2] : memref<48x6400xbf16, #tpu.memory_space<vmem>>, vector<48x6400xbf16>
    %cst = arith.constant dense<0.000000e+00> : vector<4x6400xf32>
    %2 = tpu.matmul %0, %1, %cst {dimension_numbers = #tpu.dot_dimension_numbers<[1], [0], [0], [1], [0, 0, 1, 1], [], []>} : vector<4x48xbf16>, vector<48x6400xbf16>, vector<4x6400xf32> -> vector<4x6400xf32>
    %c0_3 = arith.constant 0 : index
    %c0_4 = arith.constant 0 : index
    %3 = vector.load %arg3[%c0_3, %c0_4] : memref<4x1xf32, #tpu.memory_space<vmem>>, vector<4x1xf32>
    %4 = vector.broadcast %3 : vector<4x1xf32> to vector<4x6400xf32>
    %5 = arith.addf %2, %4 : vector<4x6400xf32>
    %cst_5 = arith.constant 2.000000e-01 : f32
    %6 = vector.broadcast %cst_5 : f32 to vector<4x6400xf32>
    %7 = arith.mulf %6, %5 : vector<4x6400xf32>
    %8 = arith.maximumf %5, %7 : vector<4x6400xf32>
    %9 = arith.truncf %8 : vector<4x6400xf32> to vector<4x6400xbf16>
    %c0_6 = arith.constant 0 : index
    %c0_7 = arith.constant 0 : index
    %10 = vector.load %arg4[%c0_6, %c0_7] : memref<4x6400xbf16, #tpu.memory_space<vmem>>, vector<4x6400xbf16>
    tpu.vector_store %arg4[%c0_6, %c0_7], %9 {strides = array<i32>} : memref<4x6400xbf16, #tpu.memory_space<vmem>>, vector<4x6400xbf16>,
    return
  }
  func.func @transform_0(%arg0: i32) -> (i32, i32) {
    %c0_i32 = arith.constant 0 : i32
    %c0_i32_0 = arith.constant 0 : i32
    %c0_i32_1 = arith.constant 0 : i32
    return %c0_i32, %c0_i32_0 : i32, i32
  }
  func.func @transform_1(%arg0: i32) -> (i32, i32) {
    %c0_i32 = arith.constant 0 : i32
    %c0_i32_0 = arith.constant 0 : i32
    return %c0_i32, %arg0 : i32, i32
  }
  func.func @transform_2(%arg0: i32) -> (i32, i32) {
    %c0_i32 = arith.constant 0 : i32
    %c0_i32_0 = arith.constant 0 : i32
    %c0_i32_1 = arith.constant 0 : i32
    return %c0_i32, %c0_i32_0 : i32, i32
  }
  func.func @transform_3(%arg0: i32) -> (i32, i32) {
    %c0_i32 = arith.constant 0 : i32
    %c0_i32_0 = arith.constant 0 : i32
    return %c0_i32, %arg0 : i32, i32
  }
}

module attributes {stable_mosaic.version = 11 : i64} {
  func.func @_gemm_bias_act_kernel(%arg0: i32, %arg1: memref<4x64xbf16, #tpu.memory_space<vmem>>, %arg2: memref<64x3200xbf16, #tpu.memory_space<vmem>>, %arg3: memref<4x1xf32, #tpu.memory_space<vmem>>, %arg4: memref<4x3200xbf16, #tpu.memory_space<vmem>>) attributes {dimension_semantics = [#tpu.dimension_semantics<parallel>], iteration_bounds = array<i64: 1>, scalar_prefetch = 0 : i64, scratch_operands = 0 : i64, tpu.core_type = #tpu.core_type<tc>, window_params = [{pipeline_mode = #tpu.pipeline_mode<synchronous>, transform_indices = @transform_0, window_bounds = array<i64: 4, 64>}, {transform_indices = @transform_1, window_bounds = array<i64: 64, 3200>}, {pipeline_mode = #tpu.pipeline_mode<synchronous>, transform_indices = @transform_2, window_bounds = array<i64: 4, 1>}, {transform_indices = @transform_3, window_bounds = array<i64: 4, 3200>}]} {
    %c0 = arith.constant 0 : index
    %c0_0 = arith.constant 0 : index
    %0 = vector.load %arg1[%c0, %c0_0] : memref<4x64xbf16, #tpu.memory_space<vmem>>, vector<4x64xbf16>
    %c0_1 = arith.constant 0 : index
    %c0_2 = arith.constant 0 : index
    %1 = vector.load %arg2[%c0_1, %c0_2] : memref<64x3200xbf16, #tpu.memory_space<vmem>>, vector<64x3200xbf16>
    %cst = arith.constant dense<0.000000e+00> : vector<4x3200xf32>
    %2 = tpu.matmul %0, %1, %cst {dimension_numbers = #tpu.dot_dimension_numbers<[1], [0], [0], [1], [0, 0, 1, 1], [], []>} : vector<4x64xbf16>, vector<64x3200xbf16>, vector<4x3200xf32> -> vector<4x3200xf32>
    %c0_3 = arith.constant 0 : index
    %c0_4 = arith.constant 0 : index
    %3 = vector.load %arg3[%c0_3, %c0_4] : memref<4x1xf32, #tpu.memory_space<vmem>>, vector<4x1xf32>
    %4 = vector.broadcast %3 : vector<4x1xf32> to vector<4x3200xf32>
    %5 = arith.addf %2, %4 : vector<4x3200xf32>
    %cst_5 = arith.constant 2.000000e-01 : f32
    %6 = vector.broadcast %cst_5 : f32 to vector<4x3200xf32>
    %7 = arith.mulf %6, %5 : vector<4x3200xf32>
    %8 = arith.maximumf %5, %7 : vector<4x3200xf32>
    %9 = arith.truncf %8 : vector<4x3200xf32> to vector<4x3200xbf16>
    %c0_6 = arith.constant 0 : index
    %c0_7 = arith.constant 0 : index
    %10 = vector.load %arg4[%c0_6, %c0_7] : memref<4x3200xbf16, #tpu.memory_space<vmem>>, vector<4x3200xbf16>
    tpu.vector_store %arg4[%c0_6, %c0_7], %9 {strides = array<i32>} : memref<4x3200xbf16, #tpu.memory_space<vmem>>, vector<4x3200xbf16>,
    return
  }
  func.func @transform_0(%arg0: i32) -> (i32, i32) {
    %c0_i32 = arith.constant 0 : i32
    %c0_i32_0 = arith.constant 0 : i32
    %c0_i32_1 = arith.constant 0 : i32
    return %c0_i32, %c0_i32_0 : i32, i32
  }
  func.func @transform_1(%arg0: i32) -> (i32, i32) {
    %c0_i32 = arith.constant 0 : i32
    %c0_i32_0 = arith.constant 0 : i32
    return %c0_i32, %arg0 : i32, i32
  }
  func.func @transform_2(%arg0: i32) -> (i32, i32) {
    %c0_i32 = arith.constant 0 : i32
    %c0_i32_0 = arith.constant 0 : i32
    %c0_i32_1 = arith.constant 0 : i32
    return %c0_i32, %c0_i32_0 : i32, i32
  }
  func.func @transform_3(%arg0: i32) -> (i32, i32) {
    %c0_i32 = arith.constant 0 : i32
    %c0_i32_0 = arith.constant 0 : i32
    return %c0_i32, %arg0 : i32, i32
  }
}

module attributes {stable_mosaic.version = 11 : i64} {
  func.func @_gemm_bias_act_kernel(%arg0: i32, %arg1: memref<8x64xbf16, #tpu.memory_space<vmem>>, %arg2: memref<64x800xbf16, #tpu.memory_space<vmem>>, %arg3: memref<8x1xf32, #tpu.memory_space<vmem>>, %arg4: memref<8x800xbf16, #tpu.memory_space<vmem>>) attributes {dimension_semantics = [#tpu.dimension_semantics<parallel>], iteration_bounds = array<i64: 1>, scalar_prefetch = 0 : i64, scratch_operands = 0 : i64, tpu.core_type = #tpu.core_type<tc>, window_params = [{pipeline_mode = #tpu.pipeline_mode<synchronous>, transform_indices = @transform_0, window_bounds = array<i64: 8, 64>}, {transform_indices = @transform_1, window_bounds = array<i64: 64, 800>}, {pipeline_mode = #tpu.pipeline_mode<synchronous>, transform_indices = @transform_2, window_bounds = array<i64: 8, 1>}, {transform_indices = @transform_3, window_bounds = array<i64: 8, 800>}]} {
    %c0 = arith.constant 0 : index
    %c0_0 = arith.constant 0 : index
    %0 = vector.load %arg1[%c0, %c0_0] : memref<8x64xbf16, #tpu.memory_space<vmem>>, vector<8x64xbf16>
    %c0_1 = arith.constant 0 : index
    %c0_2 = arith.constant 0 : index
    %1 = vector.load %arg2[%c0_1, %c0_2] : memref<64x800xbf16, #tpu.memory_space<vmem>>, vector<64x800xbf16>
    %cst = arith.constant dense<0.000000e+00> : vector<8x800xf32>
    %2 = tpu.matmul %0, %1, %cst {dimension_numbers = #tpu.dot_dimension_numbers<[1], [0], [0], [1], [0, 0, 1, 1], [], []>} : vector<8x64xbf16>, vector<64x800xbf16>, vector<8x800xf32> -> vector<8x800xf32>
    %c0_3 = arith.constant 0 : index
    %c0_4 = arith.constant 0 : index
    %3 = vector.load %arg3[%c0_3, %c0_4] : memref<8x1xf32, #tpu.memory_space<vmem>>, vector<8x1xf32>
    %4 = vector.broadcast %3 : vector<8x1xf32> to vector<8x800xf32>
    %5 = arith.addf %2, %4 : vector<8x800xf32>
    %cst_5 = arith.constant 2.000000e-01 : f32
    %6 = vector.broadcast %cst_5 : f32 to vector<8x800xf32>
    %7 = arith.mulf %6, %5 : vector<8x800xf32>
    %8 = arith.maximumf %5, %7 : vector<8x800xf32>
    %9 = arith.truncf %8 : vector<8x800xf32> to vector<8x800xbf16>
    %c0_6 = arith.constant 0 : index
    %c0_7 = arith.constant 0 : index
    %10 = vector.load %arg4[%c0_6, %c0_7] : memref<8x800xbf16, #tpu.memory_space<vmem>>, vector<8x800xbf16>
    tpu.vector_store %arg4[%c0_6, %c0_7], %9 {strides = array<i32>} : memref<8x800xbf16, #tpu.memory_space<vmem>>, vector<8x800xbf16>,
    return
  }
  func.func @transform_0(%arg0: i32) -> (i32, i32) {
    %c0_i32 = arith.constant 0 : i32
    %c0_i32_0 = arith.constant 0 : i32
    %c0_i32_1 = arith.constant 0 : i32
    return %c0_i32, %c0_i32_0 : i32, i32
  }
  func.func @transform_1(%arg0: i32) -> (i32, i32) {
    %c0_i32 = arith.constant 0 : i32
    %c0_i32_0 = arith.constant 0 : i32
    return %c0_i32, %arg0 : i32, i32
  }
  func.func @transform_2(%arg0: i32) -> (i32, i32) {
    %c0_i32 = arith.constant 0 : i32
    %c0_i32_0 = arith.constant 0 : i32
    %c0_i32_1 = arith.constant 0 : i32
    return %c0_i32, %c0_i32_0 : i32, i32
  }
  func.func @transform_3(%arg0: i32) -> (i32, i32) {
    %c0_i32 = arith.constant 0 : i32
    %c0_i32_0 = arith.constant 0 : i32
    return %c0_i32, %arg0 : i32, i32
  }
}

module attributes {stable_mosaic.version = 11 : i64} {
  func.func @_gemm_bias_act_kernel(%arg0: i32, %arg1: memref<16x128xbf16, #tpu.memory_space<vmem>>, %arg2: memref<128x200xbf16, #tpu.memory_space<vmem>>, %arg3: memref<16x1xf32, #tpu.memory_space<vmem>>, %arg4: memref<16x200xbf16, #tpu.memory_space<vmem>>) attributes {dimension_semantics = [#tpu.dimension_semantics<parallel>], iteration_bounds = array<i64: 1>, scalar_prefetch = 0 : i64, scratch_operands = 0 : i64, tpu.core_type = #tpu.core_type<tc>, window_params = [{pipeline_mode = #tpu.pipeline_mode<synchronous>, transform_indices = @transform_0, window_bounds = array<i64: 16, 128>}, {transform_indices = @transform_1, window_bounds = array<i64: 128, 200>}, {pipeline_mode = #tpu.pipeline_mode<synchronous>, transform_indices = @transform_2, window_bounds = array<i64: 16, 1>}, {transform_indices = @transform_3, window_bounds = array<i64: 16, 200>}]} {
    %c0 = arith.constant 0 : index
    %c0_0 = arith.constant 0 : index
    %0 = vector.load %arg1[%c0, %c0_0] : memref<16x128xbf16, #tpu.memory_space<vmem>>, vector<16x128xbf16>
    %c0_1 = arith.constant 0 : index
    %c0_2 = arith.constant 0 : index
    %1 = vector.load %arg2[%c0_1, %c0_2] : memref<128x200xbf16, #tpu.memory_space<vmem>>, vector<128x200xbf16>
    %cst = arith.constant dense<0.000000e+00> : vector<16x200xf32>
    %2 = tpu.matmul %0, %1, %cst {dimension_numbers = #tpu.dot_dimension_numbers<[1], [0], [0], [1], [0, 0, 1, 1], [], []>} : vector<16x128xbf16>, vector<128x200xbf16>, vector<16x200xf32> -> vector<16x200xf32>
    %c0_3 = arith.constant 0 : index
    %c0_4 = arith.constant 0 : index
    %3 = vector.load %arg3[%c0_3, %c0_4] : memref<16x1xf32, #tpu.memory_space<vmem>>, vector<16x1xf32>
    %4 = vector.broadcast %3 : vector<16x1xf32> to vector<16x200xf32>
    %5 = arith.addf %2, %4 : vector<16x200xf32>
    %cst_5 = arith.constant 2.000000e-01 : f32
    %6 = vector.broadcast %cst_5 : f32 to vector<16x200xf32>
    %7 = arith.mulf %6, %5 : vector<16x200xf32>
    %8 = arith.maximumf %5, %7 : vector<16x200xf32>
    %9 = arith.truncf %8 : vector<16x200xf32> to vector<16x200xbf16>
    %c0_6 = arith.constant 0 : index
    %c0_7 = arith.constant 0 : index
    %10 = vector.load %arg4[%c0_6, %c0_7] : memref<16x200xbf16, #tpu.memory_space<vmem>>, vector<16x200xbf16>
    tpu.vector_store %arg4[%c0_6, %c0_7], %9 {strides = array<i32>} : memref<16x200xbf16, #tpu.memory_space<vmem>>, vector<16x200xbf16>,
    return
  }
  func.func @transform_0(%arg0: i32) -> (i32, i32) {
    %c0_i32 = arith.constant 0 : i32
    %c0_i32_0 = arith.constant 0 : i32
    %c0_i32_1 = arith.constant 0 : i32
    return %c0_i32, %c0_i32_0 : i32, i32
  }
  func.func @transform_1(%arg0: i32) -> (i32, i32) {
    %c0_i32 = arith.constant 0 : i32
    %c0_i32_0 = arith.constant 0 : i32
    return %c0_i32, %arg0 : i32, i32
  }
  func.func @transform_2(%arg0: i32) -> (i32, i32) {
    %c0_i32 = arith.constant 0 : i32
    %c0_i32_0 = arith.constant 0 : i32
    %c0_i32_1 = arith.constant 0 : i32
    return %c0_i32, %c0_i32_0 : i32, i32
  }
  func.func @transform_3(%arg0: i32) -> (i32, i32) {
    %c0_i32 = arith.constant 0 : i32
    %c0_i32_0 = arith.constant 0 : i32
    return %c0_i32, %arg0 : i32, i32
  }
}

module attributes {stable_mosaic.version = 11 : i64} {
  func.func @_gemm_bias_act_kernel(%arg0: i32, %arg1: memref<32x256xbf16, #tpu.memory_space<vmem>>, %arg2: memref<256x50xbf16, #tpu.memory_space<vmem>>, %arg3: memref<32x1xf32, #tpu.memory_space<vmem>>, %arg4: memref<32x50xbf16, #tpu.memory_space<vmem>>) attributes {dimension_semantics = [#tpu.dimension_semantics<parallel>], iteration_bounds = array<i64: 1>, scalar_prefetch = 0 : i64, scratch_operands = 0 : i64, tpu.core_type = #tpu.core_type<tc>, window_params = [{pipeline_mode = #tpu.pipeline_mode<synchronous>, transform_indices = @transform_0, window_bounds = array<i64: 32, 256>}, {transform_indices = @transform_1, window_bounds = array<i64: 256, 50>}, {pipeline_mode = #tpu.pipeline_mode<synchronous>, transform_indices = @transform_2, window_bounds = array<i64: 32, 1>}, {transform_indices = @transform_3, window_bounds = array<i64: 32, 50>}]} {
    %c0 = arith.constant 0 : index
    %c0_0 = arith.constant 0 : index
    %0 = vector.load %arg1[%c0, %c0_0] : memref<32x256xbf16, #tpu.memory_space<vmem>>, vector<32x256xbf16>
    %c0_1 = arith.constant 0 : index
    %c0_2 = arith.constant 0 : index
    %1 = vector.load %arg2[%c0_1, %c0_2] : memref<256x50xbf16, #tpu.memory_space<vmem>>, vector<256x50xbf16>
    %cst = arith.constant dense<0.000000e+00> : vector<32x50xf32>
    %2 = tpu.matmul %0, %1, %cst {dimension_numbers = #tpu.dot_dimension_numbers<[1], [0], [0], [1], [0, 0, 1, 1], [], []>} : vector<32x256xbf16>, vector<256x50xbf16>, vector<32x50xf32> -> vector<32x50xf32>
    %c0_3 = arith.constant 0 : index
    %c0_4 = arith.constant 0 : index
    %3 = vector.load %arg3[%c0_3, %c0_4] : memref<32x1xf32, #tpu.memory_space<vmem>>, vector<32x1xf32>
    %4 = vector.broadcast %3 : vector<32x1xf32> to vector<32x50xf32>
    %5 = arith.addf %2, %4 : vector<32x50xf32>
    %cst_5 = arith.constant 2.000000e-01 : f32
    %6 = vector.broadcast %cst_5 : f32 to vector<32x50xf32>
    %7 = arith.mulf %6, %5 : vector<32x50xf32>
    %8 = arith.maximumf %5, %7 : vector<32x50xf32>
    %9 = arith.truncf %8 : vector<32x50xf32> to vector<32x50xbf16>
    %c0_6 = arith.constant 0 : index
    %c0_7 = arith.constant 0 : index
    %10 = vector.load %arg4[%c0_6, %c0_7] : memref<32x50xbf16, #tpu.memory_space<vmem>>, vector<32x50xbf16>
    tpu.vector_store %arg4[%c0_6, %c0_7], %9 {strides = array<i32>} : memref<32x50xbf16, #tpu.memory_space<vmem>>, vector<32x50xbf16>,
    return
  }
  func.func @transform_0(%arg0: i32) -> (i32, i32) {
    %c0_i32 = arith.constant 0 : i32
    %c0_i32_0 = arith.constant 0 : i32
    %c0_i32_1 = arith.constant 0 : i32
    return %c0_i32, %c0_i32_0 : i32, i32
  }
  func.func @transform_1(%arg0: i32) -> (i32, i32) {
    %c0_i32 = arith.constant 0 : i32
    %c0_i32_0 = arith.constant 0 : i32
    return %c0_i32, %arg0 : i32, i32
  }
  func.func @transform_2(%arg0: i32) -> (i32, i32) {
    %c0_i32 = arith.constant 0 : i32
    %c0_i32_0 = arith.constant 0 : i32
    %c0_i32_1 = arith.constant 0 : i32
    return %c0_i32, %c0_i32_0 : i32, i32
  }
  func.func @transform_3(%arg0: i32) -> (i32, i32) {
    %c0_i32 = arith.constant 0 : i32
    %c0_i32_0 = arith.constant 0 : i32
    return %c0_i32, %arg0 : i32, i32
  }
}

module attributes {stable_mosaic.version = 11 : i64} {
  func.func @_gemm_bias_act_kernel(%arg0: i32, %arg1: memref<16x512xbf16, #tpu.memory_space<vmem>>, %arg2: memref<512x8xbf16, #tpu.memory_space<vmem>>, %arg3: memref<16x1xf32, #tpu.memory_space<vmem>>, %arg4: memref<16x8xbf16, #tpu.memory_space<vmem>>) attributes {dimension_semantics = [#tpu.dimension_semantics<parallel>], iteration_bounds = array<i64: 1>, scalar_prefetch = 0 : i64, scratch_operands = 0 : i64, tpu.core_type = #tpu.core_type<tc>, window_params = [{pipeline_mode = #tpu.pipeline_mode<synchronous>, transform_indices = @transform_0, window_bounds = array<i64: 16, 512>}, {transform_indices = @transform_1, window_bounds = array<i64: 512, 8>}, {pipeline_mode = #tpu.pipeline_mode<synchronous>, transform_indices = @transform_2, window_bounds = array<i64: 16, 1>}, {transform_indices = @transform_3, window_bounds = array<i64: 16, 8>}]} {
    %c0 = arith.constant 0 : index
    %c0_0 = arith.constant 0 : index
    %0 = vector.load %arg1[%c0, %c0_0] : memref<16x512xbf16, #tpu.memory_space<vmem>>, vector<16x512xbf16>
    %c0_1 = arith.constant 0 : index
    %c0_2 = arith.constant 0 : index
    %1 = vector.load %arg2[%c0_1, %c0_2] : memref<512x8xbf16, #tpu.memory_space<vmem>>, vector<512x8xbf16>
    %cst = arith.constant dense<0.000000e+00> : vector<16x8xf32>
    %2 = tpu.matmul %0, %1, %cst {dimension_numbers = #tpu.dot_dimension_numbers<[1], [0], [0], [1], [0, 0, 1, 1], [], []>} : vector<16x512xbf16>, vector<512x8xbf16>, vector<16x8xf32> -> vector<16x8xf32>
    %c0_3 = arith.constant 0 : index
    %c0_4 = arith.constant 0 : index
    %3 = vector.load %arg3[%c0_3, %c0_4] : memref<16x1xf32, #tpu.memory_space<vmem>>, vector<16x1xf32>
    %4 = vector.broadcast %3 : vector<16x1xf32> to vector<16x8xf32>
    %5 = arith.addf %2, %4 : vector<16x8xf32>
    %cst_5 = arith.constant 2.000000e-01 : f32
    %6 = vector.broadcast %cst_5 : f32 to vector<16x8xf32>
    %7 = arith.mulf %6, %5 : vector<16x8xf32>
    %8 = arith.maximumf %5, %7 : vector<16x8xf32>
    %9 = arith.truncf %8 : vector<16x8xf32> to vector<16x8xbf16>
    %c0_6 = arith.constant 0 : index
    %c0_7 = arith.constant 0 : index
    %10 = vector.load %arg4[%c0_6, %c0_7] : memref<16x8xbf16, #tpu.memory_space<vmem>>, vector<16x8xbf16>
    tpu.vector_store %arg4[%c0_6, %c0_7], %9 {strides = array<i32>} : memref<16x8xbf16, #tpu.memory_space<vmem>>, vector<16x8xbf16>,
    return
  }
  func.func @transform_0(%arg0: i32) -> (i32, i32) {
    %c0_i32 = arith.constant 0 : i32
    %c0_i32_0 = arith.constant 0 : i32
    %c0_i32_1 = arith.constant 0 : i32
    return %c0_i32, %c0_i32_0 : i32, i32
  }
  func.func @transform_1(%arg0: i32) -> (i32, i32) {
    %c0_i32 = arith.constant 0 : i32
    %c0_i32_0 = arith.constant 0 : i32
    return %c0_i32, %arg0 : i32, i32
  }
  func.func @transform_2(%arg0: i32) -> (i32, i32) {
    %c0_i32 = arith.constant 0 : i32
    %c0_i32_0 = arith.constant 0 : i32
    %c0_i32_1 = arith.constant 0 : i32
    return %c0_i32, %c0_i32_0 : i32, i32
  }
  func.func @transform_3(%arg0: i32) -> (i32, i32) {
    %c0_i32 = arith.constant 0 : i32
    %c0_i32_0 = arith.constant 0 : i32
    return %c0_i32, %arg0 : i32, i32
  }
}

module attributes {stable_mosaic.version = 11 : i64} {
  func.func @_gemm_bias_act_kernel(%arg0: i32, %arg1: memref<8x256xbf16, #tpu.memory_space<vmem>>, %arg2: memref<256x8xbf16, #tpu.memory_space<vmem>>, %arg3: memref<8x1xf32, #tpu.memory_space<vmem>>, %arg4: memref<8x8xbf16, #tpu.memory_space<vmem>>) attributes {dimension_semantics = [#tpu.dimension_semantics<parallel>], iteration_bounds = array<i64: 1>, scalar_prefetch = 0 : i64, scratch_operands = 0 : i64, tpu.core_type = #tpu.core_type<tc>, window_params = [{pipeline_mode = #tpu.pipeline_mode<synchronous>, transform_indices = @transform_0, window_bounds = array<i64: 8, 256>}, {transform_indices = @transform_1, window_bounds = array<i64: 256, 8>}, {pipeline_mode = #tpu.pipeline_mode<synchronous>, transform_indices = @transform_2, window_bounds = array<i64: 8, 1>}, {transform_indices = @transform_3, window_bounds = array<i64: 8, 8>}]} {
    %c0 = arith.constant 0 : index
    %c0_0 = arith.constant 0 : index
    %0 = vector.load %arg1[%c0, %c0_0] : memref<8x256xbf16, #tpu.memory_space<vmem>>, vector<8x256xbf16>
    %c0_1 = arith.constant 0 : index
    %c0_2 = arith.constant 0 : index
    %1 = vector.load %arg2[%c0_1, %c0_2] : memref<256x8xbf16, #tpu.memory_space<vmem>>, vector<256x8xbf16>
    %cst = arith.constant dense<0.000000e+00> : vector<8x8xf32>
    %2 = tpu.matmul %0, %1, %cst {dimension_numbers = #tpu.dot_dimension_numbers<[1], [0], [0], [1], [0, 0, 1, 1], [], []>} : vector<8x256xbf16>, vector<256x8xbf16>, vector<8x8xf32> -> vector<8x8xf32>
    %c0_3 = arith.constant 0 : index
    %c0_4 = arith.constant 0 : index
    %3 = vector.load %arg3[%c0_3, %c0_4] : memref<8x1xf32, #tpu.memory_space<vmem>>, vector<8x1xf32>
    %4 = vector.broadcast %3 : vector<8x1xf32> to vector<8x8xf32>
    %5 = arith.addf %2, %4 : vector<8x8xf32>
    %cst_5 = arith.constant 2.000000e-01 : f32
    %6 = vector.broadcast %cst_5 : f32 to vector<8x8xf32>
    %7 = arith.mulf %6, %5 : vector<8x8xf32>
    %8 = arith.maximumf %5, %7 : vector<8x8xf32>
    %9 = arith.truncf %8 : vector<8x8xf32> to vector<8x8xbf16>
    %c0_6 = arith.constant 0 : index
    %c0_7 = arith.constant 0 : index
    %10 = vector.load %arg4[%c0_6, %c0_7] : memref<8x8xbf16, #tpu.memory_space<vmem>>, vector<8x8xbf16>
    tpu.vector_store %arg4[%c0_6, %c0_7], %9 {strides = array<i32>} : memref<8x8xbf16, #tpu.memory_space<vmem>>, vector<8x8xbf16>,
    return
  }
  func.func @transform_0(%arg0: i32) -> (i32, i32) {
    %c0_i32 = arith.constant 0 : i32
    %c0_i32_0 = arith.constant 0 : i32
    %c0_i32_1 = arith.constant 0 : i32
    return %c0_i32, %c0_i32_0 : i32, i32
  }
  func.func @transform_1(%arg0: i32) -> (i32, i32) {
    %c0_i32 = arith.constant 0 : i32
    %c0_i32_0 = arith.constant 0 : i32
    return %c0_i32, %arg0 : i32, i32
  }
  func.func @transform_2(%arg0: i32) -> (i32, i32) {
    %c0_i32 = arith.constant 0 : i32
    %c0_i32_0 = arith.constant 0 : i32
    %c0_i32_1 = arith.constant 0 : i32
    return %c0_i32, %c0_i32_0 : i32, i32
  }
  func.func @transform_3(%arg0: i32) -> (i32, i32) {
    %c0_i32 = arith.constant 0 : i32
    %c0_i32_0 = arith.constant 0 : i32
    return %c0_i32, %arg0 : i32, i32
  }
}

module attributes {stable_mosaic.version = 11 : i64} {
  func.func @_gemm_bias_act_kernel(%arg0: i32, %arg1: memref<4x128xbf16, #tpu.memory_space<vmem>>, %arg2: memref<128x8xbf16, #tpu.memory_space<vmem>>, %arg3: memref<4x1xf32, #tpu.memory_space<vmem>>, %arg4: memref<4x8xbf16, #tpu.memory_space<vmem>>) attributes {dimension_semantics = [#tpu.dimension_semantics<parallel>], iteration_bounds = array<i64: 1>, scalar_prefetch = 0 : i64, scratch_operands = 0 : i64, tpu.core_type = #tpu.core_type<tc>, window_params = [{pipeline_mode = #tpu.pipeline_mode<synchronous>, transform_indices = @transform_0, window_bounds = array<i64: 4, 128>}, {transform_indices = @transform_1, window_bounds = array<i64: 128, 8>}, {pipeline_mode = #tpu.pipeline_mode<synchronous>, transform_indices = @transform_2, window_bounds = array<i64: 4, 1>}, {transform_indices = @transform_3, window_bounds = array<i64: 4, 8>}]} {
    %c0 = arith.constant 0 : index
    %c0_0 = arith.constant 0 : index
    %0 = vector.load %arg1[%c0, %c0_0] : memref<4x128xbf16, #tpu.memory_space<vmem>>, vector<4x128xbf16>
    %c0_1 = arith.constant 0 : index
    %c0_2 = arith.constant 0 : index
    %1 = vector.load %arg2[%c0_1, %c0_2] : memref<128x8xbf16, #tpu.memory_space<vmem>>, vector<128x8xbf16>
    %cst = arith.constant dense<0.000000e+00> : vector<4x8xf32>
    %2 = tpu.matmul %0, %1, %cst {dimension_numbers = #tpu.dot_dimension_numbers<[1], [0], [0], [1], [0, 0, 1, 1], [], []>} : vector<4x128xbf16>, vector<128x8xbf16>, vector<4x8xf32> -> vector<4x8xf32>
    %c0_3 = arith.constant 0 : index
    %c0_4 = arith.constant 0 : index
    %3 = vector.load %arg3[%c0_3, %c0_4] : memref<4x1xf32, #tpu.memory_space<vmem>>, vector<4x1xf32>
    %4 = vector.broadcast %3 : vector<4x1xf32> to vector<4x8xf32>
    %5 = arith.addf %2, %4 : vector<4x8xf32>
    %cst_5 = arith.constant 2.000000e-01 : f32
    %6 = vector.broadcast %cst_5 : f32 to vector<4x8xf32>
    %7 = arith.mulf %6, %5 : vector<4x8xf32>
    %8 = arith.maximumf %5, %7 : vector<4x8xf32>
    %9 = arith.truncf %8 : vector<4x8xf32> to vector<4x8xbf16>
    %c0_6 = arith.constant 0 : index
    %c0_7 = arith.constant 0 : index
    %10 = vector.load %arg4[%c0_6, %c0_7] : memref<4x8xbf16, #tpu.memory_space<vmem>>, vector<4x8xbf16>
    tpu.vector_store %arg4[%c0_6, %c0_7], %9 {strides = array<i32>} : memref<4x8xbf16, #tpu.memory_space<vmem>>, vector<4x8xbf16>,
    return
  }
  func.func @transform_0(%arg0: i32) -> (i32, i32) {
    %c0_i32 = arith.constant 0 : i32
    %c0_i32_0 = arith.constant 0 : i32
    %c0_i32_1 = arith.constant 0 : i32
    return %c0_i32, %c0_i32_0 : i32, i32
  }
  func.func @transform_1(%arg0: i32) -> (i32, i32) {
    %c0_i32 = arith.constant 0 : i32
    %c0_i32_0 = arith.constant 0 : i32
    return %c0_i32, %arg0 : i32, i32
  }
  func.func @transform_2(%arg0: i32) -> (i32, i32) {
    %c0_i32 = arith.constant 0 : i32
    %c0_i32_0 = arith.constant 0 : i32
    %c0_i32_1 = arith.constant 0 : i32
    return %c0_i32, %c0_i32_0 : i32, i32
  }
  func.func @transform_3(%arg0: i32) -> (i32, i32) {
    %c0_i32 = arith.constant 0 : i32
    %c0_i32_0 = arith.constant 0 : i32
    return %c0_i32, %arg0 : i32, i32
  }
}

module attributes {stable_mosaic.version = 11 : i64} {
  func.func @_gemm_bias_act_kernel(%arg0: i32, %arg1: memref<3x64xbf16, #tpu.memory_space<vmem>>, %arg2: memref<64x2xbf16, #tpu.memory_space<vmem>>, %arg3: memref<3x1xf32, #tpu.memory_space<vmem>>, %arg4: memref<3x2xf32, #tpu.memory_space<vmem>>) attributes {dimension_semantics = [#tpu.dimension_semantics<parallel>], iteration_bounds = array<i64: 1>, scalar_prefetch = 0 : i64, scratch_operands = 0 : i64, tpu.core_type = #tpu.core_type<tc>, window_params = [{pipeline_mode = #tpu.pipeline_mode<synchronous>, transform_indices = @transform_0, window_bounds = array<i64: 3, 64>}, {transform_indices = @transform_1, window_bounds = array<i64: 64, 2>}, {pipeline_mode = #tpu.pipeline_mode<synchronous>, transform_indices = @transform_2, window_bounds = array<i64: 3, 1>}, {transform_indices = @transform_3, window_bounds = array<i64: 3, 2>}]} {
    %c0 = arith.constant 0 : index
    %c0_0 = arith.constant 0 : index
    %0 = vector.load %arg1[%c0, %c0_0] : memref<3x64xbf16, #tpu.memory_space<vmem>>, vector<3x64xbf16>
    %c0_1 = arith.constant 0 : index
    %c0_2 = arith.constant 0 : index
    %1 = vector.load %arg2[%c0_1, %c0_2] : memref<64x2xbf16, #tpu.memory_space<vmem>>, vector<64x2xbf16>
    %cst = arith.constant dense<0.000000e+00> : vector<3x2xf32>
    %2 = tpu.matmul %0, %1, %cst {dimension_numbers = #tpu.dot_dimension_numbers<[1], [0], [0], [1], [0, 0, 1, 1], [], []>} : vector<3x64xbf16>, vector<64x2xbf16>, vector<3x2xf32> -> vector<3x2xf32>
    %c0_3 = arith.constant 0 : index
    %c0_4 = arith.constant 0 : index
    %3 = vector.load %arg3[%c0_3, %c0_4] : memref<3x1xf32, #tpu.memory_space<vmem>>, vector<3x1xf32>
    %4 = vector.broadcast %3 : vector<3x1xf32> to vector<3x2xf32>
    %5 = arith.addf %2, %4 : vector<3x2xf32>
    %6 = math.tanh %5 : vector<3x2xf32>
    %c0_5 = arith.constant 0 : index
    %c0_6 = arith.constant 0 : index
    %7 = vector.load %arg4[%c0_5, %c0_6] : memref<3x2xf32, #tpu.memory_space<vmem>>, vector<3x2xf32>
    tpu.vector_store %arg4[%c0_5, %c0_6], %6 {strides = array<i32>} : memref<3x2xf32, #tpu.memory_space<vmem>>, vector<3x2xf32>,
    return
  }
  func.func @transform_0(%arg0: i32) -> (i32, i32) {
    %c0_i32 = arith.constant 0 : i32
    %c0_i32_0 = arith.constant 0 : i32
    %c0_i32_1 = arith.constant 0 : i32
    return %c0_i32, %c0_i32_0 : i32, i32
  }
  func.func @transform_1(%arg0: i32) -> (i32, i32) {
    %c0_i32 = arith.constant 0 : i32
    %c0_i32_0 = arith.constant 0 : i32
    return %c0_i32, %arg0 : i32, i32
  }
  func.func @transform_2(%arg0: i32) -> (i32, i32) {
    %c0_i32 = arith.constant 0 : i32
    %c0_i32_0 = arith.constant 0 : i32
    %c0_i32_1 = arith.constant 0 : i32
    return %c0_i32, %c0_i32_0 : i32, i32
  }
  func.func @transform_3(%arg0: i32) -> (i32, i32) {
    %c0_i32 = arith.constant 0 : i32
    %c0_i32_0 = arith.constant 0 : i32
    return %c0_i32, %arg0 : i32, i32
  }
}

</mosaic_0001>

<bundles_post_ra>
// kernel: generator_forward.9
= control target key start
LH: loop header
LB: loop body
LE: loop exit
PB: predicated region body
PF: predicated region fallthrough
CT: control target
= control target key end

     0   :  { %s3439_s12 = smov 0   ;;  %s3441_s13 = smov 0   ;;  %s4125_s0 = inlined_call_operand.vmem [shape: bf16[4,48], index: 0, kind: input, shape index: {}]   ;;  %s4126_s1 = inlined_call_operand.vmem [shape: bf16[48,12800], index: 1, kind: input, shape index: {}]   ;;  %s4127_s2 = inlined_call_operand.vmem [shape: f32[4,1], index: 2, kind: input, shape index: {}]   ;;  %s4128_s3 = inlined_call_operand.vmem [shape: bf16[4,12800], index: 3, kind: output, shape index: {}]  }
   0x1   :  { %s3443_s14 = smov 0  }
   0x2 LB: > { %s2928_s15 = sadd.s32 4294967295, %s3415_s14   ;;  %s3456_s16 = sadd.s32 1, %s3415_s14   ;;  %s3415_s14 = sphi %s3443_s14, %s4131_s14   ;;  %s3411_s13 = sphi %s3441_s13, %s4130_s13   ;;  %s3407_s12 = sphi %s3439_s12, %s4129_s12  }
   0x3   : > { %s38_s17 = ssub.s32 %s3415_s14, %s3456_s16  ;;  %s41_s18 = sadd.s32 1, %s3411_s13 }
   0x4   : > { %p39_p0 = scmp.eq.s32.totalorder %s38_s17, 0  ;;  %p48_p1 = scmp.ne.s32.totalorder %s3411_s13, %s3407_s12 }
   0x5   : > { %p49_p2 = scmp.eq.s32.totalorder %s3415_s14, 0  ;;  %p2931_p4 = scmp.ge.s32.totalorder %s3415_s14, 2 }
   0x6   : > { %s3465_s19 = scalar_select %p39_p0, %s3411_s13, %s41_s18  }
   0x7   : > { %p50_p3 = por %p49_p2, %p48_p1  ;;  %127 = sbr.rel (%p2931_p4) target bundleno = 94 (0x5e), region = 24 }
   0xe   : > { %130 = sbr.rel (!%p50_p3) target bundleno = 94 (0x5e), region = 28  ;;  %s132_s20 = sand.u32 (%p50_p3), 1, %s3411_s13  }
   0xf   : > { %s3138_s21 = smul.u32 (%p50_p3), 200, %s3415_s14 }
  0x10   : > { %s3139_s22 = smul.u32 (%p50_p3), 1200, %s132_s20 }
  0x11   : > { %s3473_s25 = scalar_lea.vmem (%p50_p3), %s4126_s1, %s3138_s21 }
  0x12   : > { %v150_v0 = vld [vmem:[%s3473_s25] sm:$0xff] (%p50_p3)  ;;  %v152_v1 = vld [vmem:[%s3473_s25 + $0x8] sm:$0xff] (%p50_p3)  ;;  %v154_v2 = vld [vmem:[%s3473_s25 + $0x10] sm:$0xff] (%p50_p3)  ;;  %s3478_s26 = scalar_lea.vmem (%p50_p3), [#allocation2], %s3139_s22 }
  0x13   : > { %151 = vst [vmem:[%s3478_s26] sm:$0xff] (%p50_p3), %v150_v0  ;;  %153 = vst [vmem:[%s3478_s26 + $0x8] sm:$0xff] (%p50_p3), %v152_v1  ;;  %v156_v3 = vld [vmem:[%s3473_s25 + $0x18] sm:$0xff] (%p50_p3)  ;;  %v158_v4 = vld [vmem:[%s3473_s25 + $0x20] sm:$0xff] (%p50_p3) }
  0x14   : > { %155 = vst [vmem:[%s3478_s26 + $0x10] sm:$0xff] (%p50_p3), %v154_v2  ;;  %v160_v5 = vld [vmem:[%s3473_s25 + $0x28] sm:$0xff] (%p50_p3)  ;;  %157 = vst [vmem:[%s3478_s26 + $0x18] sm:$0xff] (%p50_p3), %v156_v3  ;;  %v162_v6 = vld [vmem:[%s3473_s25 + $0x30] sm:$0xff] (%p50_p3) }
  0x15   : > { %159 = vst [vmem:[%s3478_s26 + $0x20] sm:$0xff] %v158_v4  ;;  %161 = vst [vmem:[%s3478_s26 + $0x28] sm:$0xff] %v160_v5  ;;  %v164_v7 = vld [vmem:[%s3473_s25 + $0x38] sm:$0xff]  ;;  %v166_v8 = vld [vmem:[%s3473_s25 + $0x40] sm:$0xff] }
  0x16   : > { %163 = vst [vmem:[%s3478_s26 + $0x30] sm:$0xff] %v162_v6  ;;  %165 = vst [vmem:[%s3478_s26 + $0x38] sm:$0xff] %v164_v7  ;;  %v168_v9 = vld [vmem:[%s3473_s25 + $0x48] sm:$0xff]  ;;  %v170_v10 = vld [vmem:[%s3473_s25 + $0x50] sm:$0xff] }
  0x17   : > { %167 = vst [vmem:[%s3478_s26 + $0x40] sm:$0xff] %v166_v8  ;;  %v172_v11 = vld [vmem:[%s3473_s25 + $0x58] sm:$0xff]  ;;  %169 = vst [vmem:[%s3478_s26 + $0x48] sm:$0xff] %v168_v9  ;;  %v174_v12 = vld [vmem:[%s3473_s25 + $0x60] sm:$0xff] }
  0x18   : > { %171 = vst [vmem:[%s3478_s26 + $0x50] sm:$0xff] %v170_v10  ;;  %173 = vst [vmem:[%s3478_s26 + $0x58] sm:$0xff] %v172_v11  ;;  %v176_v13 = vld [vmem:[%s3473_s25 + $0x68] sm:$0xff]  ;;  %v178_v14 = vld [vmem:[%s3473_s25 + $0x70] sm:$0xff] }
  0x19   : > { %175 = vst [vmem:[%s3478_s26 + $0x60] sm:$0xff] %v174_v12  ;;  %177 = vst [vmem:[%s3478_s26 + $0x68] sm:$0xff] %v176_v13  ;;  %v180_v15 = vld [vmem:[%s3473_s25 + $0x78] sm:$0xff]  ;;  %v182_v16 = vld [vmem:[%s3473_s25 + $0x80] sm:$0xff] }
  0x1a   : > { %179 = vst [vmem:[%s3478_s26 + $0x70] sm:$0xff] %v178_v14  ;;  %v184_v17 = vld [vmem:[%s3473_s25 + $0x88] sm:$0xff]  ;;  %181 = vst [vmem:[%s3478_s26 + $0x78] sm:$0xff] %v180_v15  ;;  %v186_v18 = vld [vmem:[%s3473_s25 + $0x90] sm:$0xff] }
  0x1b   : > { %183 = vst [vmem:[%s3478_s26 + $0x80] sm:$0xff] %v182_v16  ;;  %185 = vst [vmem:[%s3478_s26 + $0x88] sm:$0xff] %v184_v17  ;;  %v188_v19 = vld [vmem:[%s3473_s25 + $0x98] sm:$0xff]  ;;  %v190_v20 = vld [vmem:[%s3473_s25 + $0xa0] sm:$0xff] }
  0x1c   : > { %187 = vst [vmem:[%s3478_s26 + $0x90] sm:$0xff] %v186_v18  ;;  %189 = vst [vmem:[%s3478_s26 + $0x98] sm:$0xff] %v188_v19  ;;  %v192_v21 = vld [vmem:[%s3473_s25 + $0xa8] sm:$0xff]  ;;  %v194_v22 = vld [vmem:[%s3473_s25 + $0xb0] sm:$0xff] }
  0x1d   : > { %191 = vst [vmem:[%s3478_s26 + $0xa0] sm:$0xff] %v190_v20  ;;  %v196_v23 = vld [vmem:[%s3473_s25 + $0xb8] sm:$0xff]  ;;  %193 = vst [vmem:[%s3478_s26 + $0xa8] sm:$0xff] %v192_v21  ;;  %v198_v24 = vld [vmem:[%s3473_s25 + $0xc0] sm:$0xff] }
  0x1e   : > { %195 = vst [vmem:[%s3478_s26 + $0xb0] sm:$0xff] %v194_v22  ;;  %197 = vst [vmem:[%s3478_s26 + $0xb8] sm:$0xff] %v196_v23  ;;  %v200_v25 = vld [vmem:[%s3473_s25 + $0x190] sm:$0xff]  ;;  %v202_v26 = vld [vmem:[%s3473_s25 + $0x198] sm:$0xff] }
  0x1f   : > { %199 = vst [vmem:[%s3478_s26 + $0xc0] sm:$0xff] %v198_v24  ;;  %201 = vst [vmem:[%s3478_s26 + $0xc8] sm:$0xff] %v200_v25  ;;  %v204_v27 = vld [vmem:[%s3473_s25 + $0x1a0] sm:$0xff]  ;;  %v206_v28 = vld [vmem:[%s3473_s25 + $0x1a8] sm:$0xff] }
  0x20   : > { %203 = vst [vmem:[%s3478_s26 + $0xd0] sm:$0xff] %v202_v26  ;;  %v208_v29 = vld [vmem:[%s3473_s25 + $0x1b0] sm:$0xff]  ;;  %205 = vst [vmem:[%s3478_s26 + $0xd8] sm:$0xff] %v204_v27  ;;  %v210_v30 = vld [vmem:[%s3473_s25 + $0x1b8] sm:$0xff] }
  0x21   : > { %207 = vst [vmem:[%s3478_s26 + $0xe0] sm:$0xff] %v206_v28  ;;  %209 = vst [vmem:[%s3478_s26 + $0xe8] sm:$0xff] %v208_v29  ;;  %v212_v31 = vld [vmem:[%s3473_s25 + $0x1c0] sm:$0xff]  ;;  %v214_v32 = vld [vmem:[%s3473_s25 + $0x1c8] sm:$0xff] }
  0x22   : > { %211 = vst [vmem:[%s3478_s26 + $0xf0] sm:$0xff] %v210_v30  ;;  %213 = vst [vmem:[%s3478_s26 + $0xf8] sm:$0xff] %v212_v31  ;;  %v216_v33 = vld [vmem:[%s3473_s25 + $0x1d0] sm:$0xff]  ;;  %v218_v34 = vld [vmem:[%s3473_s25 + $0x1d8] sm:$0xff] }
  0x23   : > { %215 = vst [vmem:[%s3478_s26 + $0x100] sm:$0xff] %v214_v32  ;;  %v220_v35 = vld [vmem:[%s3473_s25 + $0x1e0] sm:$0xff]  ;;  %217 = vst [vmem:[%s3478_s26 + $0x108] sm:$0xff] %v216_v33  ;;  %v222_v36 = vld [vmem:[%s3473_s25 + $0x1e8] sm:$0xff] }
  0x24   : > { %219 = vst [vmem:[%s3478_s26 + $0x110] sm:$0xff] %v218_v34  ;;  %221 = vst [vmem:[%s3478_s26 + $0x118] sm:$0xff] %v220_v35  ;;  %v224_v37 = vld [vmem:[%s3473_s25 + $0x1f0] sm:$0xff]  ;;  %v226_v38 = vld [vmem:[%s3473_s25 + $0x1f8] sm:$0xff] }
  0x25   : > { %223 = vst [vmem:[%s3478_s26 + $0x120] sm:$0xff] %v222_v36  ;;  %225 = vst [vmem:[%s3478_s26 + $0x128] sm:$0xff] %v224_v37  ;;  %v228_v39 = vld [vmem:[%s3473_s25 + $0x200] sm:$0xff]  ;;  %v230_v40 = vld [vmem:[%s3473_s25 + $0x208] sm:$0xff] }
  0x26   : > { %227 = vst [vmem:[%s3478_s26 + $0x130] sm:$0xff] %v226_v38  ;;  %v232_v41 = vld [vmem:[%s3473_s25 + $0x210] sm:$0xff]  ;;  %229 = vst [vmem:[%s3478_s26 + $0x138] sm:$0xff] %v228_v39  ;;  %v234_v42 = vld [vmem:[%s3473_s25 + $0x218] sm:$0xff] }
  0x27   : > { %231 = vst [vmem:[%s3478_s26 + $0x140] sm:$0xff] %v230_v40  ;;  %233 = vst [vmem:[%s3478_s26 + $0x148] sm:$0xff] %v232_v41  ;;  %v236_v43 = vld [vmem:[%s3473_s25 + $0x220] sm:$0xff]  ;;  %v238_v44 = vld [vmem:[%s3473_s25 + $0x228] sm:$0xff] }
  0x28   : > { %235 = vst [vmem:[%s3478_s26 + $0x150] sm:$0xff] %v234_v42  ;;  %237 = vst [vmem:[%s3478_s26 + $0x158] sm:$0xff] %v236_v43  ;;  %v240_v45 = vld [vmem:[%s3473_s25 + $0x230] sm:$0xff]  ;;  %v242_v46 = vld [vmem:[%s3473_s25 + $0x238] sm:$0xff] }
  0x29   : > { %239 = vst [vmem:[%s3478_s26 + $0x160] sm:$0xff] %v238_v44  ;;  %v244_v47 = vld [vmem:[%s3473_s25 + $0x240] sm:$0xff]  ;;  %241 = vst [vmem:[%s3478_s26 + $0x168] sm:$0xff] %v240_v45  ;;  %v246_v48 = vld [vmem:[%s3473_s25 + $0x248] sm:$0xff] }
  0x2a   : > { %243 = vst [vmem:[%s3478_s26 + $0x170] sm:$0xff] %v242_v46  ;;  %245 = vst [vmem:[%s3478_s26 + $0x178] sm:$0xff] %v244_v47  ;;  %v248_v49 = vld [vmem:[%s3473_s25 + $0x250] sm:$0xff]  ;;  %v250_v50 = vld [vmem:[%s3473_s25 + $0x320] sm:$0xff] }
  0x2b   : > { %247 = vst [vmem:[%s3478_s26 + $0x180] sm:$0xff] %v246_v48  ;;  %249 = vst [vmem:[%s3478_s26 + $0x188] sm:$0xff] %v248_v49  ;;  %v252_v51 = vld [vmem:[%s3473_s25 + $0x328] sm:$0xff]  ;;  %v254_v52 = vld [vmem:[%s3473_s25 + $0x330] sm:$0xff] }
  0x2c   : > { %251 = vst [vmem:[%s3478_s26 + $0x190] sm:$0xff] %v250_v50  ;;  %v256_v53 = vld [vmem:[%s3473_s25 + $0x338] sm:$0xff]  ;;  %253 = vst [vmem:[%s3478_s26 + $0x198] sm:$0xff] %v252_v51  ;;  %v258_v54 = vld [vmem:[%s3473_s25 + $0x340] sm:$0xff] }
  0x2d   : > { %255 = vst [vmem:[%s3478_s26 + $0x1a0] sm:$0xff] %v254_v52  ;;  %257 = vst [vmem:[%s3478_s26 + $0x1a8] sm:$0xff] %v256_v53  ;;  %v260_v55 = vld [vmem:[%s3473_s25 + $0x348] sm:$0xff]  ;;  %v262_v56 = vld [vmem:[%s3473_s25 + $0x350] sm:$0xff] }
  0x2e   : > { %259 = vst [vmem:[%s3478_s26 + $0x1b0] sm:$0xff] %v258_v54  ;;  %261 = vst [vmem:[%s3478_s26 + $0x1b8] sm:$0xff] %v260_v55  ;;  %v264_v57 = vld [vmem:[%s3473_s25 + $0x358] sm:$0xff]  ;;  %v266_v58 = vld [vmem:[%s3473_s25 + $0x360] sm:$0xff] }
  0x2f   : > { %263 = vst [vmem:[%s3478_s26 + $0x1c0] sm:$0xff] %v262_v56  ;;  %v268_v59 = vld [vmem:[%s3473_s25 + $0x368] sm:$0xff]  ;;  %265 = vst [vmem:[%s3478_s26 + $0x1c8] sm:$0xff] %v264_v57  ;;  %v270_v60 = vld [vmem:[%s3473_s25 + $0x370] sm:$0xff] }
  0x30   : > { %267 = vst [vmem:[%s3478_s26 + $0x1d0] sm:$0xff] %v266_v58  ;;  %269 = vst [vmem:[%s3478_s26 + $0x1d8] sm:$0xff] %v268_v59  ;;  %v272_v61 = vld [vmem:[%s3473_s25 + $0x378] sm:$0xff]  ;;  %v274_v62 = vld [vmem:[%s3473_s25 + $0x380] sm:$0xff] }
  0x31   : > { %271 = vst [vmem:[%s3478_s26 + $0x1e0] sm:$0xff] %v270_v60  ;;  %273 = vst [vmem:[%s3478_s26 + $0x1e8] sm:$0xff] %v272_v61  ;;  %v276_v63 = vld [vmem:[%s3473_s25 + $0x388] sm:$0xff]  ;;  %v278_v0 = vld [vmem:[%s3473_s25 + $0x390] sm:$0xff] }
  0x32   : > { %275 = vst [vmem:[%s3478_s26 + $0x1f0] sm:$0xff] %v274_v62  ;;  %v280_v1 = vld [vmem:[%s3473_s25 + $0x398] sm:$0xff]  ;;  %277 = vst [vmem:[%s3478_s26 + $0x1f8] sm:$0xff] %v276_v63  ;;  %v282_v2 = vld [vmem:[%s3473_s25 + $0x3a0] sm:$0xff] }
  0x33   : > { %279 = vst [vmem:[%s3478_s26 + $0x200] sm:$0xff] %v278_v0  ;;  %281 = vst [vmem:[%s3478_s26 + $0x208] sm:$0xff] %v280_v1  ;;  %v284_v3 = vld [vmem:[%s3473_s25 + $0x3a8] sm:$0xff]  ;;  %v286_v4 = vld [vmem:[%s3473_s25 + $0x3b0] sm:$0xff] }
  0x34   : > { %283 = vst [vmem:[%s3478_s26 + $0x210] sm:$0xff] %v282_v2  ;;  %285 = vst [vmem:[%s3478_s26 + $0x218] sm:$0xff] %v284_v3  ;;  %v288_v5 = vld [vmem:[%s3473_s25 + $0x3b8] sm:$0xff]  ;;  %v290_v6 = vld [vmem:[%s3473_s25 + $0x3c0] sm:$0xff] }
  0x35   : > { %287 = vst [vmem:[%s3478_s26 + $0x220] sm:$0xff] %v286_v4  ;;  %v292_v7 = vld [vmem:[%s3473_s25 + $0x3c8] sm:$0xff]  ;;  %289 = vst [vmem:[%s3478_s26 + $0x228] sm:$0xff] %v288_v5  ;;  %v294_v8 = vld [vmem:[%s3473_s25 + $0x3d0] sm:$0xff] }
  0x36   : > { %291 = vst [vmem:[%s3478_s26 + $0x230] sm:$0xff] %v290_v6  ;;  %293 = vst [vmem:[%s3478_s26 + $0x238] sm:$0xff] %v292_v7  ;;  %v296_v9 = vld [vmem:[%s3473_s25 + $0x3d8] sm:$0xff]  ;;  %v298_v10 = vld [vmem:[%s3473_s25 + $0x3e0] sm:$0xff] }
  0x37   : > { %295 = vst [vmem:[%s3478_s26 + $0x240] sm:$0xff] %v294_v8  ;;  %297 = vst [vmem:[%s3478_s26 + $0x248] sm:$0xff] %v296_v9  ;;  %v300_v11 = vld [vmem:[%s3473_s25 + $0x4b0] sm:$0xff]  ;;  %v302_v12 = vld [vmem:[%s3473_s25 + $0x4b8] sm:$0xff] }
  0x38   : > { %299 = vst [vmem:[%s3478_s26 + $0x250] sm:$0xff] %v298_v10  ;;  %v304_v13 = vld [vmem:[%s3473_s25 + $0x4c0] sm:$0xff]  ;;  %301 = vst [vmem:[%s3478_s26 + $0x258] sm:$0xff] %v300_v11  ;;  %v306_v14 = vld [vmem:[%s3473_s25 + $0x4c8] sm:$0xff] }
  0x39   : > { %303 = vst [vmem:[%s3478_s26 + $0x260] sm:$0xff] %v302_v12  ;;  %305 = vst [vmem:[%s3478_s26 + $0x268] sm:$0xff] %v304_v13  ;;  %v308_v15 = vld [vmem:[%s3473_s25 + $0x4d0] sm:$0xff]  ;;  %v310_v16 = vld [vmem:[%s3473_s25 + $0x4d8] sm:$0xff] }
  0x3a   : > { %307 = vst [vmem:[%s3478_s26 + $0x270] sm:$0xff] %v306_v14  ;;  %309 = vst [vmem:[%s3478_s26 + $0x278] sm:$0xff] %v308_v15  ;;  %v312_v17 = vld [vmem:[%s3473_s25 + $0x4e0] sm:$0xff]  ;;  %v314_v18 = vld [vmem:[%s3473_s25 + $0x4e8] sm:$0xff] }
  0x3b   : > { %311 = vst [vmem:[%s3478_s26 + $0x280] sm:$0xff] %v310_v16  ;;  %v316_v19 = vld [vmem:[%s3473_s25 + $0x4f0] sm:$0xff]  ;;  %313 = vst [vmem:[%s3478_s26 + $0x288] sm:$0xff] %v312_v17  ;;  %v318_v20 = vld [vmem:[%s3473_s25 + $0x4f8] sm:$0xff] }
  0x3c   : > { %315 = vst [vmem:[%s3478_s26 + $0x290] sm:$0xff] %v314_v18  ;;  %317 = vst [vmem:[%s3478_s26 + $0x298] sm:$0xff] %v316_v19  ;;  %v320_v21 = vld [vmem:[%s3473_s25 + $0x500] sm:$0xff]  ;;  %v322_v22 = vld [vmem:[%s3473_s25 + $0x508] sm:$0xff] }
  0x3d   : > { %319 = vst [vmem:[%s3478_s26 + $0x2a0] sm:$0xff] %v318_v20  ;;  %321 = vst [vmem:[%s3478_s26 + $0x2a8] sm:$0xff] %v320_v21  ;;  %v324_v23 = vld [vmem:[%s3473_s25 + $0x510] sm:$0xff]  ;;  %v326_v24 = vld [vmem:[%s3473_s25 + $0x518] sm:$0xff] }
  0x3e   : > { %323 = vst [vmem:[%s3478_s26 + $0x2b0] sm:$0xff] %v322_v22  ;;  %v328_v25 = vld [vmem:[%s3473_s25 + $0x520] sm:$0xff]  ;;  %325 = vst [vmem:[%s3478_s26 + $0x2b8] sm:$0xff] %v324_v23  ;;  %v330_v26 = vld [vmem:[%s3473_s25 + $0x528] sm:$0xff] }
  0x3f   : > { %327 = vst [vmem:[%s3478_s26 + $0x2c0] sm:$0xff] %v326_v24  ;;  %329 = vst [vmem:[%s3478_s26 + $0x2c8] sm:$0xff] %v328_v25  ;;  %v332_v27 = vld [vmem:[%s3473_s25 + $0x530] sm:$0xff]  ;;  %v334_v28 = vld [vmem:[%s3473_s25 + $0x538] sm:$0xff] }
  0x40   : > { %331 = vst [vmem:[%s3478_s26 + $0x2d0] sm:$0xff] %v330_v26  ;;  %333 = vst [vmem:[%s3478_s26 + $0x2d8] sm:$0xff] %v332_v27  ;;  %v336_v29 = vld [vmem:[%s3473_s25 + $0x540] sm:$0xff]  ;;  %v338_v30 = vld [vmem:[%s3473_s25 + $0x548] sm:$0xff] }
  0x41   : > { %335 = vst [vmem:[%s3478_s26 + $0x2e0] sm:$0xff] %v334_v28  ;;  %v340_v31 = vld [vmem:[%s3473_s25 + $0x550] sm:$0xff]  ;;  %337 = vst [vmem:[%s3478_s26 + $0x2e8] sm:$0xff] %v336_v29  ;;  %v342_v32 = vld [vmem:[%s3473_s25 + $0x558] sm:$0xff] }
  0x42   : > { %339 = vst [vmem:[%s3478_s26 + $0x2f0] sm:$0xff] %v338_v30  ;;  %341 = vst [vmem:[%s3478_s26 + $0x2f8] sm:$0xff] %v340_v31  ;;  %v344_v33 = vld [vmem:[%s3473_s25 + $0x560] sm:$0xff]  ;;  %v346_v34 = vld [vmem:[%s3473_s25 + $0x568] sm:$0xff] }
  0x43   : > { %343 = vst [vmem:[%s3478_s26 + $0x300] sm:$0xff] %v342_v32  ;;  %345 = vst [vmem:[%s3478_s26 + $0x308] sm:$0xff] %v344_v33  ;;  %v348_v35 = vld [vmem:[%s3473_s25 + $0x570] sm:$0xff]  ;;  %v350_v36 = vld [vmem:[%s3473_s25 + $0x640] sm:$0xff] }
  0x44   : > { %347 = vst [vmem:[%s3478_s26 + $0x310] sm:$0xff] %v346_v34  ;;  %v352_v37 = vld [vmem:[%s3473_s25 + $0x648] sm:$0xff]  ;;  %349 = vst [vmem:[%s3478_s26 + $0x318] sm:$0xff] %v348_v35  ;;  %v354_v38 = vld [vmem:[%s3473_s25 + $0x650] sm:$0xff] }
  0x45   : > { %351 = vst [vmem:[%s3478_s26 + $0x320] sm:$0xff] %v350_v36  ;;  %353 = vst [vmem:[%s3478_s26 + $0x328] sm:$0xff] %v352_v37  ;;  %v356_v39 = vld [vmem:[%s3473_s25 + $0x658] sm:$0xff]  ;;  %v358_v40 = vld [vmem:[%s3473_s25 + $0x660] sm:$0xff] }
  0x46   : > { %355 = vst [vmem:[%s3478_s26 + $0x330] sm:$0xff] %v354_v38  ;;  %357 = vst [vmem:[%s3478_s26 + $0x338] sm:$0xff] %v356_v39  ;;  %v360_v41 = vld [vmem:[%s3473_s25 + $0x668] sm:$0xff]  ;;  %v362_v42 = vld [vmem:[%s3473_s25 + $0x670] sm:$0xff] }
  0x47   : > { %359 = vst [vmem:[%s3478_s26 + $0x340] sm:$0xff] %v358_v40  ;;  %v364_v43 = vld [vmem:[%s3473_s25 + $0x678] sm:$0xff]  ;;  %361 = vst [vmem:[%s3478_s26 + $0x348] sm:$0xff] %v360_v41  ;;  %v366_v44 = vld [vmem:[%s3473_s25 + $0x680] sm:$0xff] }
  0x48   : > { %363 = vst [vmem:[%s3478_s26 + $0x350] sm:$0xff] %v362_v42  ;;  %365 = vst [vmem:[%s3478_s26 + $0x358] sm:$0xff] %v364_v43  ;;  %v368_v45 = vld [vmem:[%s3473_s25 + $0x688] sm:$0xff]  ;;  %v370_v46 = vld [vmem:[%s3473_s25 + $0x690] sm:$0xff] }
  0x49   : > { %367 = vst [vmem:[%s3478_s26 + $0x360] sm:$0xff] %v366_v44  ;;  %369 = vst [vmem:[%s3478_s26 + $0x368] sm:$0xff] %v368_v45  ;;  %v372_v47 = vld [vmem:[%s3473_s25 + $0x698] sm:$0xff]  ;;  %v374_v48 = vld [vmem:[%s3473_s25 + $0x6a0] sm:$0xff] }
  0x4a   : > { %371 = vst [vmem:[%s3478_s26 + $0x370] sm:$0xff] %v370_v46  ;;  %v376_v49 = vld [vmem:[%s3473_s25 + $0x6a8] sm:$0xff]  ;;  %373 = vst [vmem:[%s3478_s26 + $0x378] sm:$0xff] %v372_v47  ;;  %v378_v50 = vld [vmem:[%s3473_s25 + $0x6b0] sm:$0xff] }
  0x4b   : > { %375 = vst [vmem:[%s3478_s26 + $0x380] sm:$0xff] %v374_v48  ;;  %377 = vst [vmem:[%s3478_s26 + $0x388] sm:$0xff] %v376_v49  ;;  %v380_v51 = vld [vmem:[%s3473_s25 + $0x6b8] sm:$0xff]  ;;  %v382_v52 = vld [vmem:[%s3473_s25 + $0x6c0] sm:$0xff] }
  0x4c   : > { %379 = vst [vmem:[%s3478_s26 + $0x390] sm:$0xff] %v378_v50  ;;  %381 = vst [vmem:[%s3478_s26 + $0x398] sm:$0xff] %v380_v51  ;;  %v384_v53 = vld [vmem:[%s3473_s25 + $0x6c8] sm:$0xff]  ;;  %v386_v54 = vld [vmem:[%s3473_s25 + $0x6d0] sm:$0xff] }
  0x4d   : > { %383 = vst [vmem:[%s3478_s26 + $0x3a0] sm:$0xff] %v382_v52  ;;  %v388_v55 = vld [vmem:[%s3473_s25 + $0x6d8] sm:$0xff]  ;;  %385 = vst [vmem:[%s3478_s26 + $0x3a8] sm:$0xff] %v384_v53  ;;  %v390_v56 = vld [vmem:[%s3473_s25 + $0x6e0] sm:$0xff] }
  0x4e   : > { %387 = vst [vmem:[%s3478_s26 + $0x3b0] sm:$0xff] %v386_v54  ;;  %389 = vst [vmem:[%s3478_s26 + $0x3b8] sm:$0xff] %v388_v55  ;;  %v392_v57 = vld [vmem:[%s3473_s25 + $0x6e8] sm:$0xff]  ;;  %v394_v58 = vld [vmem:[%s3473_s25 + $0x6f0] sm:$0xff] }
  0x4f   : > { %391 = vst [vmem:[%s3478_s26 + $0x3c0] sm:$0xff] %v390_v56  ;;  %393 = vst [vmem:[%s3478_s26 + $0x3c8] sm:$0xff] %v392_v57  ;;  %v396_v59 = vld [vmem:[%s3473_s25 + $0x6f8] sm:$0xff]  ;;  %v398_v60 = vld [vmem:[%s3473_s25 + $0x700] sm:$0xff] }
  0x50   : > { %395 = vst [vmem:[%s3478_s26 + $0x3d0] sm:$0xff] %v394_v58  ;;  %v400_v61 = vld [vmem:[%s3473_s25 + $0x7d0] sm:$0xff]  ;;  %397 = vst [vmem:[%s3478_s26 + $0x3d8] sm:$0xff] %v396_v59  ;;  %v402_v62 = vld [vmem:[%s3473_s25 + $0x7d8] sm:$0xff] }
  0x51   : > { %399 = vst [vmem:[%s3478_s26 + $0x3e0] sm:$0xff] %v398_v60  ;;  %401 = vst [vmem:[%s3478_s26 + $0x3e8] sm:$0xff] %v400_v61  ;;  %v404_v63 = vld [vmem:[%s3473_s25 + $0x7e0] sm:$0xff]  ;;  %v406_v0 = vld [vmem:[%s3473_s25 + $0x7e8] sm:$0xff] }
  0x52   : > { %403 = vst [vmem:[%s3478_s26 + $0x3f0] sm:$0xff] %v402_v62  ;;  %405 = vst [vmem:[%s3478_s26 + $0x3f8] sm:$0xff] %v404_v63  ;;  %v408_v1 = vld [vmem:[%s3473_s25 + $0x7f0] sm:$0xff]  ;;  %v410_v2 = vld [vmem:[%s3473_s25 + $0x7f8] sm:$0xff] }
  0x53   : > { %407 = vst [vmem:[%s3478_s26 + $0x400] sm:$0xff] %v406_v0  ;;  %v412_v3 = vld [vmem:[%s3473_s25 + $0x800] sm:$0xff]  ;;  %409 = vst [vmem:[%s3478_s26 + $0x408] sm:$0xff] %v408_v1  ;;  %v414_v4 = vld [vmem:[%s3473_s25 + $0x808] sm:$0xff] }
  0x54   : > { %411 = vst [vmem:[%s3478_s26 + $0x410] sm:$0xff] %v410_v2  ;;  %413 = vst [vmem:[%s3478_s26 + $0x418] sm:$0xff] %v412_v3  ;;  %v416_v5 = vld [vmem:[%s3473_s25 + $0x810] sm:$0xff]  ;;  %v418_v6 = vld [vmem:[%s3473_s25 + $0x818] sm:$0xff] }
  0x55   : > { %415 = vst [vmem:[%s3478_s26 + $0x420] sm:$0xff] %v414_v4  ;;  %417 = vst [vmem:[%s3478_s26 + $0x428] sm:$0xff] %v416_v5  ;;  %v420_v7 = vld [vmem:[%s3473_s25 + $0x820] sm:$0xff]  ;;  %v422_v8 = vld [vmem:[%s3473_s25 + $0x828] sm:$0xff] }
  0x56   : > { %419 = vst [vmem:[%s3478_s26 + $0x430] sm:$0xff] %v418_v6  ;;  %v424_v9 = vld [vmem:[%s3473_s25 + $0x830] sm:$0xff]  ;;  %421 = vst [vmem:[%s3478_s26 + $0x438] sm:$0xff] %v420_v7  ;;  %v426_v10 = vld [vmem:[%s3473_s25 + $0x838] sm:$0xff] }
  0x57   : > { %423 = vst [vmem:[%s3478_s26 + $0x440] sm:$0xff] %v422_v8  ;;  %425 = vst [vmem:[%s3478_s26 + $0x448] sm:$0xff] %v424_v9  ;;  %v428_v11 = vld [vmem:[%s3473_s25 + $0x840] sm:$0xff]  ;;  %v430_v12 = vld [vmem:[%s3473_s25 + $0x848] sm:$0xff] }
  0x58   : > { %427 = vst [vmem:[%s3478_s26 + $0x450] sm:$0xff] %v426_v10  ;;  %429 = vst [vmem:[%s3478_s26 + $0x458] sm:$0xff] %v428_v11  ;;  %v432_v13 = vld [vmem:[%s3473_s25 + $0x850] sm:$0xff]  ;;  %v434_v14 = vld [vmem:[%s3473_s25 + $0x858] sm:$0xff] }
  0x59   : > { %431 = vst [vmem:[%s3478_s26 + $0x460] sm:$0xff] %v430_v12  ;;  %v436_v15 = vld [vmem:[%s3473_s25 + $0x860] sm:$0xff]  ;;  %433 = vst [vmem:[%s3478_s26 + $0x468] sm:$0xff] %v432_v13  ;;  %v438_v16 = vld [vmem:[%s3473_s25 + $0x868] sm:$0xff] }
  0x5a   : > { %435 = vst [vmem:[%s3478_s26 + $0x470] sm:$0xff] %v434_v14  ;;  %437 = vst [vmem:[%s3478_s26 + $0x478] sm:$0xff] %v436_v15  ;;  %v440_v17 = vld [vmem:[%s3473_s25 + $0x870] sm:$0xff]  ;;  %v442_v18 = vld [vmem:[%s3473_s25 + $0x878] sm:$0xff] }
  0x5b   : > { %439 = vst [vmem:[%s3478_s26 + $0x480] sm:$0xff] %v438_v16  ;;  %441 = vst [vmem:[%s3478_s26 + $0x488] sm:$0xff] %v440_v17  ;;  %v444_v19 = vld [vmem:[%s3473_s25 + $0x880] sm:$0xff]  ;;  %v446_v20 = vld [vmem:[%s3473_s25 + $0x888] sm:$0xff] }
  0x5c   : > { %443 = vst [vmem:[%s3478_s26 + $0x490] sm:$0xff] %v442_v18  ;;  %v448_v21 = vld [vmem:[%s3473_s25 + $0x890] sm:$0xff]  ;;  %445 = vst [vmem:[%s3478_s26 + $0x498] sm:$0xff] %v444_v19 }
  0x5d   : > { %447 = vst [vmem:[%s3478_s26 + $0x4a0] sm:$0xff] %v446_v20  ;;  %449 = vst [vmem:[%s3478_s26 + $0x4a8] sm:$0xff] %v448_v21 }
  0x5e PF: > { %p2933_p5 = scmp.ge.s32.totalorder %s3415_s14, 1  ;;  %p454_p6 = scmp.lt.s32.totalorder %s3415_s14, 3 }
  0x60   : > { %p455_p7 = pnand %p2933_p5, %p454_p6 }
  0x61   : > { %s461_s27 = sand.u32 (!%p455_p7), 1, %s3407_s12   ;;  %v3417_v22 = vmov (!%p455_p7), 0   ;;  %v643_v23 = vld [vmem:[%s4127_s2] sm:$0xf] (!%p455_p7)  ;;  %vm1399_vm0 = vcmask (!%p455_p7), 392192   ;;  %s485_s7 = smul.u32 (!%p455_p7), 50, %s2928_s15 }
  0x62   : > { %458 = sbr.rel (%p455_p7) target bundleno = 481 (0x1e1), region = 51  ;;  %1435 = vmatprep.mubr.bf16.mxu0 (!%p455_p7), %v3417_v22  ;;  %1476 = vmatprep.mubr.bf16.mxu1 (!%p455_p7), %v3417_v22  ;;  %v3804_v37 = vld [vmem:[%s4125_s0] sm:$0x3] (!%p455_p7) }
  0x63   : > { %s3140_s28 = smul.u32 (!%p455_p7), 1200, %s461_s27  ;;  %3167 = vset.pattern.permute.xlu0 (!%p455_p7), %v3417_v22  ;;  %p486_p8 = scmp.lt.s32.totalorder (!%p455_p7), %s485_s7, 99 }
  0x64   : > { %646 = vperm.xlu0 (!%p455_p7), %3167, %v643_v23  }
  0x65   : > { %s3786_s4 = scalar_lea.vmem (!%p455_p7), [#allocation2], %s3140_s28 }
  0x66   : > { %v3168_v24 = vld [vmem:[%s3786_s4 + $0x4] ss:$200 sps:$4 sm:$0xff] (!%p455_p7)   ;;  %v3172_v26 = vld [vmem:[%s3786_s4] ss:$200 sps:$4 sm:$0xff] (!%p455_p7)   ;;  %v3174_v28 = vld [vmem:[%s3786_s4 + $0x194] ss:$200 sps:$4 sm:$0xff] (!%p455_p7)  }
  0x67   : > { %v3170_v25 = vld [vmem:[%s3786_s4 + $0xc] ss:$200 sps:$4 sm:$0xff] (!%p455_p7)   ;;  %1403 = vmatprep.subr.bf16.mxu0 (!%p455_p7), %v3168_v24  ;;  %v3173_v27 = vld [vmem:[%s3786_s4 + $0x8] ss:$200 sps:$4 sm:$0xff] (!%p455_p7)   ;;  %v3176_v29 = vld [vmem:[%s3786_s4 + $0x19c] ss:$200 sps:$4 sm:$0xff] (!%p455_p7)  }
  0x68   : > { %1444 = vmatprep.subr.bf16.mxu1 (!%p455_p7), %v3170_v25  ;;  %1404 = vmatpush1.bf16.msra.mxu0 (!%p455_p7), %v3172_v26  ;;  %v3178_v30 = vld [vmem:[%s3786_s4 + $0x190] ss:$200 sps:$4 sm:$0xff] (!%p455_p7)   ;;  %v3180_v32 = vld [vmem:[%s3786_s4 + $0x324] ss:$200 sps:$4 sm:$0xff] (!%p455_p7)   ;;  %v3184_v34 = vld [vmem:[%s3786_s4 + $0x320] ss:$200 sps:$4 sm:$0xff] (!%p455_p7)  }
  0x69   : > { %1445 = vmatpush1.bf16.msra.mxu1 %v3173_v27  ;;  %1405 = vmatprep.subr.bf16.mxu0 %v3174_v28  ;;  %v3179_v31 = vld [vmem:[%s3786_s4 + $0x198] ss:$200 sps:$4 sm:$0xff]   ;;  %v3182_v33 = vld [vmem:[%s3786_s4 + $0x32c] ss:$200 sps:$4 sm:$0xff]   ;;  %v3185_v35 = vld [vmem:[%s3786_s4 + $0x328] ss:$200 sps:$4 sm:$0xff]  }
  0x6a   : > { %1446 = vmatprep.subr.bf16.mxu1 %v3176_v29  ;;  %v3188_v36 = vld [vmem:[%s3786_s4 + $0x14] ss:$200 sps:$4 sm:$0xff]   ;;  %v3186_v39 = vld [vmem:[%s3786_s4 + $0x10] ss:$200 sps:$4 sm:$0xff]   ;;  %v3194_v41 = vld [vmem:[%s3786_s4 + $0x1a4] ss:$200 sps:$4 sm:$0xff]  }
  0x6b   : > { %v3191_v38 = vld [vmem:[%s3786_s4 + $0x1c] ss:$200 sps:$4 sm:$0xff]   ;;  %v3189_v40 = vld [vmem:[%s3786_s4 + $0x18] ss:$200 sps:$4 sm:$0xff]   ;;  %v3197_v42 = vld [vmem:[%s3786_s4 + $0x1ac] ss:$200 sps:$4 sm:$0xff]  }
  0x6c   : > { %1406 = vmatpush1.bf16.msra.mxu0 %v3178_v30  ;;  %v3192_v43 = vld [vmem:[%s3786_s4 + $0x1a0] ss:$200 sps:$4 sm:$0xff]   ;;  %v3200_v45 = vld [vmem:[%s3786_s4 + $0x334] ss:$200 sps:$4 sm:$0xff]   ;;  %v3198_v47 = vld [vmem:[%s3786_s4 + $0x330] ss:$200 sps:$4 sm:$0xff]  }
  0x6d   : > { %1447 = vmatpush1.bf16.msra.mxu1 %v3179_v31  ;;  %1407 = vmatprep.subr.bf16.mxu0 %v3180_v32  ;;  %v3195_v44 = vld [vmem:[%s3786_s4 + $0x1a8] ss:$200 sps:$4 sm:$0xff]   ;;  %v3203_v46 = vld [vmem:[%s3786_s4 + $0x33c] ss:$200 sps:$4 sm:$0xff]   ;;  %v3201_v48 = vld [vmem:[%s3786_s4 + $0x338] ss:$200 sps:$4 sm:$0xff]  }
  0x6e   : > { %1448 = vmatprep.subr.bf16.mxu1 %v3182_v33  ;;  %v3206_v49 = vld [vmem:[%s3786_s4 + $0x24] ss:$200 sps:$4 sm:$0xff]   ;;  %v3204_v51 = vld [vmem:[%s3786_s4 + $0x20] ss:$200 sps:$4 sm:$0xff]   ;;  %v3212_v53 = vld [vmem:[%s3786_s4 + $0x1b4] ss:$200 sps:$4 sm:$0xff]  }
  0x6f   : > { %v3209_v50 = vld [vmem:[%s3786_s4 + $0x2c] ss:$200 sps:$4 sm:$0xff]   ;;  %v3207_v52 = vld [vmem:[%s3786_s4 + $0x28] ss:$200 sps:$4 sm:$0xff]   ;;  %v3215_v54 = vld [vmem:[%s3786_s4 + $0x1bc] ss:$200 sps:$4 sm:$0xff]  }
  0x70   : > { %1408 = vmatpush1.bf16.msra.mxu0 %v3184_v34  ;;  %v3210_v55 = vld [vmem:[%s3786_s4 + $0x1b0] ss:$200 sps:$4 sm:$0xff]   ;;  %v3218_v57 = vld [vmem:[%s3786_s4 + $0x344] ss:$200 sps:$4 sm:$0xff]   ;;  %v3216_v59 = vld [vmem:[%s3786_s4 + $0x340] ss:$200 sps:$4 sm:$0xff]  }
  0x71   : > { %1449 = vmatpush1.bf16.msra.mxu1 %v3185_v35  ;;  %1485 = vmatprep.subr.bf16.mxu0 %v3188_v36  ;;  %v3213_v56 = vld [vmem:[%s3786_s4 + $0x1b8] ss:$200 sps:$4 sm:$0xff]   ;;  %v3221_v58 = vld [vmem:[%s3786_s4 + $0x34c] ss:$200 sps:$4 sm:$0xff]   ;;  %v3219_v60 = vld [vmem:[%s3786_s4 + $0x348] ss:$200 sps:$4 sm:$0xff]  }
  0x72   : > { %1526 = vmatprep.subr.bf16.mxu1 %v3191_v38  ;;  %v3224_v61 = vld [vmem:[%s3786_s4 + $0x34] ss:$200 sps:$4 sm:$0xff]   ;;  %v3222_v63 = vld [vmem:[%s3786_s4 + $0x30] ss:$200 sps:$4 sm:$0xff]   ;;  %v3230_v1 = vld [vmem:[%s3786_s4 + $0x1c4] ss:$200 sps:$4 sm:$0xff]  }
  0x73   : > { %3085 = vmatmul.mubr.msk.bf16.vlgmr.msra.gmra.mrb[0].mxu0 %vm1399_vm0, %v3804_v37  ;;  %v3227_v62 = vld [vmem:[%s3786_s4 + $0x3c] ss:$200 sps:$4 sm:$0xff]   ;;  %v3225_v0 = vld [vmem:[%s3786_s4 + $0x38] ss:$200 sps:$4 sm:$0xff]   ;;  %v3233_v2 = vld [vmem:[%s3786_s4 + $0x1cc] ss:$200 sps:$4 sm:$0xff]  }
  0x74   : > { %3086 = vmatmul.mubr.msk.bf16.vlgmr.msra.gmra.mrb[0].mxu1 %vm1399_vm0, %v3804_v37  ;;  %1486 = vmatpush1.bf16.msra.mxu0 %v3186_v39  ;;  %v3228_v3 = vld [vmem:[%s3786_s4 + $0x1c0] ss:$200 sps:$4 sm:$0xff]   ;;  %v3236_v5 = vld [vmem:[%s3786_s4 + $0x354] ss:$200 sps:$4 sm:$0xff]   ;;  %v3234_v7 = vld [vmem:[%s3786_s4 + $0x350] ss:$200 sps:$4 sm:$0xff]  }
  0x75   : > { %1527 = vmatpush1.bf16.msra.mxu1 %v3189_v40  ;;  %1487 = vmatprep.subr.bf16.mxu0 %v3194_v41  ;;  %v3231_v4 = vld [vmem:[%s3786_s4 + $0x1c8] ss:$200 sps:$4 sm:$0xff]   ;;  %v3239_v6 = vld [vmem:[%s3786_s4 + $0x35c] ss:$200 sps:$4 sm:$0xff]   ;;  %v3237_v8 = vld [vmem:[%s3786_s4 + $0x358] ss:$200 sps:$4 sm:$0xff]  }
  0x76   : > { %1528 = vmatprep.subr.bf16.mxu1 %v3197_v42  ;;  %1517 = vmatprep.mubr.bf16.mxu0 %v3417_v22  ;;  %v3242_v9 = vld [vmem:[%s3786_s4 + $0x44] ss:$200 sps:$4 sm:$0xff]   ;;  %v3240_v11 = vld [vmem:[%s3786_s4 + $0x40] ss:$200 sps:$4 sm:$0xff]   ;;  %v3248_v13 = vld [vmem:[%s3786_s4 + $0x1d4] ss:$200 sps:$4 sm:$0xff]  }
  0x77   : > { %1558 = vmatprep.mubr.bf16.mxu1 %v3417_v22  ;;  %v3245_v10 = vld [vmem:[%s3786_s4 + $0x4c] ss:$200 sps:$4 sm:$0xff]   ;;  %v3243_v12 = vld [vmem:[%s3786_s4 + $0x48] ss:$200 sps:$4 sm:$0xff]   ;;  %v3251_v14 = vld [vmem:[%s3786_s4 + $0x1dc] ss:$200 sps:$4 sm:$0xff]  }
  0x78   : > { %1488 = vmatpush1.bf16.msra.mxu0 %v3192_v43  ;;  %v3246_v15 = vld [vmem:[%s3786_s4 + $0x1d0] ss:$200 sps:$4 sm:$0xff]   ;;  %v3254_v17 = vld [vmem:[%s3786_s4 + $0x364] ss:$200 sps:$4 sm:$0xff]   ;;  %v3252_v19 = vld [vmem:[%s3786_s4 + $0x360] ss:$200 sps:$4 sm:$0xff]  }
  0x79   : > { %1529 = vmatpush1.bf16.msra.mxu1 %v3195_v44  ;;  %1489 = vmatprep.subr.bf16.mxu0 %v3200_v45  ;;  %v3249_v16 = vld [vmem:[%s3786_s4 + $0x1d8] ss:$200 sps:$4 sm:$0xff]   ;;  %v3257_v18 = vld [vmem:[%s3786_s4 + $0x36c] ss:$200 sps:$4 sm:$0xff]   ;;  %v3255_v20 = vld [vmem:[%s3786_s4 + $0x368] ss:$200 sps:$4 sm:$0xff]  }
  0x7a   : > { %1530 = vmatprep.subr.bf16.mxu1 %v3203_v46  ;;  %v3260_v21 = vld [vmem:[%s3786_s4 + $0x54] ss:$200 sps:$4 sm:$0xff]   ;;  %v3258_v24 = vld [vmem:[%s3786_s4 + $0x50] ss:$200 sps:$4 sm:$0xff]   ;;  %v3266_v26 = vld [vmem:[%s3786_s4 + $0x1e4] ss:$200 sps:$4 sm:$0xff]  }
  0x7b   : > { %v3263_v23 = vld [vmem:[%s3786_s4 + $0x5c] ss:$200 sps:$4 sm:$0xff]   ;;  %v3261_v25 = vld [vmem:[%s3786_s4 + $0x58] ss:$200 sps:$4 sm:$0xff]   ;;  %v3269_v27 = vld [vmem:[%s3786_s4 + $0x1ec] ss:$200 sps:$4 sm:$0xff]  }
  0x7c   : > { %1490 = vmatpush1.bf16.msra.mxu0 %v3198_v47  ;;  %v3264_v28 = vld [vmem:[%s3786_s4 + $0x1e0] ss:$200 sps:$4 sm:$0xff]   ;;  %v3272_v30 = vld [vmem:[%s3786_s4 + $0x374] ss:$200 sps:$4 sm:$0xff]   ;;  %v3270_v32 = vld [vmem:[%s3786_s4 + $0x370] ss:$200 sps:$4 sm:$0xff]  }
  0x7d   : > { %1531 = vmatpush1.bf16.msra.mxu1 %v3201_v48  ;;  %1567 = vmatprep.subr.bf16.mxu0 %v3206_v49  ;;  %v3267_v29 = vld [vmem:[%s3786_s4 + $0x1e8] ss:$200 sps:$4 sm:$0xff]   ;;  %v3275_v31 = vld [vmem:[%s3786_s4 + $0x37c] ss:$200 sps:$4 sm:$0xff]   ;;  %v3273_v33 = vld [vmem:[%s3786_s4 + $0x378] ss:$200 sps:$4 sm:$0xff]  }
  0x7e   : > { %1608 = vmatprep.subr.bf16.mxu1 %v3209_v50  ;;  %v3278_v34 = vld [vmem:[%s3786_s4 + $0x64] ss:$200 sps:$4 sm:$0xff]   ;;  %v3276_v36 = vld [vmem:[%s3786_s4 + $0x60] ss:$200 sps:$4 sm:$0xff]   ;;  %v3284_v39 = vld [vmem:[%s3786_s4 + $0x1f4] ss:$200 sps:$4 sm:$0xff]  }
  0x7f   : > { %3087 = vmatmul.mubr.msk.bf16.vlgmr.msra.gmra.mrb[4].mxu0 %vm1399_vm0, %v3804_v37  ;;  %v3281_v35 = vld [vmem:[%s3786_s4 + $0x6c] ss:$200 sps:$4 sm:$0xff]   ;;  %v3279_v38 = vld [vmem:[%s3786_s4 + $0x68] ss:$200 sps:$4 sm:$0xff]   ;;  %v3287_v40 = vld [vmem:[%s3786_s4 + $0x1fc] ss:$200 sps:$4 sm:$0xff]  }
  0x80   : > { %3088 = vmatmul.mubr.msk.bf16.vlgmr.msra.gmra.mrb[4].mxu1 %vm1399_vm0, %v3804_v37  ;;  %1568 = vmatpush1.bf16.msra.mxu0 %v3204_v51  ;;  %v3282_v41 = vld [vmem:[%s3786_s4 + $0x1f0] ss:$200 sps:$4 sm:$0xff]   ;;  %v3290_v43 = vld [vmem:[%s3786_s4 + $0x384] ss:$200 sps:$4 sm:$0xff]   ;;  %v3288_v45 = vld [vmem:[%s3786_s4 + $0x380] ss:$200 sps:$4 sm:$0xff]  }
  0x81   : > { %1609 = vmatpush1.bf16.msra.mxu1 %v3207_v52  ;;  %1569 = vmatprep.subr.bf16.mxu0 %v3212_v53  ;;  %v3285_v42 = vld [vmem:[%s3786_s4 + $0x1f8] ss:$200 sps:$4 sm:$0xff]   ;;  %v3293_v44 = vld [vmem:[%s3786_s4 + $0x38c] ss:$200 sps:$4 sm:$0xff]   ;;  %v3291_v46 = vld [vmem:[%s3786_s4 + $0x388] ss:$200 sps:$4 sm:$0xff]  }
  0x82   : > { %1610 = vmatprep.subr.bf16.mxu1 %v3215_v54  ;;  %1599 = vmatprep.mubr.bf16.mxu0 %v3417_v22  ;;  %v3296_v47 = vld [vmem:[%s3786_s4 + $0x74] ss:$200 sps:$4 sm:$0xff]   ;;  %v3294_v49 = vld [vmem:[%s3786_s4 + $0x70] ss:$200 sps:$4 sm:$0xff]   ;;  %v3302_v51 = vld [vmem:[%s3786_s4 + $0x204] ss:$200 sps:$4 sm:$0xff]  }
  0x83   : > { %1640 = vmatprep.mubr.bf16.mxu1 %v3417_v22  ;;  %v3299_v48 = vld [vmem:[%s3786_s4 + $0x7c] ss:$200 sps:$4 sm:$0xff]   ;;  %v3297_v50 = vld [vmem:[%s3786_s4 + $0x78] ss:$200 sps:$4 sm:$0xff]   ;;  %v3305_v52 = vld [vmem:[%s3786_s4 + $0x20c] ss:$200 sps:$4 sm:$0xff]  }
  0x84   : > { %1570 = vmatpush1.bf16.msra.mxu0 %v3210_v55  ;;  %v3300_v53 = vld [vmem:[%s3786_s4 + $0x200] ss:$200 sps:$4 sm:$0xff]   ;;  %v3308_v55 = vld [vmem:[%s3786_s4 + $0x394] ss:$200 sps:$4 sm:$0xff]   ;;  %s4133_s7 = smov (!%p486_p8, %s485_s7), 99 }
  0x85   : > { %1611 = vmatpush1.bf16.msra.mxu1 %v3213_v56  ;;  %1571 = vmatprep.subr.bf16.mxu0 %v3218_v57  ;;  %v3303_v54 = vld [vmem:[%s3786_s4 + $0x208] ss:$200 sps:$4 sm:$0xff]   ;;  %v3311_v56 = vld [vmem:[%s3786_s4 + $0x39c] ss:$200 sps:$4 sm:$0xff]   ;;  %s2934_s8 = sshll.u32 %s4133_s7, 1 }
  0x86   : > { %1612 = vmatprep.subr.bf16.mxu1 %v3221_v58  ;;  %v3306_v57 = vld [vmem:[%s3786_s4 + $0x390] ss:$200 sps:$4 sm:$0xff]   ;;  %s4032_s11 = scalar_lea.vmem %s4128_s3, %s2934_s8 }
  0x87   : > { %v3309_v58 = vld [vmem:[%s3786_s4 + $0x398] ss:$200 sps:$4 sm:$0xff]  }
  0x88   : > { %1572 = vmatpush1.bf16.msra.mxu0 %v3216_v59  ;;  %v3314_v59 = vld [vmem:[%s3786_s4 + $0x84] ss:$200 sps:$4 sm:$0xff]  }
  0x89   : > { %1613 = vmatpush1.bf16.msra.mxu1 %v3219_v60  ;;  %1649 = vmatprep.subr.bf16.mxu0 %v3224_v61  ;;  %v3317_v60 = vld [vmem:[%s3786_s4 + $0x8c] ss:$200 sps:$4 sm:$0xff]   ;;  %v3312_v61 = vld [vmem:[%s3786_s4 + $0x80] ss:$200 sps:$4 sm:$0xff]  }
  0x8a   : > { %1690 = vmatprep.subr.bf16.mxu1 %v3227_v62  ;;  %v3315_v62 = vld [vmem:[%s3786_s4 + $0x88] ss:$200 sps:$4 sm:$0xff]  }
  0x8b   : > { %3089 = vmatmul.mubr.msk.bf16.vlgmr.msra.gmra.mrb[8].mxu0 %vm1399_vm0, %v3804_v37 }
  0x8c   : > { %3090 = vmatmul.mubr.msk.bf16.vlgmr.msra.gmra.mrb[8].mxu1 %vm1399_vm0, %v3804_v37  ;;  %1650 = vmatpush1.bf16.msra.mxu0 %v3222_v63  ;;  %v3320_v63 = vld [vmem:[%s3786_s4 + $0x214] ss:$200 sps:$4 sm:$0xff]  }
  0x8d   : > { %1691 = vmatpush1.bf16.msra.mxu1 %v3225_v0  ;;  %1651 = vmatprep.subr.bf16.mxu0 %v3230_v1  ;;  %v3323_v0 = vld [vmem:[%s3786_s4 + $0x21c] ss:$200 sps:$4 sm:$0xff]   ;;  %v3318_v1 = vld [vmem:[%s3786_s4 + $0x210] ss:$200 sps:$4 sm:$0xff]  }
  0x8e   : > { %1692 = vmatprep.subr.bf16.mxu1 %v3233_v2  ;;  %1681 = vmatprep.mubr.bf16.mxu0 %v3417_v22  ;;  %v3321_v2 = vld [vmem:[%s3786_s4 + $0x218] ss:$200 sps:$4 sm:$0xff]  }
  0x8f   : > { %1722 = vmatprep.mubr.bf16.mxu1 %v3417_v22 }
  0x90   : > { %1652 = vmatpush1.bf16.msra.mxu0 %v3228_v3  ;;  %v3326_v3 = vld [vmem:[%s3786_s4 + $0x3a4] ss:$200 sps:$4 sm:$0xff]  }
  0x91   : > { %1693 = vmatpush1.bf16.msra.mxu1 %v3231_v4  ;;  %1653 = vmatprep.subr.bf16.mxu0 %v3236_v5  ;;  %v3329_v4 = vld [vmem:[%s3786_s4 + $0x3ac] ss:$200 sps:$4 sm:$0xff]   ;;  %v3324_v5 = vld [vmem:[%s3786_s4 + $0x3a0] ss:$200 sps:$4 sm:$0xff]  }
  0x92   : > { %1694 = vmatprep.subr.bf16.mxu1 %v3239_v6  ;;  %v3327_v6 = vld [vmem:[%s3786_s4 + $0x3a8] ss:$200 sps:$4 sm:$0xff]  }
  0x94   : > { %1654 = vmatpush1.bf16.msra.mxu0 %v3234_v7  ;;  %v3332_v7 = vld [vmem:[%s3786_s4 + $0x94] ss:$200 sps:$4 sm:$0xff]  }
  0x95   : > { %1695 = vmatpush1.bf16.msra.mxu1 %v3237_v8  ;;  %1731 = vmatprep.subr.bf16.mxu0 %v3242_v9  ;;  %v3335_v8 = vld [vmem:[%s3786_s4 + $0x9c] ss:$200 sps:$4 sm:$0xff]   ;;  %v3330_v9 = vld [vmem:[%s3786_s4 + $0x90] ss:$200 sps:$4 sm:$0xff]  }
  0x96   : > { %1772 = vmatprep.subr.bf16.mxu1 %v3245_v10  ;;  %v3333_v10 = vld [vmem:[%s3786_s4 + $0x98] ss:$200 sps:$4 sm:$0xff]  }
  0x97   : > { %3091 = vmatmul.mubr.msk.bf16.vlgmr.msra.gmra.mrb[12].mxu0 %vm1399_vm0, %v3804_v37 }
  0x98   : > { %3092 = vmatmul.mubr.msk.bf16.vlgmr.msra.gmra.mrb[12].mxu1 %vm1399_vm0, %v3804_v37  ;;  %1732 = vmatpush1.bf16.msra.mxu0 %v3240_v11  ;;  %v3338_v11 = vld [vmem:[%s3786_s4 + $0x224] ss:$200 sps:$4 sm:$0xff]  }
  0x99   : > { %1773 = vmatpush1.bf16.msra.mxu1 %v3243_v12  ;;  %1733 = vmatprep.subr.bf16.mxu0 %v3248_v13  ;;  %v3341_v12 = vld [vmem:[%s3786_s4 + $0x22c] ss:$200 sps:$4 sm:$0xff]   ;;  %v3336_v13 = vld [vmem:[%s3786_s4 + $0x220] ss:$200 sps:$4 sm:$0xff]  }
  0x9a   : > { %1774 = vmatprep.subr.bf16.mxu1 %v3251_v14  ;;  %1763 = vmatprep.mubr.bf16.mxu0 %v3417_v22  ;;  %v3339_v14 = vld [vmem:[%s3786_s4 + $0x228] ss:$200 sps:$4 sm:$0xff]  }
  0x9b   : > { %1804 = vmatprep.mubr.bf16.mxu1 %v3417_v22 }
  0x9c   : > { %1734 = vmatpush1.bf16.msra.mxu0 %v3246_v15  ;;  %v3344_v15 = vld [vmem:[%s3786_s4 + $0x3b4] ss:$200 sps:$4 sm:$0xff]  }
  0x9d   : > { %1775 = vmatpush1.bf16.msra.mxu1 %v3249_v16  ;;  %1735 = vmatprep.subr.bf16.mxu0 %v3254_v17  ;;  %v3347_v16 = vld [vmem:[%s3786_s4 + $0x3bc] ss:$200 sps:$4 sm:$0xff]   ;;  %v3342_v17 = vld [vmem:[%s3786_s4 + $0x3b0] ss:$200 sps:$4 sm:$0xff]  }
  0x9e   : > { %1776 = vmatprep.subr.bf16.mxu1 %v3257_v18  ;;  %v3345_v18 = vld [vmem:[%s3786_s4 + $0x3b8] ss:$200 sps:$4 sm:$0xff]  }
  0xa0   : > { %1736 = vmatpush1.bf16.msra.mxu0 %v3252_v19  ;;  %v3350_v19 = vld [vmem:[%s3786_s4 + $0xa4] ss:$200 sps:$4 sm:$0xff]  }
  0xa1   : > { %1777 = vmatpush1.bf16.msra.mxu1 %v3255_v20  ;;  %1813 = vmatprep.subr.bf16.mxu0 %v3260_v21  ;;  %v3353_v20 = vld [vmem:[%s3786_s4 + $0xac] ss:$200 sps:$4 sm:$0xff]   ;;  %v3348_v21 = vld [vmem:[%s3786_s4 + $0xa0] ss:$200 sps:$4 sm:$0xff]  }
  0xa2   : > { %1854 = vmatprep.subr.bf16.mxu1 %v3263_v23  ;;  %v3351_v23 = vld [vmem:[%s3786_s4 + $0xa8] ss:$200 sps:$4 sm:$0xff]  }
  0xa3   : > { %3093 = vmatmul.mubr.msk.bf16.vlgmr.msra.gmra.mrb[16].mxu0 %vm1399_vm0, %v3804_v37 }
  0xa4   : > { %3094 = vmatmul.mubr.msk.bf16.vlgmr.msra.gmra.mrb[16].mxu1 %vm1399_vm0, %v3804_v37  ;;  %1814 = vmatpush1.bf16.msra.mxu0 %v3258_v24  ;;  %v3356_v24 = vld [vmem:[%s3786_s4 + $0x234] ss:$200 sps:$4 sm:$0xff]  }
  0xa5   : > { %1855 = vmatpush1.bf16.msra.mxu1 %v3261_v25  ;;  %1815 = vmatprep.subr.bf16.mxu0 %v3266_v26  ;;  %v3359_v25 = vld [vmem:[%s3786_s4 + $0x23c] ss:$200 sps:$4 sm:$0xff]   ;;  %v3354_v26 = vld [vmem:[%s3786_s4 + $0x230] ss:$200 sps:$4 sm:$0xff]  }
  0xa6   : > { %1856 = vmatprep.subr.bf16.mxu1 %v3269_v27  ;;  %1845 = vmatprep.mubr.bf16.mxu0 %v3417_v22  ;;  %v3357_v27 = vld [vmem:[%s3786_s4 + $0x238] ss:$200 sps:$4 sm:$0xff]  }
  0xa7   : > { %1886 = vmatprep.mubr.bf16.mxu1 %v3417_v22 }
  0xa8   : > { %1816 = vmatpush1.bf16.msra.mxu0 %v3264_v28  ;;  %v3362_v28 = vld [vmem:[%s3786_s4 + $0x3c4] ss:$200 sps:$4 sm:$0xff]  }
  0xa9   : > { %1857 = vmatpush1.bf16.msra.mxu1 %v3267_v29  ;;  %1817 = vmatprep.subr.bf16.mxu0 %v3272_v30  ;;  %v3365_v29 = vld [vmem:[%s3786_s4 + $0x3cc] ss:$200 sps:$4 sm:$0xff]   ;;  %v3360_v30 = vld [vmem:[%s3786_s4 + $0x3c0] ss:$200 sps:$4 sm:$0xff]  }
  0xaa   : > { %1858 = vmatprep.subr.bf16.mxu1 %v3275_v31  ;;  %v3363_v31 = vld [vmem:[%s3786_s4 + $0x3c8] ss:$200 sps:$4 sm:$0xff]  }
  0xac   : > { %1818 = vmatpush1.bf16.msra.mxu0 %v3270_v32  ;;  %v3368_v32 = vld [vmem:[%s3786_s4 + $0xb4] ss:$200 sps:$4 sm:$0xff]  }
  0xad   : > { %1859 = vmatpush1.bf16.msra.mxu1 %v3273_v33  ;;  %1895 = vmatprep.subr.bf16.mxu0 %v3278_v34  ;;  %v3371_v33 = vld [vmem:[%s3786_s4 + $0xbc] ss:$200 sps:$4 sm:$0xff]   ;;  %v3366_v34 = vld [vmem:[%s3786_s4 + $0xb0] ss:$200 sps:$4 sm:$0xff]  }
  0xae   : > { %1936 = vmatprep.subr.bf16.mxu1 %v3281_v35  ;;  %v3369_v35 = vld [vmem:[%s3786_s4 + $0xb8] ss:$200 sps:$4 sm:$0xff]  }
  0xaf   : > { %3095 = vmatmul.mubr.msk.bf16.vlgmr.msra.gmra.mrb[20].mxu0 %vm1399_vm0, %v3804_v37 }
  0xb0   : > { %3096 = vmatmul.mubr.msk.bf16.vlgmr.msra.gmra.mrb[20].mxu1 %vm1399_vm0, %v3804_v37  ;;  %1896 = vmatpush1.bf16.msra.mxu0 %v3276_v36  ;;  %v3374_v36 = vld [vmem:[%s3786_s4 + $0x244] ss:$200 sps:$4 sm:$0xff]  }
  0xb1   : > { %1937 = vmatpush1.bf16.msra.mxu1 %v3279_v38  ;;  %1897 = vmatprep.subr.bf16.mxu0 %v3284_v39  ;;  %v3377_v38 = vld [vmem:[%s3786_s4 + $0x24c] ss:$200 sps:$4 sm:$0xff]   ;;  %v3372_v39 = vld [vmem:[%s3786_s4 + $0x240] ss:$200 sps:$4 sm:$0xff]  }
  0xb2   : > { %1938 = vmatprep.subr.bf16.mxu1 %v3287_v40  ;;  %1927 = vmatprep.mubr.bf16.mxu0 %v3417_v22  ;;  %v3375_v40 = vld [vmem:[%s3786_s4 + $0x248] ss:$200 sps:$4 sm:$0xff]  }
  0xb3   : > { %1968 = vmatprep.mubr.bf16.mxu1 %v3417_v22 }
  0xb4   : > { %1898 = vmatpush1.bf16.msra.mxu0 %v3282_v41  ;;  %v3380_v41 = vld [vmem:[%s3786_s4 + $0x3d4] ss:$200 sps:$4 sm:$0xff]  }
  0xb5   : > { %1939 = vmatpush1.bf16.msra.mxu1 %v3285_v42  ;;  %1899 = vmatprep.subr.bf16.mxu0 %v3290_v43  ;;  %v3383_v42 = vld [vmem:[%s3786_s4 + $0x3dc] ss:$200 sps:$4 sm:$0xff]   ;;  %v3378_v43 = vld [vmem:[%s3786_s4 + $0x3d0] ss:$200 sps:$4 sm:$0xff]  }
  0xb6   : > { %1940 = vmatprep.subr.bf16.mxu1 %v3293_v44  ;;  %v3381_v44 = vld [vmem:[%s3786_s4 + $0x3d8] ss:$200 sps:$4 sm:$0xff]  }
  0xb8   : > { %1900 = vmatpush1.bf16.msra.mxu0 %v3288_v45  ;;  %v3386_v45 = vld [vmem:[%s3786_s4 + $0xc4] ss:$200 sps:$4 sm:$0xff]  }
  0xb9   : > { %1941 = vmatpush1.bf16.msra.mxu1 %v3291_v46  ;;  %1977 = vmatprep.subr.bf16.mxu0 %v3296_v47  ;;  %v3384_v46 = vld [vmem:[%s3786_s4 + $0xc0] ss:$200 sps:$4 sm:$0xff]   ;;  %v3389_v47 = vld [vmem:[%s3786_s4 + $0x254] ss:$200 sps:$4 sm:$0xff]  }
  0xba   : > { %2018 = vmatprep.subr.bf16.mxu1 %v3299_v48  ;;  %v3387_v48 = vld [vmem:[%s3786_s4 + $0x250] ss:$200 sps:$4 sm:$0xff]  }
  0xbb   : > { %3097 = vmatmul.mubr.msk.bf16.vlgmr.msra.gmra.mrb[24].mxu0 %vm1399_vm0, %v3804_v37 }
  0xbc   : > { %3098 = vmatmul.mubr.msk.bf16.vlgmr.msra.gmra.mrb[24].mxu1 %vm1399_vm0, %v3804_v37  ;;  %1978 = vmatpush1.bf16.msra.mxu0 %v3294_v49  ;;  %v3392_v49 = vld [vmem:[%s3786_s4 + $0x3e4] ss:$200 sps:$4 sm:$0xff]  }
  0xbd   : > { %2019 = vmatpush1.bf16.msra.mxu1 %v3297_v50  ;;  %1979 = vmatprep.subr.bf16.mxu0 %v3302_v51  ;;  %v3390_v50 = vld [vmem:[%s3786_s4 + $0x3e0] ss:$200 sps:$4 sm:$0xff]  }
  0xbe   : > { %2020 = vmatprep.subr.bf16.mxu1 %v3305_v52  ;;  %2009 = vmatprep.mubr.bf16.mxu0 %v3417_v22  ;;  %v3418_v52 = vmov 1983009808  }
  0xbf   : > { %2050 = vmatprep.mubr.bf16.mxu1 %v3417_v22 }
  0xc0   : > { %1980 = vmatpush1.bf16.msra.mxu0 %v3300_v53  ;;  %v2631_v53 = vunpack.c.l.s4 %v3418_v52 }
  0xc1   : > { %2021 = vmatpush1.bf16.msra.mxu1 %v3303_v54  ;;  %1981 = vmatprep.subr.bf16.mxu0 %v3308_v55  ;;  %v2633_v54 = vlaneseq }
  0xc2   : > { %2022 = vmatprep.subr.bf16.mxu1 %v3311_v56 }
  0xc4   : > { %1982 = vmatpush1.bf16.msra.mxu0 %v3306_v57 }
  0xc5   : > { %2023 = vmatpush1.bf16.msra.mxu1 %v3309_v58  ;;  %2059 = vmatprep.subr.bf16.mxu0 %v3314_v59 }
  0xc6   : > { %2100 = vmatprep.subr.bf16.mxu1 %v3317_v60 }
  0xc7   : > { %3099 = vmatmul.mubr.msk.bf16.vlgmr.msra.gmra.mrb[28].mxu0 %vm1399_vm0, %v3804_v37 }
  0xc8   : > { %3100 = vmatmul.mubr.msk.bf16.vlgmr.msra.gmra.mrb[28].mxu1 %vm1399_vm0, %v3804_v37  ;;  %2060 = vmatpush1.bf16.msra.mxu0 %v3312_v61  ;;  %v2632_v61 = vunpack.c.0.s8 %v2631_v53 }
  0xc9   : > { %2101 = vmatpush1.bf16.msra.mxu1 %v3315_v62  ;;  %2061 = vmatprep.subr.bf16.mxu0 %v3320_v63 }
  0xca   : > { %2102 = vmatprep.subr.bf16.mxu1 %v3323_v0  ;;  %2091 = vmatprep.mubr.bf16.mxu0 %v3417_v22 }
  0xcb   : > { %2132 = vmatprep.mubr.bf16.mxu1 %v3417_v22 }
  0xcc   : > { %2062 = vmatpush1.bf16.msra.mxu0 %v3318_v1 }
  0xcd   : > { %2103 = vmatpush1.bf16.msra.mxu1 %v3321_v2  ;;  %2063 = vmatprep.subr.bf16.mxu0 %v3326_v3 }
  0xce   : > { %2104 = vmatprep.subr.bf16.mxu1 %v3329_v4 }
  0xd0   : > { %2064 = vmatpush1.bf16.msra.mxu0 %v3324_v5 }
  0xd1   : > { %2105 = vmatpush1.bf16.msra.mxu1 %v3327_v6  ;;  %2141 = vmatprep.subr.bf16.mxu0 %v3332_v7 }
  0xd2   : > { %2182 = vmatprep.subr.bf16.mxu1 %v3335_v8 }
  0xd3   : > { %3101 = vmatmul.mubr.msk.bf16.vlgmr.msra.gmra.mrb[32].mxu0 %vm1399_vm0, %v3804_v37 }
  0xd4   : > { %3102 = vmatmul.mubr.msk.bf16.vlgmr.msra.gmra.mrb[32].mxu1 %vm1399_vm0, %v3804_v37  ;;  %2142 = vmatpush1.bf16.msra.mxu0 %v3330_v9 }
  0xd5   : > { %2183 = vmatpush1.bf16.msra.mxu1 %v3333_v10  ;;  %2143 = vmatprep.subr.bf16.mxu0 %v3338_v11 }
  0xd6   : > { %2184 = vmatprep.subr.bf16.mxu1 %v3341_v12  ;;  %2173 = vmatprep.mubr.bf16.mxu0 %v3417_v22 }
  0xd7   : > { %2214 = vmatprep.mubr.bf16.mxu1 %v3417_v22 }
  0xd8   : > { %2144 = vmatpush1.bf16.msra.mxu0 %v3336_v13 }
  0xd9   : > { %2185 = vmatpush1.bf16.msra.mxu1 %v3339_v14  ;;  %2145 = vmatprep.subr.bf16.mxu0 %v3344_v15 }
  0xda   : > { %2186 = vmatprep.subr.bf16.mxu1 %v3347_v16 }
  0xdc   : > { %2146 = vmatpush1.bf16.msra.mxu0 %v3342_v17 }
  0xdd   : > { %2187 = vmatpush1.bf16.msra.mxu1 %v3345_v18  ;;  %2223 = vmatprep.subr.bf16.mxu0 %v3350_v19 }
  0xde   : > { %2264 = vmatprep.subr.bf16.mxu1 %v3353_v20 }
  0xdf   : > { %3103 = vmatmul.mubr.msk.bf16.vlgmr.msra.gmra.mrb[36].mxu0 %vm1399_vm0, %v3804_v37 }
  0xe0   : > { %3104 = vmatmul.mubr.msk.bf16.vlgmr.msra.gmra.mrb[36].mxu1 %vm1399_vm0, %v3804_v37  ;;  %2224 = vmatpush1.bf16.msra.mxu0 %v3348_v21 }
  0xe1   : > { %2265 = vmatpush1.bf16.msra.mxu1 %v3351_v23  ;;  %2225 = vmatprep.subr.bf16.mxu0 %v3356_v24 }
  0xe2   : > { %2266 = vmatprep.subr.bf16.mxu1 %v3359_v25  ;;  %2255 = vmatprep.mubr.bf16.mxu0 %v3417_v22 }
  0xe3   : > { %2296 = vmatprep.mubr.bf16.mxu1 %v3417_v22  ;;  %v4018_v51 = vpop.permute.xlu0 %646 }
  0xe4   : > { %2226 = vmatpush1.bf16.msra.mxu0 %v3354_v26 }
  0xe5   : > { %2267 = vmatpush1.bf16.msra.mxu1 %v3357_v27  ;;  %2227 = vmatprep.subr.bf16.mxu0 %v3362_v28 }
  0xe6   : > { %2268 = vmatprep.subr.bf16.mxu1 %v3365_v29 }
  0xe8   : > { %2228 = vmatpush1.bf16.msra.mxu0 %v3360_v30 }
  0xe9   : > { %2269 = vmatpush1.bf16.msra.mxu1 %v3363_v31  ;;  %2305 = vmatprep.subr.bf16.mxu0 %v3368_v32 }
  0xea   : > { %2346 = vmatprep.subr.bf16.mxu1 %v3371_v33 }
  0xeb   : > { %3105 = vmatmul.mubr.msk.bf16.vlgmr.msra.gmra.mrb[40].mxu0 %vm1399_vm0, %v3804_v37 }
  0xec   : > { %3106 = vmatmul.mubr.msk.bf16.vlgmr.msra.gmra.mrb[40].mxu1 %vm1399_vm0, %v3804_v37  ;;  %2306 = vmatpush1.bf16.msra.mxu0 %v3366_v34 }
  0xed   : > { %2347 = vmatpush1.bf16.msra.mxu1 %v3369_v35  ;;  %2307 = vmatprep.subr.bf16.mxu0 %v3374_v36 }
  0xee   : > { %2348 = vmatprep.subr.bf16.mxu1 %v3377_v38  ;;  %2337 = vmatprep.mubr.bf16.mxu0 %v3417_v22 }
  0xef   : > { %2378 = vmatprep.mubr.bf16.mxu1 %v3417_v22 }
  0xf0   : > { %2308 = vmatpush1.bf16.msra.mxu0 %v3372_v39 }
  0xf1   : > { %2349 = vmatpush1.bf16.msra.mxu1 %v3375_v40  ;;  %2309 = vmatprep.subr.bf16.mxu0 %v3380_v41 }
  0xf2   : > { %2350 = vmatprep.subr.bf16.mxu1 %v3383_v42 }
  0xf4   : > { %2310 = vmatpush1.bf16.msra.mxu0 %v3378_v43 }
  0xf5   : > { %2351 = vmatpush1.bf16.msra.mxu1 %v3381_v44  ;;  %2387 = vmatprep.subr.bf16.mxu0 %v3386_v45 }
  0xf7   : > { %3107 = vmatmul.mubr.msk.bf16.vlgmr.msra.gmra.mrb[44].mxu0 %vm1399_vm0, %v3804_v37 }
  0xf8   : > { %3108 = vmatmul.mubr.msk.bf16.vlgmr.msra.gmra.mrb[44].mxu1 %vm1399_vm0, %v3804_v37  ;;  %2388 = vmatpush1.bf16.msra.mxu0 %v3384_v46 }
  0xf9   : > { %2419 = vmatprep.mubr.bf16.mxu0 %v3417_v22  ;;  %2389 = vmatprep.subr.bf16.mxu0 %v3389_v47 }
  0xfc   : > { %2390 = vmatpush1.bf16.msra.mxu0 %v3387_v48 }
  0xfd   : > { %2391 = vmatprep.subr.bf16.mxu0 %v3392_v49 }
 0x100   : > { %2392 = vmatpush1.bf16.msra.mxu0 %v3390_v50 }
 0x103   : > { %3109 = vmatmul.mubr.msk.bf16.vlgmr.msra.gmra.mrb[48].mxu0 %vm1399_vm0, %v3804_v37  ;;  %v2634_v37 = vshrl.u32 %v2633_v54, 7 }
 0x105   : > { %v4025_v10 = vsub.s32 %v2632_v61, %v2634_v37 }
 0x146   : > { %v1437_v55 = vpop.f32.mrb[0].mxu0 }
 0x147   : > { %v1478_v56 = vpop.f32.mrb[0].mxu1  ;;  %v1438_v22 = vadd.f32 %v1437_v55, %v4018_v51  ;;  %v1439_v58 = vpop.f32.mrb[1].mxu0 }
 0x148   : > { %v1479_v57 = vadd.f32 %v1478_v56, %v4018_v51  ;;  %v1480_v59 = vpop.f32.mrb[1].mxu1  ;;  %v1440_v60 = vadd.f32 %v1439_v58, %v4018_v51  ;;  %v1441_v63 = vpop.f32.mrb[2].mxu0 }
 0x149   : > { %v1481_v62 = vadd.f32 %v1480_v59, %v4018_v51  ;;  %v1482_v0 = vpop.f32.mrb[2].mxu1  ;;  %v2428_v1 = vmul.f32 0.2, %v1438_v22  ;;  %v1442_v3 = vpop.f32.mrb[3].mxu0 }
 0x14a   : > { %v2430_v2 = vmul.f32 0.2, %v1479_v57  ;;  %v1483_v4 = vpop.f32.mrb[3].mxu1  ;;  %v2429_v5 = vmul.f32 0.2, %v1440_v60 }
 0x14b   : > { %v2431_v6 = vmul.f32 0.2, %v1481_v62  ;;  %v2478_v7 = vmax.f32 %v1438_v22, %v2428_v1 }
 0x14c   : > { %v2480_v8 = vmax.f32 %v1479_v57, %v2430_v2  ;;  %v2479_v9 = vmax.f32 %v1440_v60, %v2429_v5 }
 0x14d   : > { %v2481_v11 = vmax.f32 %v1481_v62, %v2431_v6 }
 0x14e   : > { %v3110_v12 = vpack.c.bf16 %v2479_v9, %v2478_v7 }
 0x14f   : > { %v3111_v13 = vpack.c.bf16 %v2481_v11, %v2480_v8 }
 0x150   : > { %v2636_v14 = vrot.slane %v3110_v12, %v4025_v10 }
 0x151   : > { %v2643_v15 = vrot.slane %v3111_v13, %v4025_v10 }
 0x152   : > { %v1519_v17 = vpop.f32.mrb[4].mxu0 }
 0x153   : > { %v2644_v16 = vcombine.low %v2636_v14, %v2643_v15  ;;  %v1560_v18 = vpop.f32.mrb[4].mxu1  ;;  %v1520_v19 = vadd.f32 %v1519_v17, %v4018_v51  ;;  %v1521_v21 = vpop.f32.mrb[5].mxu0 }
 0x154   : > { %v1561_v20 = vadd.f32 %v1560_v18, %v4018_v51  ;;  %v1562_v23 = vpop.f32.mrb[5].mxu1  ;;  %v1522_v24 = vadd.f32 %v1521_v21, %v4018_v51  ;;  %v1523_v26 = vpop.f32.mrb[6].mxu0 }
 0x155   : > { %2853 = vst [vmem:[%s4032_s11] sm:$0xff] %v2644_v16  ;;  %v1563_v25 = vadd.f32 %v1562_v23, %v4018_v51  ;;  %v1564_v27 = vpop.f32.mrb[6].mxu1  ;;  %v2432_v28 = vmul.f32 0.2, %v1520_v19  ;;  %v1524_v30 = vpop.f32.mrb[7].mxu0 }
 0x156   : > { %v2434_v29 = vmul.f32 0.2, %v1561_v20  ;;  %v1565_v31 = vpop.f32.mrb[7].mxu1  ;;  %v2433_v32 = vmul.f32 0.2, %v1522_v24 }
 0x157   : > { %v2435_v33 = vmul.f32 0.2, %v1563_v25  ;;  %v2482_v34 = vmax.f32 %v1520_v19, %v2432_v28 }
 0x158   : > { %v2484_v35 = vmax.f32 %v1561_v20, %v2434_v29  ;;  %v2483_v36 = vmax.f32 %v1522_v24, %v2433_v32 }
 0x159   : > { %v2485_v38 = vmax.f32 %v1563_v25, %v2435_v33 }
 0x15a   : > { %v3112_v39 = vpack.c.bf16 %v2483_v36, %v2482_v34 }
 0x15b   : > { %v3113_v40 = vpack.c.bf16 %v2485_v38, %v2484_v35 }
 0x15c   : > { %v2653_v41 = vrot.slane %v3112_v39, %v4025_v10 }
 0x15d   : > { %v2660_v42 = vrot.slane %v3113_v40, %v4025_v10 }
 0x15e   : > { %v1601_v44 = vpop.f32.mrb[8].mxu0 }
 0x15f   : > { %v2661_v43 = vcombine.low %v2653_v41, %v2660_v42  ;;  %v1642_v45 = vpop.f32.mrb[8].mxu1  ;;  %v1602_v46 = vadd.f32 %v1601_v44, %v4018_v51  ;;  %v1603_v48 = vpop.f32.mrb[9].mxu0 }
 0x160   : > { %v1643_v47 = vadd.f32 %v1642_v45, %v4018_v51  ;;  %v1644_v49 = vpop.f32.mrb[9].mxu1  ;;  %v1604_v50 = vadd.f32 %v1603_v48, %v4018_v51  ;;  %v1605_v53 = vpop.f32.mrb[10].mxu0 }
 0x161   : > { %2854 = vst [vmem:[%s4032_s11 + $0x8] sm:$0xff] %v2661_v43  ;;  %v1645_v52 = vadd.f32 %v1644_v49, %v4018_v51  ;;  %v1646_v54 = vpop.f32.mrb[10].mxu1  ;;  %v2436_v55 = vmul.f32 0.2, %v1602_v46  ;;  %v1606_v22 = vpop.f32.mrb[11].mxu0 }
 0x162   : > { %v2438_v56 = vmul.f32 0.2, %v1643_v47  ;;  %v1647_v57 = vpop.f32.mrb[11].mxu1  ;;  %v2437_v58 = vmul.f32 0.2, %v1604_v50 }
 0x163   : > { %v2439_v59 = vmul.f32 0.2, %v1645_v52  ;;  %v2486_v60 = vmax.f32 %v1602_v46, %v2436_v55 }
 0x164   : > { %v2488_v61 = vmax.f32 %v1643_v47, %v2438_v56  ;;  %v2487_v37 = vmax.f32 %v1604_v50, %v2437_v58 }
 0x165   : > { %v2489_v62 = vmax.f32 %v1645_v52, %v2439_v59 }
 0x166   : > { %v3114_v63 = vpack.c.bf16 %v2487_v37, %v2486_v60 }
 0x167   : > { %v3115_v0 = vpack.c.bf16 %v2489_v62, %v2488_v61 }
 0x168   : > { %v2670_v1 = vrot.slane %v3114_v63, %v4025_v10 }
 0x169   : > { %v2677_v2 = vrot.slane %v3115_v0, %v4025_v10 }
 0x16a   : > { %v1683_v4 = vpop.f32.mrb[12].mxu0 }
 0x16b   : > { %v2678_v3 = vcombine.low %v2670_v1, %v2677_v2  ;;  %v1724_v5 = vpop.f32.mrb[12].mxu1  ;;  %v1684_v6 = vadd.f32 %v1683_v4, %v4018_v51  ;;  %v1685_v8 = vpop.f32.mrb[13].mxu0 }
 0x16c   : > { %v1725_v7 = vadd.f32 %v1724_v5, %v4018_v51  ;;  %v1726_v9 = vpop.f32.mrb[13].mxu1  ;;  %v1686_v11 = vadd.f32 %v1685_v8, %v4018_v51  ;;  %v1687_v13 = vpop.f32.mrb[14].mxu0 }
 0x16d   : > { %2855 = vst [vmem:[%s4032_s11 + $0x10] sm:$0xff] %v2678_v3  ;;  %v1727_v12 = vadd.f32 %v1726_v9, %v4018_v51  ;;  %v1728_v14 = vpop.f32.mrb[14].mxu1  ;;  %v2440_v15 = vmul.f32 0.2, %v1684_v6  ;;  %v1688_v17 = vpop.f32.mrb[15].mxu0 }
 0x16e   : > { %v2442_v16 = vmul.f32 0.2, %v1725_v7  ;;  %v1729_v18 = vpop.f32.mrb[15].mxu1  ;;  %v2441_v19 = vmul.f32 0.2, %v1686_v11 }
 0x16f   : > { %v2443_v20 = vmul.f32 0.2, %v1727_v12  ;;  %v2490_v21 = vmax.f32 %v1684_v6, %v2440_v15 }
 0x170   : > { %v2492_v23 = vmax.f32 %v1725_v7, %v2442_v16  ;;  %v2491_v24 = vmax.f32 %v1686_v11, %v2441_v19 }
 0x171   : > { %v2493_v25 = vmax.f32 %v1727_v12, %v2443_v20 }
 0x172   : > { %v3116_v26 = vpack.c.bf16 %v2491_v24, %v2490_v21 }
 0x173   : > { %v3117_v27 = vpack.c.bf16 %v2493_v25, %v2492_v23 }
 0x174   : > { %v2687_v28 = vrot.slane %v3116_v26, %v4025_v10 }
 0x175   : > { %v2694_v29 = vrot.slane %v3117_v27, %v4025_v10 }
 0x176   : > { %v1765_v31 = vpop.f32.mrb[16].mxu0 }
 0x177   : > { %v2695_v30 = vcombine.low %v2687_v28, %v2694_v29  ;;  %v1806_v32 = vpop.f32.mrb[16].mxu1  ;;  %v1766_v33 = vadd.f32 %v1765_v31, %v4018_v51  ;;  %v1767_v35 = vpop.f32.mrb[17].mxu0 }
 0x178   : > { %v1807_v34 = vadd.f32 %v1806_v32, %v4018_v51  ;;  %v1808_v36 = vpop.f32.mrb[17].mxu1  ;;  %v1768_v38 = vadd.f32 %v1767_v35, %v4018_v51  ;;  %v1769_v40 = vpop.f32.mrb[18].mxu0 }
 0x179   : > { %2856 = vst [vmem:[%s4032_s11 + $0x18] sm:$0xff] %v2695_v30  ;;  %v1809_v39 = vadd.f32 %v1808_v36, %v4018_v51  ;;  %v1810_v41 = vpop.f32.mrb[18].mxu1  ;;  %v2444_v42 = vmul.f32 0.2, %v1766_v33  ;;  %v1770_v44 = vpop.f32.mrb[19].mxu0 }
 0x17a   : > { %v2446_v43 = vmul.f32 0.2, %v1807_v34  ;;  %v1811_v45 = vpop.f32.mrb[19].mxu1  ;;  %v2445_v46 = vmul.f32 0.2, %v1768_v38 }
 0x17b   : > { %v2447_v47 = vmul.f32 0.2, %v1809_v39  ;;  %v2494_v48 = vmax.f32 %v1766_v33, %v2444_v42 }
 0x17c   : > { %v2496_v49 = vmax.f32 %v1807_v34, %v2446_v43  ;;  %v2495_v50 = vmax.f32 %v1768_v38, %v2445_v46 }
 0x17d   : > { %v2497_v52 = vmax.f32 %v1809_v39, %v2447_v47 }
 0x17e   : > { %v3118_v53 = vpack.c.bf16 %v2495_v50, %v2494_v48 }
 0x17f   : > { %v3119_v54 = vpack.c.bf16 %v2497_v52, %v2496_v49 }
 0x180   : > { %v2704_v55 = vrot.slane %v3118_v53, %v4025_v10 }
 0x181   : > { %v2711_v56 = vrot.slane %v3119_v54, %v4025_v10 }
 0x182   : > { %v1847_v57 = vpop.f32.mrb[20].mxu0 }
 0x183   : > { %v2712_v22 = vcombine.low %v2704_v55, %v2711_v56  ;;  %v1888_v58 = vpop.f32.mrb[20].mxu1  ;;  %v1848_v59 = vadd.f32 %v1847_v57, %v4018_v51  ;;  %v1849_v61 = vpop.f32.mrb[21].mxu0 }
 0x184   : > { %v1889_v60 = vadd.f32 %v1888_v58, %v4018_v51  ;;  %v1890_v37 = vpop.f32.mrb[21].mxu1  ;;  %v1850_v62 = vadd.f32 %v1849_v61, %v4018_v51  ;;  %v1851_v0 = vpop.f32.mrb[22].mxu0 }
 0x185   : > { %2857 = vst [vmem:[%s4032_s11 + $0x20] sm:$0xff] %v2712_v22  ;;  %v1891_v63 = vadd.f32 %v1890_v37, %v4018_v51  ;;  %v1892_v1 = vpop.f32.mrb[22].mxu1  ;;  %v2448_v2 = vmul.f32 0.2, %v1848_v59  ;;  %v1852_v4 = vpop.f32.mrb[23].mxu0 }
 0x186   : > { %v2450_v3 = vmul.f32 0.2, %v1889_v60  ;;  %v1893_v5 = vpop.f32.mrb[23].mxu1  ;;  %v2449_v6 = vmul.f32 0.2, %v1850_v62 }
 0x187   : > { %v2451_v7 = vmul.f32 0.2, %v1891_v63  ;;  %v2498_v8 = vmax.f32 %v1848_v59, %v2448_v2 }
 0x188   : > { %v2500_v9 = vmax.f32 %v1889_v60, %v2450_v3  ;;  %v2499_v11 = vmax.f32 %v1850_v62, %v2449_v6 }
 0x189   : > { %v2501_v12 = vmax.f32 %v1891_v63, %v2451_v7 }
 0x18a   : > { %v3120_v13 = vpack.c.bf16 %v2499_v11, %v2498_v8 }
 0x18b   : > { %v3121_v14 = vpack.c.bf16 %v2501_v12, %v2500_v9 }
 0x18c   : > { %v2721_v15 = vrot.slane %v3120_v13, %v4025_v10 }
 0x18d   : > { %v2728_v16 = vrot.slane %v3121_v14, %v4025_v10 }
 0x18e   : > { %v1929_v18 = vpop.f32.mrb[24].mxu0 }
 0x18f   : > { %v2729_v17 = vcombine.low %v2721_v15, %v2728_v16  ;;  %v1970_v19 = vpop.f32.mrb[24].mxu1  ;;  %v1930_v20 = vadd.f32 %v1929_v18, %v4018_v51  ;;  %v1931_v23 = vpop.f32.mrb[25].mxu0 }
 0x190   : > { %v1971_v21 = vadd.f32 %v1970_v19, %v4018_v51  ;;  %v1972_v24 = vpop.f32.mrb[25].mxu1  ;;  %v1932_v25 = vadd.f32 %v1931_v23, %v4018_v51  ;;  %v1933_v27 = vpop.f32.mrb[26].mxu0 }
 0x191   : > { %2858 = vst [vmem:[%s4032_s11 + $0x28] sm:$0xff] %v2729_v17  ;;  %v1973_v26 = vadd.f32 %v1972_v24, %v4018_v51  ;;  %v1974_v28 = vpop.f32.mrb[26].mxu1  ;;  %v2452_v29 = vmul.f32 0.2, %v1930_v20  ;;  %v1934_v31 = vpop.f32.mrb[27].mxu0 }
 0x192   : > { %v2454_v30 = vmul.f32 0.2, %v1971_v21  ;;  %v1975_v32 = vpop.f32.mrb[27].mxu1  ;;  %v2453_v33 = vmul.f32 0.2, %v1932_v25 }
 0x193   : > { %v2455_v34 = vmul.f32 0.2, %v1973_v26  ;;  %v2502_v35 = vmax.f32 %v1930_v20, %v2452_v29 }
 0x194   : > { %v2504_v36 = vmax.f32 %v1971_v21, %v2454_v30  ;;  %v2503_v38 = vmax.f32 %v1932_v25, %v2453_v33 }
 0x195   : > { %v2505_v39 = vmax.f32 %v1973_v26, %v2455_v34 }
 0x196   : > { %v3122_v40 = vpack.c.bf16 %v2503_v38, %v2502_v35 }
 0x197   : > { %v3123_v41 = vpack.c.bf16 %v2505_v39, %v2504_v36 }
 0x198   : > { %v2738_v42 = vrot.slane %v3122_v40, %v4025_v10 }
 0x199   : > { %v2745_v43 = vrot.slane %v3123_v41, %v4025_v10 }
 0x19a   : > { %v2011_v45 = vpop.f32.mrb[28].mxu0 }
 0x19b   : > { %v2746_v44 = vcombine.low %v2738_v42, %v2745_v43  ;;  %v2052_v46 = vpop.f32.mrb[28].mxu1  ;;  %v2012_v47 = vadd.f32 %v2011_v45, %v4018_v51  ;;  %v2013_v49 = vpop.f32.mrb[29].mxu0 }
 0x19c   : > { %v2053_v48 = vadd.f32 %v2052_v46, %v4018_v51  ;;  %v2054_v50 = vpop.f32.mrb[29].mxu1  ;;  %v2014_v52 = vadd.f32 %v2013_v49, %v4018_v51  ;;  %v2015_v54 = vpop.f32.mrb[30].mxu0 }
 0x19d   : > { %2859 = vst [vmem:[%s4032_s11 + $0x30] sm:$0xff] %v2746_v44  ;;  %v2055_v53 = vadd.f32 %v2054_v50, %v4018_v51  ;;  %v2056_v55 = vpop.f32.mrb[30].mxu1  ;;  %v2456_v56 = vmul.f32 0.2, %v2012_v47  ;;  %v2016_v57 = vpop.f32.mrb[31].mxu0 }
 0x19e   : > { %v2458_v22 = vmul.f32 0.2, %v2053_v48  ;;  %v2057_v58 = vpop.f32.mrb[31].mxu1  ;;  %v2457_v59 = vmul.f32 0.2, %v2014_v52 }
 0x19f   : > { %v2459_v60 = vmul.f32 0.2, %v2055_v53  ;;  %v2506_v61 = vmax.f32 %v2012_v47, %v2456_v56 }
 0x1a0   : > { %v2508_v37 = vmax.f32 %v2053_v48, %v2458_v22  ;;  %v2507_v62 = vmax.f32 %v2014_v52, %v2457_v59 }
 0x1a1   : > { %v2509_v63 = vmax.f32 %v2055_v53, %v2459_v60 }
 0x1a2   : > { %v3124_v0 = vpack.c.bf16 %v2507_v62, %v2506_v61 }
 0x1a3   : > { %v3125_v1 = vpack.c.bf16 %v2509_v63, %v2508_v37 }
 0x1a4   : > { %v2755_v2 = vrot.slane %v3124_v0, %v4025_v10 }
 0x1a5   : > { %v2762_v3 = vrot.slane %v3125_v1, %v4025_v10 }
 0x1a6   : > { %v2093_v5 = vpop.f32.mrb[32].mxu0 }
 0x1a7   : > { %v2763_v4 = vcombine.low %v2755_v2, %v2762_v3  ;;  %v2134_v6 = vpop.f32.mrb[32].mxu1  ;;  %v2094_v7 = vadd.f32 %v2093_v5, %v4018_v51  ;;  %v2095_v9 = vpop.f32.mrb[33].mxu0 }
 0x1a8   : > { %v2135_v8 = vadd.f32 %v2134_v6, %v4018_v51  ;;  %v2136_v11 = vpop.f32.mrb[33].mxu1  ;;  %v2096_v12 = vadd.f32 %v2095_v9, %v4018_v51  ;;  %v2097_v14 = vpop.f32.mrb[34].mxu0 }
 0x1a9   : > { %2860 = vst [vmem:[%s4032_s11 + $0x38] sm:$0xff] %v2763_v4  ;;  %v2137_v13 = vadd.f32 %v2136_v11, %v4018_v51  ;;  %v2138_v15 = vpop.f32.mrb[34].mxu1  ;;  %v2460_v16 = vmul.f32 0.2, %v2094_v7  ;;  %v2098_v18 = vpop.f32.mrb[35].mxu0 }
 0x1aa   : > { %v2462_v17 = vmul.f32 0.2, %v2135_v8  ;;  %v2139_v19 = vpop.f32.mrb[35].mxu1  ;;  %v2461_v20 = vmul.f32 0.2, %v2096_v12 }
 0x1ab   : > { %v2463_v21 = vmul.f32 0.2, %v2137_v13  ;;  %v2510_v23 = vmax.f32 %v2094_v7, %v2460_v16 }
 0x1ac   : > { %v2512_v24 = vmax.f32 %v2135_v8, %v2462_v17  ;;  %v2511_v25 = vmax.f32 %v2096_v12, %v2461_v20 }
 0x1ad   : > { %v2513_v26 = vmax.f32 %v2137_v13, %v2463_v21 }
 0x1ae   : > { %v3126_v27 = vpack.c.bf16 %v2511_v25, %v2510_v23 }
 0x1af   : > { %v3127_v28 = vpack.c.bf16 %v2513_v26, %v2512_v24 }
 0x1b0   : > { %v2772_v29 = vrot.slane %v3126_v27, %v4025_v10 }
 0x1b1   : > { %v2779_v30 = vrot.slane %v3127_v28, %v4025_v10 }
 0x1b2   : > { %v2175_v32 = vpop.f32.mrb[36].mxu0 }
 0x1b3   : > { %v2780_v31 = vcombine.low %v2772_v29, %v2779_v30  ;;  %v2216_v33 = vpop.f32.mrb[36].mxu1  ;;  %v2176_v34 = vadd.f32 %v2175_v32, %v4018_v51  ;;  %v2177_v36 = vpop.f32.mrb[37].mxu0 }
 0x1b4   : > { %v2217_v35 = vadd.f32 %v2216_v33, %v4018_v51  ;;  %v2218_v38 = vpop.f32.mrb[37].mxu1  ;;  %v2178_v39 = vadd.f32 %v2177_v36, %v4018_v51  ;;  %v2179_v41 = vpop.f32.mrb[38].mxu0 }
 0x1b5   : > { %2861 = vst [vmem:[%s4032_s11 + $0x40] sm:$0xff] %v2780_v31  ;;  %v2219_v40 = vadd.f32 %v2218_v38, %v4018_v51  ;;  %v2220_v42 = vpop.f32.mrb[38].mxu1  ;;  %v2464_v43 = vmul.f32 0.2, %v2176_v34  ;;  %v2180_v45 = vpop.f32.mrb[39].mxu0 }
 0x1b6   : > { %v2466_v44 = vmul.f32 0.2, %v2217_v35  ;;  %v2221_v46 = vpop.f32.mrb[39].mxu1  ;;  %v2465_v47 = vmul.f32 0.2, %v2178_v39 }
 0x1b7   : > { %v2467_v48 = vmul.f32 0.2, %v2219_v40  ;;  %v2514_v49 = vmax.f32 %v2176_v34, %v2464_v43 }
 0x1b8   : > { %v2516_v50 = vmax.f32 %v2217_v35, %v2466_v44  ;;  %v2515_v52 = vmax.f32 %v2178_v39, %v2465_v47 }
 0x1b9   : > { %v2517_v53 = vmax.f32 %v2219_v40, %v2467_v48 }
 0x1ba   : > { %v3128_v54 = vpack.c.bf16 %v2515_v52, %v2514_v49 }
 0x1bb   : > { %v3129_v55 = vpack.c.bf16 %v2517_v53, %v2516_v50 }
 0x1bc   : > { %v2789_v56 = vrot.slane %v3128_v54, %v4025_v10 }
 0x1bd   : > { %v2796_v22 = vrot.slane %v3129_v55, %v4025_v10 }
 0x1be   : > { %v2257_v58 = vpop.f32.mrb[40].mxu0 }
 0x1bf   : > { %v2797_v57 = vcombine.low %v2789_v56, %v2796_v22  ;;  %v2298_v59 = vpop.f32.mrb[40].mxu1  ;;  %v2258_v60 = vadd.f32 %v2257_v58, %v4018_v51  ;;  %v2259_v37 = vpop.f32.mrb[41].mxu0 }
 0x1c0   : > { %v2299_v61 = vadd.f32 %v2298_v59, %v4018_v51  ;;  %v2300_v62 = vpop.f32.mrb[41].mxu1  ;;  %v2260_v63 = vadd.f32 %v2259_v37, %v4018_v51  ;;  %v2261_v1 = vpop.f32.mrb[42].mxu0 }
 0x1c1   : > { %2862 = vst [vmem:[%s4032_s11 + $0x48] sm:$0xff] %v2797_v57  ;;  %v2301_v0 = vadd.f32 %v2300_v62, %v4018_v51  ;;  %v2302_v2 = vpop.f32.mrb[42].mxu1  ;;  %v2468_v3 = vmul.f32 0.2, %v2258_v60  ;;  %v2262_v5 = vpop.f32.mrb[43].mxu0 }
 0x1c2   : > { %v2470_v4 = vmul.f32 0.2, %v2299_v61  ;;  %v2303_v6 = vpop.f32.mrb[43].mxu1  ;;  %v2469_v7 = vmul.f32 0.2, %v2260_v63 }
 0x1c3   : > { %v2471_v8 = vmul.f32 0.2, %v2301_v0  ;;  %v2518_v9 = vmax.f32 %v2258_v60, %v2468_v3 }
 0x1c4   : > { %v2520_v11 = vmax.f32 %v2299_v61, %v2470_v4  ;;  %v2519_v12 = vmax.f32 %v2260_v63, %v2469_v7 }
 0x1c5   : > { %v2521_v13 = vmax.f32 %v2301_v0, %v2471_v8 }
 0x1c6   : > { %v3130_v14 = vpack.c.bf16 %v2519_v12, %v2518_v9 }
 0x1c7   : > { %v3131_v15 = vpack.c.bf16 %v2521_v13, %v2520_v11 }
 0x1c8   : > { %v2806_v16 = vrot.slane %v3130_v14, %v4025_v10 }
 0x1c9   : > { %v2813_v17 = vrot.slane %v3131_v15, %v4025_v10 }
 0x1ca   : > { %v2339_v19 = vpop.f32.mrb[44].mxu0 }
 0x1cb   : > { %v2814_v18 = vcombine.low %v2806_v16, %v2813_v17  ;;  %v2380_v20 = vpop.f32.mrb[44].mxu1  ;;  %v2340_v21 = vadd.f32 %v2339_v19, %v4018_v51  ;;  %v2341_v24 = vpop.f32.mrb[45].mxu0 }
 0x1cc   : > { %v2381_v23 = vadd.f32 %v2380_v20, %v4018_v51  ;;  %v2382_v25 = vpop.f32.mrb[45].mxu1  ;;  %v2342_v26 = vadd.f32 %v2341_v24, %v4018_v51  ;;  %v2343_v28 = vpop.f32.mrb[46].mxu0 }
 0x1cd   : > { %2863 = vst [vmem:[%s4032_s11 + $0x50] sm:$0xff] %v2814_v18  ;;  %v2383_v27 = vadd.f32 %v2382_v25, %v4018_v51  ;;  %v2384_v29 = vpop.f32.mrb[46].mxu1  ;;  %v2472_v30 = vmul.f32 0.2, %v2340_v21  ;;  %v2344_v32 = vpop.f32.mrb[47].mxu0 }
 0x1ce   : > { %v2474_v31 = vmul.f32 0.2, %v2381_v23  ;;  %v2385_v33 = vpop.f32.mrb[47].mxu1  ;;  %v2473_v34 = vmul.f32 0.2, %v2342_v26 }
 0x1cf   : > { %v2475_v35 = vmul.f32 0.2, %v2383_v27  ;;  %v2522_v36 = vmax.f32 %v2340_v21, %v2472_v30 }
 0x1d0   : > { %v2524_v38 = vmax.f32 %v2381_v23, %v2474_v31  ;;  %v2523_v39 = vmax.f32 %v2342_v26, %v2473_v34 }
 0x1d1   : > { %v2525_v40 = vmax.f32 %v2383_v27, %v2475_v35 }
 0x1d2   : > { %v3132_v41 = vpack.c.bf16 %v2523_v39, %v2522_v36 }
 0x1d3   : > { %v3133_v42 = vpack.c.bf16 %v2525_v40, %v2524_v38 }
 0x1d4   : > { %v2823_v43 = vrot.slane %v3132_v41, %v4025_v10 }
 0x1d5   : > { %v2830_v44 = vrot.slane %v3133_v42, %v4025_v10 }
 0x1d6   : > { %v2421_v46 = vpop.f32.mrb[48].mxu0 }
 0x1d7   : > { %v2831_v45 = vcombine.low %v2823_v43, %v2830_v44  ;;  %v2422_v47 = vadd.f32 %v2421_v46, %v4018_v51  ;;  %v2423_v48 = vpop.f32.mrb[49].mxu0 }
 0x1d8   : > { %v2424_v49 = vadd.f32 %v2423_v48, %v4018_v51  ;;  %v2425_v50 = vpop.f32.mrb[50].mxu0 }
 0x1d9   : > { %2864 = vst [vmem:[%s4032_s11 + $0x58] sm:$0xff] %v2831_v45  ;;  %v2476_v52 = vmul.f32 0.2, %v2422_v47  ;;  %v2426_v53 = vpop.f32.mrb[51].mxu0 }
 0x1da   : > { %v2477_v54 = vmul.f32 0.2, %v2424_v49 }
 0x1db   : > { %v2526_v55 = vmax.f32 %v2422_v47, %v2476_v52 }
 0x1dc   : > { %v2527_v56 = vmax.f32 %v2424_v49, %v2477_v54 }
 0x1de   : > { %v3134_v22 = vpack.c.bf16 %v2527_v56, %v2526_v55 }
 0x1e0   : > { %3135 = vst.sshfl [vmem:[%s4032_s11 + $0x60] sm:$0x33 pattern:$0x76325410] %v3134_v22 }
 0x1e1 PF: > { %p10_p9 = scmp.ge.s32.totalorder %s3456_s16, 4   ;;  %s4129_s12 = smov %s3411_s13 }
 0x1e2   : > { %s4130_s13 = smov %s3465_s19  ;;  %s4131_s14 = smov %s3456_s16 }
 0x1e3   :  { %12 = sbr.rel (!%p10_p9) target bundleno = 2 (0x2), region = 90 }

// kernel: generator_forward.10
= control target key start
LH: loop header
LB: loop body
LE: loop exit
PB: predicated region body
PF: predicated region fallthrough
CT: control target
= control target key end

     0   :  { %v1689_v1 = vmov 0   ;;  %vm630_vm0 = vcmask 523264   ;;  %vm1691_vm1 = vmmov 0   ;;  %s2122_s1 = inlined_call_operand.vmem [shape: bf16[64,3200], index: 1, kind: input, shape index: {}]   ;;  %s2123_s0 = inlined_call_operand.vmem [shape: bf16[4,64], index: 0, kind: input, shape index: {}]   ;;  %s2124_s2 = inlined_call_operand.vmem [shape: f32[4,1], index: 2, kind: input, shape index: {}]   ;;  %s2125_s3 = inlined_call_operand.vmem [shape: bf16[4,3200], index: 3, kind: output, shape index: {}]  }
   0x1   :  { %v1541_v0 = vld [vmem:[%s2122_s1 + $0x4] ss:$100 sps:$4 sm:$0xff]   ;;  %666 = vmatprep.mubr.bf16.mxu0 %v1689_v1  ;;  %707 = vmatprep.mubr.bf16.mxu1 %v1689_v1  ;;  %v1543_v2 = vld [vmem:[%s2122_s1 + $0xc] ss:$100 sps:$4 sm:$0xff]   ;;  %v1549_v6 = vld [vmem:[%s2122_s1 + $0xd4] ss:$100 sps:$4 sm:$0xff]  }
   0x2   :  { %1540 = vset.pattern.permute.xlu0 %v1689_v1  ;;  %634 = vmatprep.subr.bf16.mxu0 %v1541_v0  ;;  %v1545_v3 = vld [vmem:[%s2122_s1] ss:$100 sps:$4 sm:$0xff]   ;;  %v1546_v4 = vld [vmem:[%s2122_s1 + $0x8] ss:$100 sps:$4 sm:$0xff]   ;;  %v1552_v8 = vld [vmem:[%s2122_s1 + $0xd0] ss:$100 sps:$4 sm:$0xff]  }
   0x3   :  { %675 = vmatprep.subr.bf16.mxu1 %v1543_v2  ;;  %v1547_v5 = vld [vmem:[%s2122_s1 + $0xcc] ss:$100 sps:$4 sm:$0xff]   ;;  %635 = vmatpush1.bf16.msra.mxu0 %v1545_v3  ;;  %v1553_v9 = vld [vmem:[%s2122_s1 + $0x194] ss:$100 sps:$4 sm:$0xff]   ;;  %v1555_v10 = vld [vmem:[%s2122_s1 + $0x19c] ss:$100 sps:$4 sm:$0xff]  }
   0x4   :  { %676 = vmatpush1.bf16.msra.mxu1 %v1546_v4  ;;  %v1551_v7 = vld [vmem:[%s2122_s1 + $0xc8] ss:$100 sps:$4 sm:$0xff]   ;;  %636 = vmatprep.subr.bf16.mxu0 %v1547_v5  ;;  %v1557_v11 = vld [vmem:[%s2122_s1 + $0x190] ss:$100 sps:$4 sm:$0xff]   ;;  %v1558_v12 = vld [vmem:[%s2122_s1 + $0x198] ss:$100 sps:$4 sm:$0xff]  }
   0x5   :  { %677 = vmatprep.subr.bf16.mxu1 %v1549_v6  ;;  %v1559_v13 = vld [vmem:[%s2122_s1 + $0x25c] ss:$100 sps:$4 sm:$0xff]   ;;  %v1561_v14 = vld [vmem:[%s2122_s1 + $0x264] ss:$100 sps:$4 sm:$0xff]   ;;  %v1567_v17 = vld [vmem:[%s2122_s1 + $0x14] ss:$100 sps:$4 sm:$0xff]  }
   0x6   :  { %v1563_v15 = vld [vmem:[%s2122_s1 + $0x258] ss:$100 sps:$4 sm:$0xff]   ;;  %v1564_v16 = vld [vmem:[%s2122_s1 + $0x260] ss:$100 sps:$4 sm:$0xff]   ;;  %v1565_v20 = vld [vmem:[%s2122_s1 + $0x10] ss:$100 sps:$4 sm:$0xff]  }
   0x7   :  { %637 = vmatpush1.bf16.msra.mxu0 %v1551_v7  ;;  %v1570_v18 = vld [vmem:[%s2122_s1 + $0x1c] ss:$100 sps:$4 sm:$0xff]   ;;  %v1576_v23 = vld [vmem:[%s2122_s1 + $0xe4] ss:$100 sps:$4 sm:$0xff]   ;;  %v1582_v27 = vld [vmem:[%s2122_s1 + $0x1ac] ss:$100 sps:$4 sm:$0xff]  }
   0x8   :  { %678 = vmatpush1.bf16.msra.mxu1 %v1552_v8  ;;  %638 = vmatprep.subr.bf16.mxu0 %v1553_v9  ;;  %v1773_v19 = vld [vmem:[%s2123_s0] sm:$0x3]  ;;  %v1568_v21 = vld [vmem:[%s2122_s1 + $0x18] ss:$100 sps:$4 sm:$0xff]   ;;  %v1579_v26 = vld [vmem:[%s2122_s1 + $0x1a4] ss:$100 sps:$4 sm:$0xff]  }
   0x9   :  { %679 = vmatprep.subr.bf16.mxu1 %v1555_v10  ;;  %v1573_v22 = vld [vmem:[%s2122_s1 + $0xdc] ss:$100 sps:$4 sm:$0xff]   ;;  %v1580_v29 = vld [vmem:[%s2122_s1 + $0x1a8] ss:$100 sps:$4 sm:$0xff]   ;;  %v1588_v31 = vld [vmem:[%s2122_s1 + $0x274] ss:$100 sps:$4 sm:$0xff]  }
   0xa   :  { %v1571_v24 = vld [vmem:[%s2122_s1 + $0xd8] ss:$100 sps:$4 sm:$0xff]   ;;  %v1574_v25 = vld [vmem:[%s2122_s1 + $0xe0] ss:$100 sps:$4 sm:$0xff]   ;;  %v1585_v30 = vld [vmem:[%s2122_s1 + $0x26c] ss:$100 sps:$4 sm:$0xff]  }
   0xb   :  { %639 = vmatpush1.bf16.msra.mxu0 %v1557_v11  ;;  %v1577_v28 = vld [vmem:[%s2122_s1 + $0x1a0] ss:$100 sps:$4 sm:$0xff]   ;;  %v1583_v32 = vld [vmem:[%s2122_s1 + $0x268] ss:$100 sps:$4 sm:$0xff]   ;;  %v1586_v33 = vld [vmem:[%s2122_s1 + $0x270] ss:$100 sps:$4 sm:$0xff]  }
   0xc   :  { %680 = vmatpush1.bf16.msra.mxu1 %v1558_v12  ;;  %640 = vmatprep.subr.bf16.mxu0 %v1559_v13  ;;  %v1591_v34 = vld [vmem:[%s2122_s1 + $0x24] ss:$100 sps:$4 sm:$0xff]   ;;  %v1594_v35 = vld [vmem:[%s2122_s1 + $0x2c] ss:$100 sps:$4 sm:$0xff]   ;;  %v1600_v39 = vld [vmem:[%s2122_s1 + $0xf4] ss:$100 sps:$4 sm:$0xff]  }
   0xd   :  { %681 = vmatprep.subr.bf16.mxu1 %v1561_v14  ;;  %v1589_v36 = vld [vmem:[%s2122_s1 + $0x20] ss:$100 sps:$4 sm:$0xff]   ;;  %v1592_v37 = vld [vmem:[%s2122_s1 + $0x28] ss:$100 sps:$4 sm:$0xff]   ;;  %v1598_v41 = vld [vmem:[%s2122_s1 + $0xf0] ss:$100 sps:$4 sm:$0xff]  }
   0xe   :  { %v1597_v38 = vld [vmem:[%s2122_s1 + $0xec] ss:$100 sps:$4 sm:$0xff]   ;;  %v1603_v42 = vld [vmem:[%s2122_s1 + $0x1b4] ss:$100 sps:$4 sm:$0xff]   ;;  %v1606_v43 = vld [vmem:[%s2122_s1 + $0x1bc] ss:$100 sps:$4 sm:$0xff]  }
   0xf   :  { %641 = vmatpush1.bf16.msra.mxu0 %v1563_v15  ;;  %v1595_v40 = vld [vmem:[%s2122_s1 + $0xe8] ss:$100 sps:$4 sm:$0xff]   ;;  %v1601_v44 = vld [vmem:[%s2122_s1 + $0x1b0] ss:$100 sps:$4 sm:$0xff]   ;;  %v1604_v45 = vld [vmem:[%s2122_s1 + $0x1b8] ss:$100 sps:$4 sm:$0xff]  }
  0x10   :  { %682 = vmatpush1.bf16.msra.mxu1 %v1564_v16  ;;  %716 = vmatprep.subr.bf16.mxu0 %v1567_v17  ;;  %v1609_v46 = vld [vmem:[%s2122_s1 + $0x27c] ss:$100 sps:$4 sm:$0xff]   ;;  %v1612_v47 = vld [vmem:[%s2122_s1 + $0x284] ss:$100 sps:$4 sm:$0xff]   ;;  %v1615_v50 = vld [vmem:[%s2122_s1 + $0x34] ss:$100 sps:$4 sm:$0xff]  }
  0x11   :  { %757 = vmatprep.subr.bf16.mxu1 %v1570_v18  ;;  %v1607_v48 = vld [vmem:[%s2122_s1 + $0x278] ss:$100 sps:$4 sm:$0xff]   ;;  %v1610_v49 = vld [vmem:[%s2122_s1 + $0x280] ss:$100 sps:$4 sm:$0xff]   ;;  %v1613_v52 = vld [vmem:[%s2122_s1 + $0x30] ss:$100 sps:$4 sm:$0xff]  }
  0x12   :  { %1493 = vmatmul.mubr.msk.bf16.vlgmr.msra.gmra.mrb[0].mxu0 %vm630_vm0, %v1773_v19  ;;  %v1618_v51 = vld [vmem:[%s2122_s1 + $0x3c] ss:$100 sps:$4 sm:$0xff]   ;;  %v1624_v55 = vld [vmem:[%s2122_s1 + $0x104] ss:$100 sps:$4 sm:$0xff]   ;;  %v1630_v59 = vld [vmem:[%s2122_s1 + $0x1cc] ss:$100 sps:$4 sm:$0xff]  }
  0x13   :  { %1494 = vmatmul.mubr.msk.bf16.vlgmr.msra.gmra.mrb[0].mxu1 %vm630_vm0, %v1773_v19  ;;  %717 = vmatpush1.bf16.msra.mxu0 %v1565_v20  ;;  %v1616_v53 = vld [vmem:[%s2122_s1 + $0x38] ss:$100 sps:$4 sm:$0xff]   ;;  %v1622_v57 = vld [vmem:[%s2122_s1 + $0x100] ss:$100 sps:$4 sm:$0xff]   ;;  %v1628_v61 = vld [vmem:[%s2122_s1 + $0x1c8] ss:$100 sps:$4 sm:$0xff]  }
  0x14   :  { %758 = vmatpush1.bf16.msra.mxu1 %v1568_v21  ;;  %718 = vmatprep.subr.bf16.mxu0 %v1573_v22  ;;  %v1621_v54 = vld [vmem:[%s2122_s1 + $0xfc] ss:$100 sps:$4 sm:$0xff]   ;;  %v1627_v58 = vld [vmem:[%s2122_s1 + $0x1c4] ss:$100 sps:$4 sm:$0xff]   ;;  %v1633_v62 = vld [vmem:[%s2122_s1 + $0x28c] ss:$100 sps:$4 sm:$0xff]  }
  0x15   :  { %759 = vmatprep.subr.bf16.mxu1 %v1576_v23  ;;  %748 = vmatprep.mubr.bf16.mxu0 %v1689_v1  ;;  %v1619_v56 = vld [vmem:[%s2122_s1 + $0xf8] ss:$100 sps:$4 sm:$0xff]   ;;  %v1625_v60 = vld [vmem:[%s2122_s1 + $0x1c0] ss:$100 sps:$4 sm:$0xff]   ;;  %v1631_v0 = vld [vmem:[%s2122_s1 + $0x288] ss:$100 sps:$4 sm:$0xff]  }
  0x16   :  { %789 = vmatprep.mubr.bf16.mxu1 %v1689_v1  ;;  %v1636_v63 = vld [vmem:[%s2122_s1 + $0x294] ss:$100 sps:$4 sm:$0xff]   ;;  %v1639_v3 = vld [vmem:[%s2122_s1 + $0x44] ss:$100 sps:$4 sm:$0xff]   ;;  %v1642_v4 = vld [vmem:[%s2122_s1 + $0x4c] ss:$100 sps:$4 sm:$0xff]  }
  0x17   :  { %719 = vmatpush1.bf16.msra.mxu0 %v1571_v24  ;;  %v1634_v2 = vld [vmem:[%s2122_s1 + $0x290] ss:$100 sps:$4 sm:$0xff]   ;;  %v1637_v5 = vld [vmem:[%s2122_s1 + $0x40] ss:$100 sps:$4 sm:$0xff]   ;;  %v1640_v6 = vld [vmem:[%s2122_s1 + $0x48] ss:$100 sps:$4 sm:$0xff]  }
  0x18   :  { %760 = vmatpush1.bf16.msra.mxu1 %v1574_v25  ;;  %720 = vmatprep.subr.bf16.mxu0 %v1579_v26  ;;  %v1645_v7 = vld [vmem:[%s2122_s1 + $0x10c] ss:$100 sps:$4 sm:$0xff]   ;;  %v1648_v8 = vld [vmem:[%s2122_s1 + $0x114] ss:$100 sps:$4 sm:$0xff]   ;;  %v120_v9 = vld [vmem:[%s2124_s2] sm:$0xf] }
  0x19   :  { %761 = vmatprep.subr.bf16.mxu1 %v1582_v27  ;;  %123 = vperm.xlu0 %1540, %v120_v9   ;;  %v1643_v10 = vld [vmem:[%s2122_s1 + $0x108] ss:$100 sps:$4 sm:$0xff]   ;;  %v1646_v11 = vld [vmem:[%s2122_s1 + $0x110] ss:$100 sps:$4 sm:$0xff]   ;;  %v1654_v13 = vld [vmem:[%s2122_s1 + $0x1dc] ss:$100 sps:$4 sm:$0xff]  }
  0x1a   :  { %v1651_v12 = vld [vmem:[%s2122_s1 + $0x1d4] ss:$100 sps:$4 sm:$0xff]   ;;  %v1657_v16 = vld [vmem:[%s2122_s1 + $0x29c] ss:$100 sps:$4 sm:$0xff]   ;;  %v1660_v17 = vld [vmem:[%s2122_s1 + $0x2a4] ss:$100 sps:$4 sm:$0xff]  }
  0x1b   :  { %721 = vmatpush1.bf16.msra.mxu0 %v1577_v28  ;;  %v1649_v14 = vld [vmem:[%s2122_s1 + $0x1d0] ss:$100 sps:$4 sm:$0xff]   ;;  %v1652_v15 = vld [vmem:[%s2122_s1 + $0x1d8] ss:$100 sps:$4 sm:$0xff]   ;;  %v1658_v20 = vld [vmem:[%s2122_s1 + $0x2a0] ss:$100 sps:$4 sm:$0xff]  }
  0x1c   :  { %762 = vmatpush1.bf16.msra.mxu1 %v1580_v29  ;;  %722 = vmatprep.subr.bf16.mxu0 %v1585_v30  ;;  %v1655_v18 = vld [vmem:[%s2122_s1 + $0x298] ss:$100 sps:$4 sm:$0xff]   ;;  %v1661_v23 = vld [vmem:[%s2122_s1 + $0x50] ss:$100 sps:$4 sm:$0xff]   ;;  %v1672_v26 = vld [vmem:[%s2122_s1 + $0x124] ss:$100 sps:$4 sm:$0xff]  }
  0x1d   :  { %763 = vmatprep.subr.bf16.mxu1 %v1588_v31  ;;  %v1663_v21 = vld [vmem:[%s2122_s1 + $0x54] ss:$100 sps:$4 sm:$0xff]   ;;  %v1666_v22 = vld [vmem:[%s2122_s1 + $0x5c] ss:$100 sps:$4 sm:$0xff]   ;;  %v1675_v29 = vld [vmem:[%s2122_s1 + $0x1e4] ss:$100 sps:$4 sm:$0xff]  }
  0x1e   :  { %v1664_v24 = vld [vmem:[%s2122_s1 + $0x58] ss:$100 sps:$4 sm:$0xff]   ;;  %v1670_v28 = vld [vmem:[%s2122_s1 + $0x120] ss:$100 sps:$4 sm:$0xff]   ;;  %v1678_v30 = vld [vmem:[%s2122_s1 + $0x1ec] ss:$100 sps:$4 sm:$0xff]  }
  0x1f   :  { %723 = vmatpush1.bf16.msra.mxu0 %v1583_v32  ;;  %v1669_v25 = vld [vmem:[%s2122_s1 + $0x11c] ss:$100 sps:$4 sm:$0xff]   ;;  %v1676_v32 = vld [vmem:[%s2122_s1 + $0x1e8] ss:$100 sps:$4 sm:$0xff]  }
  0x20   :  { %764 = vmatpush1.bf16.msra.mxu1 %v1586_v33  ;;  %798 = vmatprep.subr.bf16.mxu0 %v1591_v34  ;;  %v1667_v27 = vld [vmem:[%s2122_s1 + $0x118] ss:$100 sps:$4 sm:$0xff]   ;;  %v1673_v31 = vld [vmem:[%s2122_s1 + $0x1e0] ss:$100 sps:$4 sm:$0xff]   ;;  %v1681_v33 = vld [vmem:[%s2122_s1 + $0x2ac] ss:$100 sps:$4 sm:$0xff]  }
  0x21   :  { %839 = vmatprep.subr.bf16.mxu1 %v1594_v35  ;;  %v1679_v34 = vld [vmem:[%s2122_s1 + $0x2a8] ss:$100 sps:$4 sm:$0xff]   ;;  %v1682_v35 = vld [vmem:[%s2122_s1 + $0x2b0] ss:$100 sps:$4 sm:$0xff]  }
  0x22   :  { %1495 = vmatmul.mubr.msk.bf16.vlgmr.msra.gmra.mrb[4].mxu0 %vm630_vm0, %v1773_v19 }
  0x23   :  { %1496 = vmatmul.mubr.msk.bf16.vlgmr.msra.gmra.mrb[4].mxu1 %vm630_vm0, %v1773_v19  ;;  %799 = vmatpush1.bf16.msra.mxu0 %v1589_v36  ;;  %v1685_v36 = vld [vmem:[%s2122_s1 + $0x60] ss:$100 sps:$4 sm:$0xff]  }
  0x24   :  { %840 = vmatpush1.bf16.msra.mxu1 %v1592_v37  ;;  %800 = vmatprep.subr.bf16.mxu0 %v1597_v38  ;;  %v1690_v37 = vmov 0.0   ;;  %v1686_v38 = vld [vmem:[%s2122_s1 + $0x128] ss:$100 sps:$4 sm:$0xff]  }
  0x25   :  { %841 = vmatprep.subr.bf16.mxu1 %v1600_v39  ;;  %830 = vmatprep.mubr.bf16.mxu0 %v1689_v1  ;;  %v1687_v39 = vld [vmem:[%s2122_s1 + $0x1f0] ss:$100 sps:$4 sm:$0xff]  }
  0x26   :  { %871 = vmatprep.mubr.bf16.mxu1 %v1689_v1 }
  0x27   :  { %801 = vmatpush1.bf16.msra.mxu0 %v1595_v40  ;;  %v1688_v40 = vld [vmem:[%s2122_s1 + $0x2b8] ss:$100 sps:$4 sm:$0xff]  }
  0x28   :  { %842 = vmatpush1.bf16.msra.mxu1 %v1598_v41  ;;  %802 = vmatprep.subr.bf16.mxu0 %v1603_v42  ;;  %v1692_v42 = vmov 1983009808  }
  0x29   :  { %843 = vmatprep.subr.bf16.mxu1 %v1606_v43  ;;  %v1269_v43 = vunpack.c.l.s4 %v1692_v42 }
  0x2b   :  { %803 = vmatpush1.bf16.msra.mxu0 %v1601_v44  ;;  %v1271_v44 = vlaneseq }
  0x2c   :  { %844 = vmatpush1.bf16.msra.mxu1 %v1604_v45  ;;  %804 = vmatprep.subr.bf16.mxu0 %v1609_v46 }
  0x2d   :  { %845 = vmatprep.subr.bf16.mxu1 %v1612_v47 }
  0x2f   :  { %805 = vmatpush1.bf16.msra.mxu0 %v1607_v48 }
  0x30   :  { %846 = vmatpush1.bf16.msra.mxu1 %v1610_v49  ;;  %880 = vmatprep.subr.bf16.mxu0 %v1615_v50 }
  0x31   :  { %921 = vmatprep.subr.bf16.mxu1 %v1618_v51 }
  0x32   :  { %1497 = vmatmul.mubr.msk.bf16.vlgmr.msra.gmra.mrb[8].mxu0 %vm630_vm0, %v1773_v19 }
  0x33   :  { %1498 = vmatmul.mubr.msk.bf16.vlgmr.msra.gmra.mrb[8].mxu1 %vm630_vm0, %v1773_v19  ;;  %881 = vmatpush1.bf16.msra.mxu0 %v1613_v52  ;;  %v1270_v52 = vunpack.c.0.s8 %v1269_v43 }
  0x34   :  { %922 = vmatpush1.bf16.msra.mxu1 %v1616_v53  ;;  %882 = vmatprep.subr.bf16.mxu0 %v1621_v54  ;;  %v1272_v53 = vshrl.u32 %v1271_v44, 7 }
  0x35   :  { %923 = vmatprep.subr.bf16.mxu1 %v1624_v55  ;;  %912 = vmatprep.mubr.bf16.mxu0 %v1689_v1 }
  0x36   :  { %953 = vmatprep.mubr.bf16.mxu1 %v1689_v1 }
  0x37   :  { %883 = vmatpush1.bf16.msra.mxu0 %v1619_v56 }
  0x38   :  { %924 = vmatpush1.bf16.msra.mxu1 %v1622_v57  ;;  %884 = vmatprep.subr.bf16.mxu0 %v1627_v58 }
  0x39   :  { %925 = vmatprep.subr.bf16.mxu1 %v1630_v59 }
  0x3b   :  { %885 = vmatpush1.bf16.msra.mxu0 %v1625_v60 }
  0x3c   :  { %926 = vmatpush1.bf16.msra.mxu1 %v1628_v61  ;;  %886 = vmatprep.subr.bf16.mxu0 %v1633_v62 }
  0x3d   :  { %927 = vmatprep.subr.bf16.mxu1 %v1636_v63 }
  0x3f   :  { %887 = vmatpush1.bf16.msra.mxu0 %v1631_v0 }
  0x40   :  { %928 = vmatpush1.bf16.msra.mxu1 %v1634_v2  ;;  %962 = vmatprep.subr.bf16.mxu0 %v1639_v3  ;;  %v2066_v2 = vsub.s32 %v1270_v52, %v1272_v53 }
  0x41   :  { %1003 = vmatprep.subr.bf16.mxu1 %v1642_v4 }
  0x42   :  { %1499 = vmatmul.mubr.msk.bf16.vlgmr.msra.gmra.mrb[12].mxu0 %vm630_vm0, %v1773_v19 }
  0x43   :  { %1500 = vmatmul.mubr.msk.bf16.vlgmr.msra.gmra.mrb[12].mxu1 %vm630_vm0, %v1773_v19  ;;  %963 = vmatpush1.bf16.msra.mxu0 %v1637_v5 }
  0x44   :  { %1004 = vmatpush1.bf16.msra.mxu1 %v1640_v6  ;;  %964 = vmatprep.subr.bf16.mxu0 %v1645_v7 }
  0x45   :  { %1005 = vmatprep.subr.bf16.mxu1 %v1648_v8  ;;  %994 = vmatprep.mubr.bf16.mxu0 %v1689_v1 }
  0x46   :  { %1035 = vmatprep.mubr.bf16.mxu1 %v1689_v1 }
  0x47   :  { %965 = vmatpush1.bf16.msra.mxu0 %v1643_v10 }
  0x48   :  { %1006 = vmatpush1.bf16.msra.mxu1 %v1646_v11  ;;  %966 = vmatprep.subr.bf16.mxu0 %v1651_v12 }
  0x49   :  { %1007 = vmatprep.subr.bf16.mxu1 %v1654_v13 }
  0x4b   :  { %967 = vmatpush1.bf16.msra.mxu0 %v1649_v14 }
  0x4c   :  { %1008 = vmatpush1.bf16.msra.mxu1 %v1652_v15  ;;  %968 = vmatprep.subr.bf16.mxu0 %v1657_v16 }
  0x4d   :  { %1009 = vmatprep.subr.bf16.mxu1 %v1660_v17 }
  0x4f   :  { %969 = vmatpush1.bf16.msra.mxu0 %v1655_v18 }
  0x50   :  { %1010 = vmatpush1.bf16.msra.mxu1 %v1658_v20  ;;  %1044 = vmatprep.subr.bf16.mxu0 %v1663_v21 }
  0x51   :  { %1085 = vmatprep.subr.bf16.mxu1 %v1666_v22 }
  0x52   :  { %1501 = vmatmul.mubr.msk.bf16.vlgmr.msra.gmra.mrb[16].mxu0 %vm630_vm0, %v1773_v19 }
  0x53   :  { %1502 = vmatmul.mubr.msk.bf16.vlgmr.msra.gmra.mrb[16].mxu1 %vm630_vm0, %v1773_v19  ;;  %1045 = vmatpush1.bf16.msra.mxu0 %v1661_v23 }
  0x54   :  { %1086 = vmatpush1.bf16.msra.mxu1 %v1664_v24  ;;  %1046 = vmatprep.subr.bf16.mxu0 %v1669_v25 }
  0x55   :  { %1087 = vmatprep.subr.bf16.mxu1 %v1672_v26  ;;  %1076 = vmatprep.mubr.bf16.mxu0 %v1689_v1 }
  0x56   :  { %1117 = vmatprep.mubr.bf16.mxu1 %v1689_v1  ;;  %v1684_v1 = vld [vmem:[%s2122_s1 + $0x2b4] ss:$100 sps:$4 sm:$0xff]  }
  0x57   :  { %1047 = vmatpush1.bf16.msra.mxu0 %v1667_v27 }
  0x58   :  { %1088 = vmatpush1.bf16.msra.mxu1 %v1670_v28  ;;  %1048 = vmatprep.subr.bf16.mxu0 %v1675_v29 }
  0x59   :  { %1089 = vmatprep.subr.bf16.mxu1 %v1678_v30 }
  0x5b   :  { %1049 = vmatpush1.bf16.msra.mxu0 %v1673_v31 }
  0x5c   :  { %1090 = vmatpush1.bf16.msra.mxu1 %v1676_v32  ;;  %1050 = vmatprep.subr.bf16.mxu0 %v1681_v33 }
  0x5d   :  { %1091 = vmatprep.subr.bf16.mxu1 %v1684_v1 }
  0x5f   :  { %1051 = vmatpush1.bf16.msra.mxu0 %v1679_v34 }
  0x60   :  { %1092 = vmatpush1.bf16.msra.mxu1 %v1682_v35  ;;  %1524 = vmatprep.subr.bf16.mxu0 %v1690_v37 }
  0x62   :  { %1503 = vmatmul.mubr.msk.bf16.vlgmr.msra.gmra.mrb[20].mxu0 %vm630_vm0, %v1773_v19 }
  0x63   :  { %1504 = vmatmul.mubr.msk.bf16.vlgmr.msra.gmra.mrb[20].mxu1 %vm630_vm0, %v1773_v19  ;;  %1525 = vmatpush3.bf16.msra.mxu0 %v1685_v36 }
  0x64   :  { %1532 = vmatprep.mubr.msk.bf16.mxu0 %vm1691_vm1, %v1690_v37  ;;  %1526 = vmatprep.subr.bf16.mxu0 %v1690_v37 }
  0x67   :  { %1527 = vmatpush3.bf16.msra.mxu0 %v1686_v38 }
  0x68   :  { %1528 = vmatprep.subr.bf16.mxu0 %v1690_v37 }
  0x6b   :  { %1529 = vmatpush3.bf16.msra.mxu0 %v1687_v39 }
  0x6c   :  { %1530 = vmatprep.subr.bf16.mxu0 %v1690_v37 }
  0x6f   :  { %1531 = vmatpush3.bf16.msra.mxu0 %v1688_v40 }
  0x72   :  { %1533 = vmatmul.mubr.msk.bf16.vlgmr.msra.gmra.mrb[24].mxu0 %vm630_vm0, %v1773_v19 }
  0x98   :  { %v2060_v41 = vpop.permute.xlu0 %123 }
  0xe5   :  { %v668_v45 = vpop.f32.mrb[0].mxu0 }
  0xe6   :  { %v709_v46 = vpop.f32.mrb[0].mxu1  ;;  %v669_v47 = vadd.f32 %v668_v45, %v2060_v41  ;;  %v670_v49 = vpop.f32.mrb[1].mxu0 }
  0xe7   :  { %v710_v48 = vadd.f32 %v709_v46, %v2060_v41  ;;  %v711_v50 = vpop.f32.mrb[1].mxu1  ;;  %v671_v51 = vadd.f32 %v670_v49, %v2060_v41  ;;  %v672_v19 = vpop.f32.mrb[2].mxu0 }
  0xe8   :  { %v712_v54 = vadd.f32 %v711_v50, %v2060_v41  ;;  %v713_v55 = vpop.f32.mrb[2].mxu1  ;;  %v1166_v56 = vmul.f32 0.2, %v669_v47  ;;  %v673_v58 = vpop.f32.mrb[3].mxu0 }
  0xe9   :  { %v1168_v57 = vmul.f32 0.2, %v710_v48  ;;  %v714_v59 = vpop.f32.mrb[3].mxu1  ;;  %v1167_v60 = vmul.f32 0.2, %v671_v51 }
  0xea   :  { %v1169_v61 = vmul.f32 0.2, %v712_v54  ;;  %v1191_v62 = vmax.f32 %v669_v47, %v1166_v56 }
  0xeb   :  { %v1193_v63 = vmax.f32 %v710_v48, %v1168_v57  ;;  %v1192_v0 = vmax.f32 %v671_v51, %v1167_v60 }
  0xec   :  { %v1194_v3 = vmax.f32 %v712_v54, %v1169_v61 }
  0xed   :  { %v1506_v4 = vpack.c.bf16 %v1192_v0, %v1191_v62 }
  0xee   :  { %v1507_v5 = vpack.c.bf16 %v1194_v3, %v1193_v63 }
  0xef   :  { %v1274_v6 = vrot.slane %v1506_v4, %v2066_v2 }
  0xf0   :  { %v1281_v7 = vrot.slane %v1507_v5, %v2066_v2 }
  0xf2   :  { %v1282_v8 = vcombine.low %v1274_v6, %v1281_v7 }
  0xf4   :  { %1382 = vst [vmem:[%s2125_s3] sm:$0xff] %v1282_v8 }
  0xf5   :  { %v750_v9 = vpop.f32.mrb[4].mxu0 }
  0xf6   :  { %v791_v10 = vpop.f32.mrb[4].mxu1  ;;  %v751_v11 = vadd.f32 %v750_v9, %v2060_v41  ;;  %v752_v13 = vpop.f32.mrb[5].mxu0 }
  0xf7   :  { %v792_v12 = vadd.f32 %v791_v10, %v2060_v41  ;;  %v793_v14 = vpop.f32.mrb[5].mxu1  ;;  %v753_v15 = vadd.f32 %v752_v13, %v2060_v41  ;;  %v754_v17 = vpop.f32.mrb[6].mxu0 }
  0xf8   :  { %v794_v16 = vadd.f32 %v793_v14, %v2060_v41  ;;  %v795_v18 = vpop.f32.mrb[6].mxu1  ;;  %v1170_v20 = vmul.f32 0.2, %v751_v11  ;;  %v755_v22 = vpop.f32.mrb[7].mxu0 }
  0xf9   :  { %v1172_v21 = vmul.f32 0.2, %v792_v12  ;;  %v796_v23 = vpop.f32.mrb[7].mxu1  ;;  %v1171_v24 = vmul.f32 0.2, %v753_v15 }
  0xfa   :  { %v1173_v25 = vmul.f32 0.2, %v794_v16  ;;  %v1195_v26 = vmax.f32 %v751_v11, %v1170_v20 }
  0xfb   :  { %v1197_v27 = vmax.f32 %v792_v12, %v1172_v21  ;;  %v1196_v28 = vmax.f32 %v753_v15, %v1171_v24 }
  0xfc   :  { %v1198_v29 = vmax.f32 %v794_v16, %v1173_v25 }
  0xfd   :  { %v1508_v30 = vpack.c.bf16 %v1196_v28, %v1195_v26 }
  0xfe   :  { %v1509_v31 = vpack.c.bf16 %v1198_v29, %v1197_v27 }
  0xff   :  { %v1291_v32 = vrot.slane %v1508_v30, %v2066_v2 }
 0x100   :  { %v1298_v33 = vrot.slane %v1509_v31, %v2066_v2 }
 0x102   :  { %v1299_v1 = vcombine.low %v1291_v32, %v1298_v33 }
 0x104   :  { %1383 = vst [vmem:[%s2125_s3 + $0x8] sm:$0xff] %v1299_v1 }
 0x105   :  { %v832_v34 = vpop.f32.mrb[8].mxu0 }
 0x106   :  { %v873_v35 = vpop.f32.mrb[8].mxu1  ;;  %v833_v36 = vadd.f32 %v832_v34, %v2060_v41  ;;  %v834_v38 = vpop.f32.mrb[9].mxu0 }
 0x107   :  { %v874_v37 = vadd.f32 %v873_v35, %v2060_v41  ;;  %v875_v39 = vpop.f32.mrb[9].mxu1  ;;  %v835_v40 = vadd.f32 %v834_v38, %v2060_v41  ;;  %v836_v43 = vpop.f32.mrb[10].mxu0 }
 0x108   :  { %v876_v42 = vadd.f32 %v875_v39, %v2060_v41  ;;  %v877_v44 = vpop.f32.mrb[10].mxu1  ;;  %v1174_v45 = vmul.f32 0.2, %v833_v36  ;;  %v837_v47 = vpop.f32.mrb[11].mxu0 }
 0x109   :  { %v1176_v46 = vmul.f32 0.2, %v874_v37  ;;  %v878_v48 = vpop.f32.mrb[11].mxu1  ;;  %v1175_v49 = vmul.f32 0.2, %v835_v40 }
 0x10a   :  { %v1177_v50 = vmul.f32 0.2, %v876_v42  ;;  %v1199_v51 = vmax.f32 %v833_v36, %v1174_v45 }
 0x10b   :  { %v1201_v52 = vmax.f32 %v874_v37, %v1176_v46  ;;  %v1200_v53 = vmax.f32 %v835_v40, %v1175_v49 }
 0x10c   :  { %v1202_v54 = vmax.f32 %v876_v42, %v1177_v50 }
 0x10d   :  { %v1510_v19 = vpack.c.bf16 %v1200_v53, %v1199_v51 }
 0x10e   :  { %v1511_v55 = vpack.c.bf16 %v1202_v54, %v1201_v52 }
 0x10f   :  { %v1308_v56 = vrot.slane %v1510_v19, %v2066_v2 }
 0x110   :  { %v1315_v57 = vrot.slane %v1511_v55, %v2066_v2 }
 0x112   :  { %v1316_v58 = vcombine.low %v1308_v56, %v1315_v57 }
 0x114   :  { %1384 = vst [vmem:[%s2125_s3 + $0x10] sm:$0xff] %v1316_v58 }
 0x115   :  { %v914_v59 = vpop.f32.mrb[12].mxu0 }
 0x116   :  { %v955_v60 = vpop.f32.mrb[12].mxu1  ;;  %v915_v61 = vadd.f32 %v914_v59, %v2060_v41  ;;  %v916_v63 = vpop.f32.mrb[13].mxu0 }
 0x117   :  { %v956_v62 = vadd.f32 %v955_v60, %v2060_v41  ;;  %v957_v0 = vpop.f32.mrb[13].mxu1  ;;  %v917_v3 = vadd.f32 %v916_v63, %v2060_v41  ;;  %v918_v5 = vpop.f32.mrb[14].mxu0 }
 0x118   :  { %v958_v4 = vadd.f32 %v957_v0, %v2060_v41  ;;  %v959_v6 = vpop.f32.mrb[14].mxu1  ;;  %v1178_v7 = vmul.f32 0.2, %v915_v61  ;;  %v919_v9 = vpop.f32.mrb[15].mxu0 }
 0x119   :  { %v1180_v8 = vmul.f32 0.2, %v956_v62  ;;  %v960_v10 = vpop.f32.mrb[15].mxu1  ;;  %v1179_v11 = vmul.f32 0.2, %v917_v3 }
 0x11a   :  { %v1181_v12 = vmul.f32 0.2, %v958_v4  ;;  %v1203_v13 = vmax.f32 %v915_v61, %v1178_v7 }
 0x11b   :  { %v1205_v14 = vmax.f32 %v956_v62, %v1180_v8  ;;  %v1204_v15 = vmax.f32 %v917_v3, %v1179_v11 }
 0x11c   :  { %v1206_v16 = vmax.f32 %v958_v4, %v1181_v12 }
 0x11d   :  { %v1512_v17 = vpack.c.bf16 %v1204_v15, %v1203_v13 }
 0x11e   :  { %v1513_v18 = vpack.c.bf16 %v1206_v16, %v1205_v14 }
 0x11f   :  { %v1325_v20 = vrot.slane %v1512_v17, %v2066_v2 }
 0x120   :  { %v1332_v21 = vrot.slane %v1513_v18, %v2066_v2 }
 0x122   :  { %v1333_v22 = vcombine.low %v1325_v20, %v1332_v21 }
 0x124   :  { %1385 = vst [vmem:[%s2125_s3 + $0x18] sm:$0xff] %v1333_v22 }
 0x125   :  { %v996_v23 = vpop.f32.mrb[16].mxu0 }
 0x126   :  { %v1037_v24 = vpop.f32.mrb[16].mxu1  ;;  %v997_v25 = vadd.f32 %v996_v23, %v2060_v41  ;;  %v998_v27 = vpop.f32.mrb[17].mxu0 }
 0x127   :  { %v1038_v26 = vadd.f32 %v1037_v24, %v2060_v41  ;;  %v1039_v28 = vpop.f32.mrb[17].mxu1  ;;  %v999_v29 = vadd.f32 %v998_v27, %v2060_v41  ;;  %v1000_v31 = vpop.f32.mrb[18].mxu0 }
 0x128   :  { %v1040_v30 = vadd.f32 %v1039_v28, %v2060_v41  ;;  %v1041_v32 = vpop.f32.mrb[18].mxu1  ;;  %v1182_v33 = vmul.f32 0.2, %v997_v25  ;;  %v1001_v34 = vpop.f32.mrb[19].mxu0 }
 0x129   :  { %v1184_v1 = vmul.f32 0.2, %v1038_v26  ;;  %v1042_v35 = vpop.f32.mrb[19].mxu1  ;;  %v1183_v36 = vmul.f32 0.2, %v999_v29 }
 0x12a   :  { %v1185_v37 = vmul.f32 0.2, %v1040_v30  ;;  %v1207_v38 = vmax.f32 %v997_v25, %v1182_v33 }
 0x12b   :  { %v1209_v39 = vmax.f32 %v1038_v26, %v1184_v1  ;;  %v1208_v40 = vmax.f32 %v999_v29, %v1183_v36 }
 0x12c   :  { %v1210_v42 = vmax.f32 %v1040_v30, %v1185_v37 }
 0x12d   :  { %v1514_v43 = vpack.c.bf16 %v1208_v40, %v1207_v38 }
 0x12e   :  { %v1515_v44 = vpack.c.bf16 %v1210_v42, %v1209_v39 }
 0x12f   :  { %v1342_v45 = vrot.slane %v1514_v43, %v2066_v2 }
 0x130   :  { %v1349_v46 = vrot.slane %v1515_v44, %v2066_v2 }
 0x132   :  { %v1350_v47 = vcombine.low %v1342_v45, %v1349_v46 }
 0x134   :  { %1386 = vst [vmem:[%s2125_s3 + $0x20] sm:$0xff] %v1350_v47 }
 0x135   :  { %v1078_v48 = vpop.f32.mrb[20].mxu0 }
 0x136   :  { %v1119_v49 = vpop.f32.mrb[20].mxu1  ;;  %v1079_v50 = vadd.f32 %v1078_v48, %v2060_v41  ;;  %v1080_v52 = vpop.f32.mrb[21].mxu0 }
 0x137   :  { %v1120_v51 = vadd.f32 %v1119_v49, %v2060_v41  ;;  %v1121_v53 = vpop.f32.mrb[21].mxu1  ;;  %v1081_v54 = vadd.f32 %v1080_v52, %v2060_v41  ;;  %v1082_v55 = vpop.f32.mrb[22].mxu0 }
 0x138   :  { %v1122_v19 = vadd.f32 %v1121_v53, %v2060_v41  ;;  %v1123_v56 = vpop.f32.mrb[22].mxu1  ;;  %v1186_v57 = vmul.f32 0.2, %v1079_v50  ;;  %v1083_v59 = vpop.f32.mrb[23].mxu0 }
 0x139   :  { %v1188_v58 = vmul.f32 0.2, %v1120_v51  ;;  %v1124_v60 = vpop.f32.mrb[23].mxu1  ;;  %v1187_v61 = vmul.f32 0.2, %v1081_v54 }
 0x13a   :  { %v1189_v62 = vmul.f32 0.2, %v1122_v19  ;;  %v1211_v63 = vmax.f32 %v1079_v50, %v1186_v57 }
 0x13b   :  { %v1213_v0 = vmax.f32 %v1120_v51, %v1188_v58  ;;  %v1212_v3 = vmax.f32 %v1081_v54, %v1187_v61 }
 0x13c   :  { %v1214_v4 = vmax.f32 %v1122_v19, %v1189_v62 }
 0x13d   :  { %v1516_v5 = vpack.c.bf16 %v1212_v3, %v1211_v63 }
 0x13e   :  { %v1517_v6 = vpack.c.bf16 %v1214_v4, %v1213_v0 }
 0x13f   :  { %v1359_v7 = vrot.slane %v1516_v5, %v2066_v2 }
 0x140   :  { %v1366_v8 = vrot.slane %v1517_v6, %v2066_v2 }
 0x142   :  { %v1367_v9 = vcombine.low %v1359_v7, %v1366_v8 }
 0x144   :  { %1387 = vst [vmem:[%s2125_s3 + $0x28] sm:$0xff] %v1367_v9 }
 0x145   :  { %v1160_v10 = vpop.f32.mrb[24].mxu0 }
 0x146   :  { %v1161_v11 = vadd.f32 %v1160_v10, %v2060_v41  ;;  %v1534_v12 = vpop.f32.mrb[25].mxu0 }
 0x147   :  { %v1163_v13 = vpop.f32.mrb[26].mxu0 }
 0x148   :  { %v1190_v14 = vmul.f32 0.2, %v1161_v11  ;;  %v1535_v15 = vpop.f32.mrb[27].mxu0 }
 0x14a   :  { %v1215_v16 = vmax.f32 %v1161_v11, %v1190_v14 }
 0x14c   :  { %v1240_v17 = vpack.c.bf16 %v1215_v16, %v1215_v16 }
 0x14e   :  { %1518 = vst.sshfl [vmem:[%s2125_s3 + $0x30] sm:$0x3 pattern:$0x76325410] %v1240_v17 }

// kernel: generator_forward.11
= control target key start
LH: loop header
LB: loop body
LE: loop exit
PB: predicated region body
PF: predicated region fallthrough
CT: control target
= control target key end

     0   :  { %v518_v1 = vmov 0   ;;  %vm198_vm0 = vcmask 523264   ;;  %v519_v21 = vmov 0.0   ;;  %vm520_vm1 = vmmov 0   ;;  %s647_s1 = inlined_call_operand.vmem [shape: bf16[64,800], index: 1, kind: input, shape index: {}]   ;;  %s648_s0 = inlined_call_operand.vmem [shape: bf16[8,64], index: 0, kind: input, shape index: {}]   ;;  %s649_s2 = inlined_call_operand.vmem [shape: f32[8,1], index: 2, kind: input, shape index: {}]   ;;  %s650_s3 = inlined_call_operand.vmem [shape: bf16[8,800], index: 3, kind: output, shape index: {}]  }
   0x1   :  { %v478_v0 = vld [vmem:[%s647_s1 + $0x4] ss:$28 sps:$4 sm:$0xff]   ;;  %234 = vmatprep.mubr.bf16.mxu0 %v518_v1  ;;  %275 = vmatprep.mubr.bf16.mxu1 %v518_v1  ;;  %v480_v2 = vld [vmem:[%s647_s1 + $0xc] ss:$28 sps:$4 sm:$0xff]   ;;  %v484_v5 = vld [vmem:[%s647_s1 + $0x3c] ss:$28 sps:$4 sm:$0xff]  }
   0x2   :  { %477 = vset.pattern.permute.xlu0 %v518_v1  ;;  %202 = vmatprep.subr.bf16.mxu0 %v478_v0  ;;  %v482_v3 = vld [vmem:[%s647_s1] ss:$28 sps:$4 sm:$0xff]   ;;  %v483_v4 = vld [vmem:[%s647_s1 + $0x8] ss:$28 sps:$4 sm:$0xff]   ;;  %v488_v7 = vld [vmem:[%s647_s1 + $0x38] ss:$28 sps:$4 sm:$0xff]  }
   0x3   :  { %243 = vmatprep.subr.bf16.mxu1 %v480_v2  ;;  %203 = vmatpush1.bf16.msra.mxu0 %v482_v3  ;;  %v486_v6 = vld [vmem:[%s647_s1 + $0x44] ss:$28 sps:$4 sm:$0xff]   ;;  %v490_v9 = vld [vmem:[%s647_s1 + $0x74] ss:$28 sps:$4 sm:$0xff]   ;;  %v492_v10 = vld [vmem:[%s647_s1 + $0x7c] ss:$28 sps:$4 sm:$0xff]  }
   0x4   :  { %244 = vmatpush1.bf16.msra.mxu1 %v483_v4  ;;  %204 = vmatprep.subr.bf16.mxu0 %v484_v5  ;;  %v489_v8 = vld [vmem:[%s647_s1 + $0x40] ss:$28 sps:$4 sm:$0xff]   ;;  %v494_v11 = vld [vmem:[%s647_s1 + $0x70] ss:$28 sps:$4 sm:$0xff]   ;;  %v495_v12 = vld [vmem:[%s647_s1 + $0x78] ss:$28 sps:$4 sm:$0xff]  }
   0x5   :  { %245 = vmatprep.subr.bf16.mxu1 %v486_v6  ;;  %v496_v13 = vld [vmem:[%s647_s1 + $0xac] ss:$28 sps:$4 sm:$0xff]   ;;  %v498_v14 = vld [vmem:[%s647_s1 + $0xb4] ss:$28 sps:$4 sm:$0xff]   ;;  %v15_v18 = vld [vmem:[%s648_s0] sm:$0xf] }
   0x6   :  { %v500_v15 = vld [vmem:[%s647_s1 + $0xa8] ss:$28 sps:$4 sm:$0xff]   ;;  %v501_v16 = vld [vmem:[%s647_s1 + $0xb0] ss:$28 sps:$4 sm:$0xff]   ;;  %v505_v20 = vld [vmem:[%s647_s1 + $0x18] ss:$28 sps:$4 sm:$0xff]  }
   0x7   :  { %205 = vmatpush1.bf16.msra.mxu0 %v488_v7  ;;  %v504_v17 = vld [vmem:[%s647_s1 + $0x14] ss:$28 sps:$4 sm:$0xff]   ;;  %v508_v22 = vld [vmem:[%s647_s1 + $0x4c] ss:$28 sps:$4 sm:$0xff]   ;;  %v48_v25 = vld [vmem:[%s649_s2] sm:$0xff]  ;;  %vm411_vm2 = vcmask 257024  }
   0x8   :  { %246 = vmatpush1.bf16.msra.mxu1 %v489_v8  ;;  %206 = vmatprep.subr.bf16.mxu0 %v490_v9  ;;  %v502_v19 = vld [vmem:[%s647_s1 + $0x10] ss:$28 sps:$4 sm:$0xff]   ;;  %v506_v23 = vld [vmem:[%s647_s1 + $0x48] ss:$28 sps:$4 sm:$0xff]   ;;  %v510_v27 = vld [vmem:[%s647_s1 + $0x80] ss:$28 sps:$4 sm:$0xff]  }
   0x9   :  { %247 = vmatprep.subr.bf16.mxu1 %v492_v10  ;;  %v509_v24 = vld [vmem:[%s647_s1 + $0x50] ss:$28 sps:$4 sm:$0xff]   ;;  %v512_v26 = vld [vmem:[%s647_s1 + $0x84] ss:$28 sps:$4 sm:$0xff]   ;;  %51 = vperm.xlu0 %477, %v48_v25   ;;  %v516_v29 = vld [vmem:[%s647_s1 + $0xbc] ss:$28 sps:$4 sm:$0xff]  }
   0xa   :  { %v513_v28 = vld [vmem:[%s647_s1 + $0x88] ss:$28 sps:$4 sm:$0xff]   ;;  %v514_v30 = vld [vmem:[%s647_s1 + $0xb8] ss:$28 sps:$4 sm:$0xff]   ;;  %v517_v31 = vld [vmem:[%s647_s1 + $0xc0] ss:$28 sps:$4 sm:$0xff]  }
   0xb   :  { %207 = vmatpush1.bf16.msra.mxu0 %v494_v11 }
   0xc   :  { %248 = vmatpush1.bf16.msra.mxu1 %v495_v12  ;;  %208 = vmatprep.subr.bf16.mxu0 %v496_v13 }
   0xd   :  { %249 = vmatprep.subr.bf16.mxu1 %v498_v14 }
   0xf   :  { %209 = vmatpush1.bf16.msra.mxu0 %v500_v15 }
  0x10   :  { %250 = vmatpush1.bf16.msra.mxu1 %v501_v16  ;;  %284 = vmatprep.subr.bf16.mxu0 %v504_v17 }
  0x11   :  { %462 = vmatprep.subr.bf16.mxu1 %v519_v21 }
  0x12   :  { %445 = vmatmul.mubr.msk.bf16.vlgmr.msra.gmra.mrb[0].mxu0 %vm198_vm0, %v15_v18 }
  0x13   :  { %446 = vmatmul.mubr.msk.bf16.vlgmr.msra.gmra.mrb[0].mxu1 %vm198_vm0, %v15_v18  ;;  %285 = vmatpush1.bf16.msra.mxu0 %v502_v19 }
  0x14   :  { %463 = vmatpush3.bf16.msra.mxu1 %v505_v20  ;;  %286 = vmatprep.subr.bf16.mxu0 %v508_v22 }
  0x15   :  { %464 = vmatprep.subr.bf16.mxu1 %v519_v21  ;;  %316 = vmatprep.mubr.bf16.mxu0 %v518_v1 }
  0x16   :  { %470 = vmatprep.mubr.msk.bf16.mxu1 %vm520_vm1, %v519_v21 }
  0x17   :  { %287 = vmatpush1.bf16.msra.mxu0 %v506_v23 }
  0x18   :  { %465 = vmatpush3.bf16.msra.mxu1 %v509_v24  ;;  %288 = vmatprep.subr.bf16.mxu0 %v512_v26 }
  0x19   :  { %466 = vmatprep.subr.bf16.mxu1 %v519_v21 }
  0x1b   :  { %289 = vmatpush1.bf16.msra.mxu0 %v510_v27 }
  0x1c   :  { %467 = vmatpush3.bf16.msra.mxu1 %v513_v28  ;;  %290 = vmatprep.subr.bf16.mxu0 %v516_v29 }
  0x1d   :  { %468 = vmatprep.subr.bf16.mxu1 %v519_v21 }
  0x1f   :  { %291 = vmatpush1.bf16.msra.mxu0 %v514_v30 }
  0x20   :  { %469 = vmatpush3.bf16.msra.mxu1 %v517_v31 }
  0x22   :  { %447 = vmatmul.mubr.msk.bf16.vlgmr.msra.gmra.mrb[4].mxu0 %vm198_vm0, %v15_v18 }
  0x23   :  { %471 = vmatmul.mubr.msk.bf16.vlgmr.msra.gmra.mrb[4].mxu1 %vm198_vm0, %v15_v18 }
  0x88   :  { %v52_v32 = vpop.permute.xlu0 %51 }
  0xe5   :  { %v236_v33 = vpop.f32.mrb[0].mxu0 }
  0xe6   :  { %v277_v34 = vpop.f32.mrb[0].mxu1  ;;  %v237_v35 = vadd.f32 %v236_v33, %v52_v32  ;;  %v238_v37 = vpop.f32.mrb[1].mxu0 }
  0xe7   :  { %v278_v36 = vadd.f32 %v277_v34, %v52_v32  ;;  %v279_v38 = vpop.f32.mrb[1].mxu1  ;;  %v239_v39 = vadd.f32 %v238_v37, %v52_v32  ;;  %v240_v41 = vpop.f32.mrb[2].mxu0 }
  0xe8   :  { %v280_v40 = vadd.f32 %v279_v38, %v52_v32  ;;  %v281_v42 = vpop.f32.mrb[2].mxu1  ;;  %v365_v43 = vmul.f32 0.2, %v237_v35  ;;  %v241_v45 = vpop.f32.mrb[3].mxu0 }
  0xe9   :  { %v367_v44 = vmul.f32 0.2, %v278_v36  ;;  %v282_v46 = vpop.f32.mrb[3].mxu1  ;;  %v366_v47 = vmul.f32 0.2, %v239_v39 }
  0xea   :  { %v368_v48 = vmul.f32 0.2, %v280_v40  ;;  %v372_v49 = vmax.f32 %v237_v35, %v365_v43 }
  0xeb   :  { %v374_v50 = vmax.f32 %v278_v36, %v367_v44  ;;  %v373_v51 = vmax.f32 %v239_v39, %v366_v47 }
  0xec   :  { %v375_v52 = vmax.f32 %v280_v40, %v368_v48 }
  0xed   :  { %v453_v53 = vpack.c.bf16 %v373_v51, %v372_v49 }
  0xee   :  { %v454_v54 = vpack.c.bf16 %v375_v52, %v374_v50 }
  0xef   :  { %408 = vst [vmem:[%s650_s3] sm:$0xff] %v453_v53 }
  0xf0   :  { %409 = vst [vmem:[%s650_s3 + $0x8] sm:$0xff] %v454_v54 }
  0xf5   :  { %v318_v55 = vpop.f32.mrb[4].mxu0 }
  0xf6   :  { %v359_v56 = vpop.f32.mrb[4].mxu1  ;;  %v319_v57 = vadd.f32 %v318_v55, %v52_v32  ;;  %v320_v59 = vpop.f32.mrb[5].mxu0 }
  0xf7   :  { %v360_v58 = vadd.f32 %v359_v56, %v52_v32  ;;  %v472_v60 = vpop.f32.mrb[5].mxu1  ;;  %v321_v61 = vadd.f32 %v320_v59, %v52_v32  ;;  %v322_v62 = vpop.f32.mrb[6].mxu0 }
  0xf8   :  { %v362_v63 = vpop.f32.mrb[6].mxu1  ;;  %v369_v0 = vmul.f32 0.2, %v319_v57  ;;  %v323_v2 = vpop.f32.mrb[7].mxu0 }
  0xf9   :  { %v371_v1 = vmul.f32 0.2, %v360_v58  ;;  %v473_v3 = vpop.f32.mrb[7].mxu1  ;;  %v370_v4 = vmul.f32 0.2, %v321_v61 }
  0xfa   :  { %v376_v5 = vmax.f32 %v319_v57, %v369_v0 }
  0xfb   :  { %v378_v6 = vmax.f32 %v360_v58, %v371_v1  ;;  %v377_v7 = vmax.f32 %v321_v61, %v370_v4 }
  0xfd   :  { %v456_v8 = vpack.c.bf16 %v378_v6, %v378_v6  ;;  %v455_v9 = vpack.c.bf16 %v377_v7, %v376_v5 }
  0xff   :  { %412 = vst.msk [vmem:[%s650_s3 + $0x18] sm:$0xf] %vm411_vm2, %v456_v8  ;;  %410 = vst [vmem:[%s650_s3 + $0x10] sm:$0xff] %v455_v9 }

// kernel: generator_forward.12
= control target key start
LH: loop header
LB: loop body
LE: loop exit
PB: predicated region body
PF: predicated region fallthrough
CT: control target
= control target key end

     0   :  { %v251_v1 = vmov 0   ;;  %vm194_vm0 = vcmask 1043456   ;;  %vm195_vm1 = vcmask 588804   ;;  %s335_s1 = inlined_call_operand.vmem [shape: bf16[128,200], index: 1, kind: input, shape index: {}]   ;;  %s336_s2 = inlined_call_operand.vmem [shape: f32[16,1], index: 2, kind: input, shape index: {}]   ;;  %s337_s0 = inlined_call_operand.vmem [shape: bf16[16,128], index: 0, kind: input, shape index: {}]   ;;  %s338_s3 = inlined_call_operand.vmem [shape: bf16[16,200], index: 3, kind: output, shape index: {}]  }
   0x1   :  { %v226_v0 = vld [vmem:[%s335_s1 + $0x4] ss:$8 sps:$4 sm:$0xff]   ;;  %163 = vmatprep.mubr.bf16.mxu0 %v251_v1  ;;  %225 = vset.pattern.permute.xlu0 %v251_v1  ;;  %v228_v2 = vld [vmem:[%s335_s1] ss:$8 sps:$4 sm:$0xff]   ;;  %v229_v3 = vld [vmem:[%s335_s1 + $0x14] ss:$8 sps:$4 sm:$0xff]  }
   0x2   :  { %131 = vmatprep.subr.bf16.mxu0 %v226_v0  ;;  %v231_v4 = vld [vmem:[%s335_s1 + $0x10] ss:$8 sps:$4 sm:$0xff]   ;;  %v232_v5 = vld [vmem:[%s335_s1 + $0x24] ss:$8 sps:$4 sm:$0xff]   ;;  %v234_v6 = vld [vmem:[%s335_s1 + $0x20] ss:$8 sps:$4 sm:$0xff]  }
   0x3   :  { %132 = vmatpush1.bf16.msra.mxu0 %v228_v2  ;;  %v235_v7 = vld [vmem:[%s335_s1 + $0x34] ss:$8 sps:$4 sm:$0xff]   ;;  %v237_v8 = vld [vmem:[%s335_s1 + $0x30] ss:$8 sps:$4 sm:$0xff]   ;;  %v33_v9 = vld [vmem:[%s336_s2] sm:$0xff] }
   0x4   :  { %133 = vmatprep.subr.bf16.mxu0 %v229_v3  ;;  %v238_v10 = vld [vmem:[%s335_s1 + $0x44] ss:$8 sps:$4 sm:$0xff]   ;;  %37 = vperm.xlu0 %225, %v33_v9   ;;  %v240_v12 = vld [vmem:[%s335_s1 + $0x40] ss:$8 sps:$4 sm:$0xff]   ;;  %v241_v13 = vld [vmem:[%s335_s1 + $0x54] ss:$8 sps:$4 sm:$0xff]  }
   0x5   :  { %v34_v11 = vld [vmem:[%s336_s2 + $0x8] sm:$0xff]  ;;  %v243_v14 = vld [vmem:[%s335_s1 + $0x50] ss:$8 sps:$4 sm:$0xff]   ;;  %v247_v17 = vld [vmem:[%s335_s1 + $0x74] ss:$8 sps:$4 sm:$0xff]  }
   0x6   :  { %v244_v15 = vld [vmem:[%s335_s1 + $0x64] ss:$8 sps:$4 sm:$0xff]   ;;  %v246_v16 = vld [vmem:[%s335_s1 + $0x60] ss:$8 sps:$4 sm:$0xff]   ;;  %v249_v18 = vld [vmem:[%s335_s1 + $0x70] ss:$8 sps:$4 sm:$0xff]  }
   0x7   :  { %134 = vmatpush1.bf16.msra.mxu0 %v231_v4  ;;  %v250_v19 = vld [vmem:[%s337_s0] sm:$0xff]   ;;  %vm196_vm2 = vmor %vm195_vm1, %vm194_vm0 }
   0x8   :  { %135 = vmatprep.subr.bf16.mxu0 %v232_v5  ;;  %42 = vperm.xlu0 %225, %v34_v11  }
   0xb   :  { %136 = vmatpush1.bf16.msra.mxu0 %v234_v6 }
   0xc   :  { %137 = vmatprep.subr.bf16.mxu0 %v235_v7 }
   0xf   :  { %138 = vmatpush1.bf16.msra.mxu0 %v237_v8 }
  0x10   :  { %139 = vmatprep.subr.bf16.mxu0 %v238_v10 }
  0x13   :  { %140 = vmatpush1.bf16.msra.mxu0 %v240_v12 }
  0x14   :  { %141 = vmatprep.subr.bf16.mxu0 %v241_v13 }
  0x17   :  { %142 = vmatpush1.bf16.msra.mxu0 %v243_v14 }
  0x18   :  { %143 = vmatprep.subr.bf16.mxu0 %v244_v15 }
  0x1b   :  { %144 = vmatpush1.bf16.msra.mxu0 %v246_v16 }
  0x1c   :  { %145 = vmatprep.subr.bf16.mxu0 %v247_v17 }
  0x1f   :  { %146 = vmatpush1.bf16.msra.mxu0 %v249_v18 }
  0x22   :  { %164 = vmatmul.mubr.bf16.vlgmr.msra.gmra.mrb[0].mxu0 %v250_v19 }
  0x83   :  { %v38_v20 = vpop.permute.xlu0 %37 }
  0x87   :  { %v43_v24 = vpop.permute.xlu0 %42 }
  0xf5   :  { %v165_v21 = vpop.f32.mrb[0].mxu0 }
  0xf6   :  { %v166_v22 = vadd.f32 %v165_v21, %v38_v20  ;;  %v167_v23 = vpop.f32.mrb[1].mxu0 }
  0xf7   :  { %v168_v25 = vadd.f32 %v167_v23, %v38_v20  ;;  %v169_v26 = vpop.f32.mrb[2].mxu0 }
  0xf8   :  { %v174_v27 = vmul.f32 0.2, %v166_v22  ;;  %v170_v28 = vadd.f32 %v169_v26, %v43_v24  ;;  %v171_v29 = vpop.f32.mrb[3].mxu0 }
  0xf9   :  { %v175_v30 = vmul.f32 0.2, %v168_v25  ;;  %v172_v31 = vadd.f32 %v171_v29, %v43_v24 }
  0xfa   :  { %v178_v32 = vmax.f32 %v166_v22, %v174_v27  ;;  %v176_v33 = vmul.f32 0.2, %v170_v28 }
  0xfb   :  { %v179_v34 = vmax.f32 %v168_v25, %v175_v30  ;;  %v177_v35 = vmul.f32 0.2, %v172_v31 }
  0xfc   :  { %v180_v36 = vmax.f32 %v170_v28, %v176_v33 }
  0xfd   :  { %v222_v37 = vpack.c.bf16 %v179_v34, %v178_v32  ;;  %v181_v38 = vmax.f32 %v172_v31, %v177_v35 }
  0xff   :  { %197 = vst.msk [vmem:[%s338_s3] sm:$0xff] %vm196_vm2, %v222_v37  ;;  %v223_v39 = vpack.c.bf16 %v181_v38, %v180_v36 }
 0x101   :  { %198 = vst.msk [vmem:[%s338_s3 + $0x8] sm:$0xff] %vm196_vm2, %v223_v39 }

// kernel: generator_forward.13
= control target key start
LH: loop header
LB: loop body
LE: loop exit
PB: predicated region body
PF: predicated region fallthrough
CT: control target
= control target key end

     0   :  { %v370_v1 = vmov 0   ;;  %vm264_vm0 = vcmask 404480   ;;  %s475_s1 = inlined_call_operand.vmem [shape: bf16[256,50], index: 1, kind: input, shape index: {}]   ;;  %s476_s0 = inlined_call_operand.vmem [shape: bf16[32,256], index: 0, kind: input, shape index: {}]   ;;  %s477_s2 = inlined_call_operand.vmem [shape: f32[32,1], index: 2, kind: input, shape index: {}]   ;;  %s478_s3 = inlined_call_operand.vmem [shape: bf16[32,50], index: 3, kind: output, shape index: {}]  }
   0x1   :  { %v348_v0 = vld [vmem:[%s475_s1 + $0x40] sm:$0xff]   ;;  %347 = vset.pattern.permute.xlu1 %v370_v1  ;;  %346 = vset.pattern.permute.xlu0 %v370_v1  ;;  %v350_v3 = vld [vmem:[%s475_s1 + $0x48] sm:$0xff]   ;;  %v352_v5 = vld [vmem:[%s475_s1 + $0x50] sm:$0xff]  }
   0x2   :  { %v349_v2 = vld [vmem:[%s475_s1] sm:$0xff]   ;;  %301 = vmatprep.subr.bf16.mxu0 %v348_v0  ;;  %329 = vmatprep.subr.bf16.mxu1 %v348_v0  ;;  %v351_v4 = vld [vmem:[%s475_s1 + $0x8] sm:$0xff]   ;;  %v353_v6 = vld [vmem:[%s475_s1 + $0x10] sm:$0xff]  }
   0x3   :  { %302 = vmatpush3.bf16.msra.mxu0 %v349_v2  ;;  %337 = vmatpush3.bf16.msra.mxu1 %v349_v2  ;;  %v354_v7 = vld [vmem:[%s475_s1 + $0x58] sm:$0xff]   ;;  %v356_v9 = vld [vmem:[%s475_s1 + $0x60] sm:$0xff]   ;;  %v358_v11 = vld [vmem:[%s475_s1 + $0x68] sm:$0xff]  }
   0x4   :  { %303 = vmatprep.subr.bf16.mxu0 %v350_v3  ;;  %330 = vmatprep.subr.bf16.mxu1 %v350_v3  ;;  %v355_v8 = vld [vmem:[%s475_s1 + $0x18] sm:$0xff]   ;;  %v357_v10 = vld [vmem:[%s475_s1 + $0x20] sm:$0xff]   ;;  %v359_v14 = vld [vmem:[%s475_s1 + $0x28] sm:$0xff]  }
   0x5   :  { %v366_v12 = vld [vmem:[%s476_s0 + $0x4] ss:$8 sps:$4 sm:$0xff]   ;;  %v369_v13 = vld [vmem:[%s476_s0 + $0x14] ss:$8 sps:$4 sm:$0xff]   ;;  %v364_v23 = vld [vmem:[%s476_s0] ss:$8 sps:$4 sm:$0xff]  }
   0x6   :  { %v53_v15 = vld [vmem:[%s477_s2 + $0x10] sm:$0xff]  ;;  %v51_v16 = vld [vmem:[%s477_s2] sm:$0xff]  ;;  %223 = vmatprep.mubr.bf16.mxu0 %v366_v12  ;;  %231 = vmatprep.mubr.bf16.mxu1 %v369_v13  ;;  %v54_v19 = vld [vmem:[%s477_s2 + $0x18] sm:$0xff] }
   0x7   :  { %304 = vmatpush3.bf16.msra.mxu0 %v351_v4  ;;  %338 = vmatpush3.bf16.msra.mxu1 %v351_v4  ;;  %v360_v17 = vld [vmem:[%s475_s1 + $0x70] sm:$0xff]   ;;  %v52_v20 = vld [vmem:[%s477_s2 + $0x8] sm:$0xff]  ;;  %v362_v21 = vld [vmem:[%s475_s1 + $0x78] sm:$0xff]  }
   0x8   :  { %305 = vmatprep.subr.bf16.mxu0 %v352_v5  ;;  %331 = vmatprep.subr.bf16.mxu1 %v352_v5  ;;  %v361_v18 = vld [vmem:[%s475_s1 + $0x30] sm:$0xff]   ;;  %v363_v22 = vld [vmem:[%s475_s1 + $0x38] sm:$0xff]  }
   0x9   :  { %67 = vperm.xlu1 %347, %v53_v15   ;;  %57 = vperm.xlu0 %346, %v51_v16   ;;  %v367_v24 = vld [vmem:[%s476_s0 + $0x10] ss:$8 sps:$4 sm:$0xff]  }
   0xb   :  { %306 = vmatpush3.bf16.msra.mxu0 %v353_v6  ;;  %339 = vmatpush3.bf16.msra.mxu1 %v353_v6 }
   0xc   :  { %307 = vmatprep.subr.bf16.mxu0 %v354_v7  ;;  %332 = vmatprep.subr.bf16.mxu1 %v354_v7 }
   0xd   :  { %72 = vperm.xlu1 %347, %v54_v19   ;;  %62 = vperm.xlu0 %346, %v52_v20  }
   0xf   :  { %308 = vmatpush3.bf16.msra.mxu0 %v355_v8  ;;  %340 = vmatpush3.bf16.msra.mxu1 %v355_v8 }
  0x10   :  { %309 = vmatprep.subr.bf16.mxu0 %v356_v9  ;;  %333 = vmatprep.subr.bf16.mxu1 %v356_v9 }
  0x13   :  { %310 = vmatpush3.bf16.msra.mxu0 %v357_v10  ;;  %341 = vmatpush3.bf16.msra.mxu1 %v357_v10 }
  0x14   :  { %311 = vmatprep.subr.bf16.mxu0 %v358_v11  ;;  %334 = vmatprep.subr.bf16.mxu1 %v358_v11 }
  0x17   :  { %312 = vmatpush3.bf16.msra.mxu0 %v359_v14  ;;  %342 = vmatpush3.bf16.msra.mxu1 %v359_v14 }
  0x18   :  { %313 = vmatprep.subr.bf16.mxu0 %v360_v17  ;;  %335 = vmatprep.subr.bf16.mxu1 %v360_v17 }
  0x1b   :  { %314 = vmatpush3.bf16.msra.mxu0 %v361_v18  ;;  %343 = vmatpush3.bf16.msra.mxu1 %v361_v18 }
  0x1c   :  { %315 = vmatprep.subr.bf16.mxu0 %v362_v21  ;;  %336 = vmatprep.subr.bf16.mxu1 %v362_v21 }
  0x1f   :  { %316 = vmatpush3.bf16.msra.mxu0 %v363_v22  ;;  %344 = vmatpush3.bf16.msra.mxu1 %v363_v22 }
  0x22   :  { %224 = vmatmul.mubr.bf16.vlgmr.msra.gmra.mrb[0].mxu0 %v364_v23  ;;  %232 = vmatmul.mubr.bf16.vlgmr.msra.gmra.mrb[0].mxu1 %v367_v24 }
  0x88   :  { %v68_v25 = vpop.permute.xlu1 %67  ;;  %v58_v26 = vpop.permute.xlu0 %57 }
  0x8c   :  { %v73_v41 = vpop.permute.xlu1 %72  ;;  %v63_v42 = vpop.permute.xlu0 %62 }
  0xf5   :  { %v317_v27 = vpop.f32.mrb[0].mxu0  ;;  %v323_v28 = vpop.f32.mrb[0].mxu1 }
  0xf6   :  { %v318_v29 = vpop.f32.mrb[1].mxu0  ;;  %v324_v30 = vpop.f32.mrb[1].mxu1 }
  0xf7   :  { %v319_v31 = vadd.f32 %v318_v29, %v317_v27  ;;  %v325_v32 = vadd.f32 %v324_v30, %v323_v28  ;;  %v320_v33 = vpop.f32.mrb[2].mxu0  ;;  %v326_v34 = vpop.f32.mrb[2].mxu1 }
  0xf8   :  { %v321_v35 = vpop.f32.mrb[3].mxu0  ;;  %v327_v36 = vpop.f32.mrb[3].mxu1 }
  0xf9   :  { %v226_v37 = vadd.f32 %v319_v31, %v58_v26  ;;  %v234_v38 = vadd.f32 %v325_v32, %v68_v25  ;;  %v322_v39 = vadd.f32 %v321_v35, %v320_v33  ;;  %v328_v40 = vadd.f32 %v327_v36, %v326_v34 }
  0xfb   :  { %v240_v43 = vmul.f32 0.2, %v226_v37  ;;  %v242_v44 = vmul.f32 0.2, %v234_v38  ;;  %v229_v45 = vadd.f32 %v322_v39, %v63_v42  ;;  %v237_v46 = vadd.f32 %v328_v40, %v73_v41 }
  0xfd   :  { %v244_v47 = vmax.f32 %v226_v37, %v240_v43  ;;  %v246_v48 = vmax.f32 %v234_v38, %v242_v44  ;;  %v241_v49 = vmul.f32 0.2, %v229_v45  ;;  %v243_v50 = vmul.f32 0.2, %v237_v46 }
  0xff   :  { %v297_v51 = vpack.c.bf16 %v244_v47, %v244_v47  ;;  %v299_v52 = vpack.c.bf16 %v246_v48, %v246_v48  ;;  %v245_v53 = vmax.f32 %v229_v45, %v241_v49  ;;  %v247_v54 = vmax.f32 %v237_v46, %v243_v50 }
 0x101   :  { %265 = vst.msk [vmem:[%s478_s3] sm:$0xf] %vm264_vm0, %v297_v51  ;;  %267 = vst.msk [vmem:[%s478_s3 + $0x8] sm:$0xf] %vm264_vm0, %v299_v52  ;;  %v298_v55 = vpack.c.bf16 %v245_v53, %v245_v53  ;;  %v300_v56 = vpack.c.bf16 %v247_v54, %v247_v54 }
 0x103   :  { %266 = vst.msk [vmem:[%s478_s3 + $0x4] sm:$0xf] %vm264_vm0, %v298_v55  ;;  %268 = vst.msk [vmem:[%s478_s3 + $0xc] sm:$0xf] %vm264_vm0, %v300_v56 }

// kernel: generator_forward.14
= control target key start
LH: loop header
LB: loop body
LE: loop exit
PB: predicated region body
PF: predicated region fallthrough
CT: control target
= control target key end

     0   :  { %v532_v1 = vmov 0   ;;  %vm401_vm0 = vcmask 60416   ;;  %s673_s1 = inlined_call_operand.vmem [shape: bf16[512,8], index: 1, kind: input, shape index: {}]   ;;  %s674_s0 = inlined_call_operand.vmem [shape: bf16[16,512], index: 0, kind: input, shape index: {}]   ;;  %s675_s2 = inlined_call_operand.vmem [shape: f32[16,1], index: 2, kind: input, shape index: {}]   ;;  %s676_s3 = inlined_call_operand.vmem [shape: bf16[16,8], index: 3, kind: output, shape index: {}]  }
   0x1   :  { %v494_v0 = vld [vmem:[%s673_s1 + $0x40] sm:$0xff]   ;;  %493 = vset.pattern.permute.xlu0 %v532_v1  ;;  %v498_v5 = vld [vmem:[%s673_s1 + $0x48] sm:$0xff]   ;;  %v502_v9 = vld [vmem:[%s673_s1 + $0x50] sm:$0xff]  }
   0x2   :  { %v495_v2 = vld [vmem:[%s673_s1 + $0xc0] sm:$0xff]   ;;  %448 = vmatprep.subr.bf16.mxu0 %v494_v0  ;;  %v499_v6 = vld [vmem:[%s673_s1 + $0xc8] sm:$0xff]   ;;  %v503_v10 = vld [vmem:[%s673_s1 + $0xd0] sm:$0xff]  }
   0x3   :  { %v496_v3 = vld [vmem:[%s673_s1] sm:$0xff]   ;;  %470 = vmatprep.subr.bf16.mxu1 %v495_v2  ;;  %v500_v7 = vld [vmem:[%s673_s1 + $0x8] sm:$0xff]   ;;  %v504_v11 = vld [vmem:[%s673_s1 + $0x10] sm:$0xff]  }
   0x4   :  { %v497_v4 = vld [vmem:[%s673_s1 + $0x80] sm:$0xff]   ;;  %449 = vmatpush3.bf16.msra.mxu0 %v496_v3  ;;  %v501_v8 = vld [vmem:[%s673_s1 + $0x88] sm:$0xff]   ;;  %v505_v12 = vld [vmem:[%s673_s1 + $0x90] sm:$0xff]  }
   0x5   :  { %471 = vmatpush3.bf16.msra.mxu1 %v497_v4  ;;  %450 = vmatprep.subr.bf16.mxu0 %v498_v5  ;;  %v506_v13 = vld [vmem:[%s673_s1 + $0x58] sm:$0xff]   ;;  %v510_v17 = vld [vmem:[%s673_s1 + $0x60] sm:$0xff]   ;;  %v514_v21 = vld [vmem:[%s673_s1 + $0x68] sm:$0xff]  }
   0x6   :  { %472 = vmatprep.subr.bf16.mxu1 %v499_v6  ;;  %v507_v14 = vld [vmem:[%s673_s1 + $0xd8] sm:$0xff]   ;;  %v511_v18 = vld [vmem:[%s673_s1 + $0xe0] sm:$0xff]   ;;  %v515_v22 = vld [vmem:[%s673_s1 + $0xe8] sm:$0xff]  }
   0x7   :  { %v508_v15 = vld [vmem:[%s673_s1 + $0x18] sm:$0xff]   ;;  %v512_v19 = vld [vmem:[%s673_s1 + $0x20] sm:$0xff]   ;;  %v516_v23 = vld [vmem:[%s673_s1 + $0x28] sm:$0xff]  }
   0x8   :  { %451 = vmatpush3.bf16.msra.mxu0 %v500_v7  ;;  %v509_v16 = vld [vmem:[%s673_s1 + $0x98] sm:$0xff]   ;;  %v513_v20 = vld [vmem:[%s673_s1 + $0xa0] sm:$0xff]   ;;  %v517_v24 = vld [vmem:[%s673_s1 + $0xa8] sm:$0xff]  }
   0x9   :  { %473 = vmatpush3.bf16.msra.mxu1 %v501_v8  ;;  %452 = vmatprep.subr.bf16.mxu0 %v502_v9  ;;  %v518_v25 = vld [vmem:[%s673_s1 + $0x70] sm:$0xff]   ;;  %v522_v29 = vld [vmem:[%s673_s1 + $0x78] sm:$0xff]   ;;  %v83_v37 = vld [vmem:[%s675_s2] sm:$0xff] }
   0xa   :  { %474 = vmatprep.subr.bf16.mxu1 %v503_v10  ;;  %v519_v26 = vld [vmem:[%s673_s1 + $0xf0] sm:$0xff]   ;;  %v523_v30 = vld [vmem:[%s673_s1 + $0xf8] sm:$0xff]   ;;  %87 = vperm.xlu0 %493, %v83_v37   ;;  %v84_v38 = vld [vmem:[%s675_s2 + $0x8] sm:$0xff] }
   0xb   :  { %v520_v27 = vld [vmem:[%s673_s1 + $0x30] sm:$0xff]   ;;  %v524_v31 = vld [vmem:[%s673_s1 + $0x38] sm:$0xff]  }
   0xc   :  { %453 = vmatpush3.bf16.msra.mxu0 %v504_v11  ;;  %v521_v28 = vld [vmem:[%s673_s1 + $0xb0] sm:$0xff]   ;;  %v525_v32 = vld [vmem:[%s673_s1 + $0xb8] sm:$0xff]  }
   0xd   :  { %475 = vmatpush3.bf16.msra.mxu1 %v505_v12  ;;  %454 = vmatprep.subr.bf16.mxu0 %v506_v13  ;;  %v526_v33 = vld [vmem:[%s674_s0] ss:$16 sps:$4 sm:$0xff]   ;;  %v528_v34 = vld [vmem:[%s674_s0 + $0x4] ss:$16 sps:$4 sm:$0xff]   ;;  %v529_v35 = vld [vmem:[%s674_s0 + $0x8] ss:$16 sps:$4 sm:$0xff]  }
   0xe   :  { %476 = vmatprep.subr.bf16.mxu1 %v507_v14  ;;  %v531_v36 = vld [vmem:[%s674_s0 + $0xc] ss:$16 sps:$4 sm:$0xff]   ;;  %339 = vmatprep.mubr.bf16.mxu0 %v528_v34 }
   0xf   :  { %380 = vmatprep.mubr.bf16.mxu1 %v531_v36  ;;  %92 = vperm.xlu0 %493, %v84_v38  }
  0x10   :  { %455 = vmatpush3.bf16.msra.mxu0 %v508_v15 }
  0x11   :  { %477 = vmatpush3.bf16.msra.mxu1 %v509_v16  ;;  %456 = vmatprep.subr.bf16.mxu0 %v510_v17 }
  0x12   :  { %478 = vmatprep.subr.bf16.mxu1 %v511_v18 }
  0x14   :  { %457 = vmatpush3.bf16.msra.mxu0 %v512_v19 }
  0x15   :  { %479 = vmatpush3.bf16.msra.mxu1 %v513_v20  ;;  %458 = vmatprep.subr.bf16.mxu0 %v514_v21 }
  0x16   :  { %480 = vmatprep.subr.bf16.mxu1 %v515_v22 }
  0x18   :  { %459 = vmatpush3.bf16.msra.mxu0 %v516_v23 }
  0x19   :  { %481 = vmatpush3.bf16.msra.mxu1 %v517_v24  ;;  %460 = vmatprep.subr.bf16.mxu0 %v518_v25 }
  0x1a   :  { %482 = vmatprep.subr.bf16.mxu1 %v519_v26 }
  0x1c   :  { %461 = vmatpush3.bf16.msra.mxu0 %v520_v27 }
  0x1d   :  { %483 = vmatpush3.bf16.msra.mxu1 %v521_v28  ;;  %462 = vmatprep.subr.bf16.mxu0 %v522_v29 }
  0x1e   :  { %484 = vmatprep.subr.bf16.mxu1 %v523_v30 }
  0x20   :  { %463 = vmatpush3.bf16.msra.mxu0 %v524_v31 }
  0x21   :  { %485 = vmatpush3.bf16.msra.mxu1 %v525_v32 }
  0x23   :  { %340 = vmatmul.mubr.bf16.vlgmr.msra.gmra.mrb[0].mxu0 %v526_v33 }
  0x24   :  { %381 = vmatmul.mubr.bf16.vlgmr.msra.gmra.mrb[0].mxu1 %v529_v35 }
  0x89   :  { %v88_v39 = vpop.permute.xlu0 %87 }
  0x8e   :  { %v93_v52 = vpop.permute.xlu0 %92 }
  0xf6   :  { %v464_v40 = vpop.f32.mrb[0].mxu0 }
  0xf7   :  { %v486_v41 = vpop.f32.mrb[0].mxu1  ;;  %v465_v42 = vpop.f32.mrb[1].mxu0 }
  0xf8   :  { %v466_v43 = vadd.f32 %v465_v42, %v464_v40  ;;  %v487_v44 = vpop.f32.mrb[1].mxu1  ;;  %v467_v45 = vpop.f32.mrb[2].mxu0 }
  0xf9   :  { %v488_v46 = vadd.f32 %v487_v44, %v486_v41  ;;  %v489_v47 = vpop.f32.mrb[2].mxu1  ;;  %v468_v48 = vpop.f32.mrb[3].mxu0 }
  0xfa   :  { %v342_v49 = vadd.f32 %v466_v43, %v88_v39  ;;  %v469_v50 = vadd.f32 %v468_v48, %v467_v45  ;;  %v490_v51 = vpop.f32.mrb[3].mxu1 }
  0xfb   :  { %v491_v53 = vadd.f32 %v490_v51, %v489_v47 }
  0xfc   :  { %v383_v54 = vadd.f32 %v488_v46, %v342_v49  ;;  %v345_v55 = vadd.f32 %v469_v50, %v93_v52 }
  0xfe   :  { %v389_v56 = vmul.f32 0.2, %v383_v54  ;;  %v386_v57 = vadd.f32 %v491_v53, %v345_v55 }
 0x100   :  { %v391_v58 = vmax.f32 %v383_v54, %v389_v56  ;;  %v390_v59 = vmul.f32 0.2, %v386_v57 }
 0x102   :  { %v446_v60 = vpack.c.bf16 %v391_v58, %v391_v58  ;;  %v392_v61 = vmax.f32 %v386_v57, %v390_v59 }
 0x104   :  { %402 = vst.msk [vmem:[%s676_s3] sm:$0xf] %vm401_vm0, %v446_v60  ;;  %v447_v62 = vpack.c.bf16 %v392_v61, %v392_v61 }
 0x106   :  { %403 = vst.msk [vmem:[%s676_s3 + $0x4] sm:$0xf] %vm401_vm0, %v447_v62 }

// kernel: generator_forward.15
= control target key start
LH: loop header
LB: loop body
LE: loop exit
PB: predicated region body
PF: predicated region fallthrough
CT: control target
= control target key end

     0   :  { %v266_v1 = vmov 0   ;;  %vm200_vm0 = vcmask 60416   ;;  %s344_s1 = inlined_call_operand.vmem [shape: bf16[256,8], index: 1, kind: input, shape index: {}]   ;;  %s345_s0 = inlined_call_operand.vmem [shape: bf16[8,256], index: 0, kind: input, shape index: {}]   ;;  %s346_s2 = inlined_call_operand.vmem [shape: f32[8,1], index: 2, kind: input, shape index: {}]   ;;  %s347_s3 = inlined_call_operand.vmem [shape: bf16[8,8], index: 3, kind: output, shape index: {}]  }
   0x1   :  { %v248_v0 = vld [vmem:[%s344_s1 + $0x40] sm:$0xff]   ;;  %247 = vset.pattern.permute.xlu0 %v266_v1  ;;  %v250_v3 = vld [vmem:[%s344_s1 + $0x48] sm:$0xff]   ;;  %v252_v5 = vld [vmem:[%s344_s1 + $0x50] sm:$0xff]  }
   0x2   :  { %v249_v2 = vld [vmem:[%s344_s1] sm:$0xff]   ;;  %224 = vmatprep.subr.bf16.mxu0 %v248_v0  ;;  %v251_v4 = vld [vmem:[%s344_s1 + $0x8] sm:$0xff]   ;;  %v253_v6 = vld [vmem:[%s344_s1 + $0x10] sm:$0xff]  }
   0x3   :  { %225 = vmatpush3.bf16.msra.mxu0 %v249_v2  ;;  %v254_v7 = vld [vmem:[%s344_s1 + $0x58] sm:$0xff]   ;;  %v256_v9 = vld [vmem:[%s344_s1 + $0x60] sm:$0xff]   ;;  %v258_v11 = vld [vmem:[%s344_s1 + $0x68] sm:$0xff]  }
   0x4   :  { %226 = vmatprep.subr.bf16.mxu0 %v250_v3  ;;  %v255_v8 = vld [vmem:[%s344_s1 + $0x18] sm:$0xff]   ;;  %v257_v10 = vld [vmem:[%s344_s1 + $0x20] sm:$0xff]   ;;  %v259_v15 = vld [vmem:[%s344_s1 + $0x28] sm:$0xff]  }
   0x5   :  { %v15_v12 = vld [vmem:[%s345_s0] sm:$0xff]  ;;  %v260_v16 = vld [vmem:[%s344_s1 + $0x70] sm:$0xff]   ;;  %v262_v18 = vld [vmem:[%s344_s1 + $0x78] sm:$0xff]  }
   0x6   :  { %v48_v13 = vld [vmem:[%s346_s2] sm:$0xff]  ;;  %v207_v14 = vcombine.high %v15_v12, %v15_v12  ;;  %v261_v17 = vld [vmem:[%s344_s1 + $0x30] sm:$0xff]   ;;  %v263_v19 = vld [vmem:[%s344_s1 + $0x38] sm:$0xff]   ;;  %v206_v20 = vcombine.low %v15_v12, %v15_v12 }
   0x7   :  { %227 = vmatpush3.bf16.msra.mxu0 %v251_v4  ;;  %51 = vperm.xlu0 %247, %v48_v13  }
   0x8   :  { %228 = vmatprep.subr.bf16.mxu0 %v252_v5  ;;  %189 = vmatprep.mubr.bf16.mxu0 %v207_v14 }
   0xb   :  { %229 = vmatpush3.bf16.msra.mxu0 %v253_v6 }
   0xc   :  { %230 = vmatprep.subr.bf16.mxu0 %v254_v7 }
   0xf   :  { %231 = vmatpush3.bf16.msra.mxu0 %v255_v8 }
  0x10   :  { %232 = vmatprep.subr.bf16.mxu0 %v256_v9 }
  0x13   :  { %233 = vmatpush3.bf16.msra.mxu0 %v257_v10 }
  0x14   :  { %234 = vmatprep.subr.bf16.mxu0 %v258_v11 }
  0x17   :  { %235 = vmatpush3.bf16.msra.mxu0 %v259_v15 }
  0x18   :  { %236 = vmatprep.subr.bf16.mxu0 %v260_v16 }
  0x1b   :  { %237 = vmatpush3.bf16.msra.mxu0 %v261_v17 }
  0x1c   :  { %238 = vmatprep.subr.bf16.mxu0 %v262_v18 }
  0x1f   :  { %239 = vmatpush3.bf16.msra.mxu0 %v263_v19 }
  0x22   :  { %190 = vmatmul.mubr.bf16.vlgmr.msra.gmra.mrb[0].mxu0 %v206_v20 }
  0x86   :  { %v52_v23 = vpop.permute.xlu0 %51 }
  0xf5   :  { %v240_v21 = vpop.f32.mrb[0].mxu0 }
  0xf6   :  { %v241_v22 = vpop.f32.mrb[1].mxu0 }
  0xf7   :  { %v242_v24 = vadd.f32 %v241_v22, %v240_v21  ;;  %v243_v25 = vpop.f32.mrb[2].mxu0 }
  0xf8   :  { %v244_v26 = vpop.f32.mrb[3].mxu0 }
  0xf9   :  { %v192_v27 = vadd.f32 %v242_v24, %v52_v23 }
  0xfb   :  { %v197_v28 = vmul.f32 0.2, %v192_v27 }
  0xfd   :  { %v198_v29 = vmax.f32 %v192_v27, %v197_v28 }
  0xff   :  { %v199_v30 = vpack.c.bf16 %v198_v29, %v198_v29 }
 0x101   :  { %201 = vst.msk [vmem:[%s347_s3] sm:$0xf] %vm200_vm0, %v199_v30 }

// kernel: generator_forward.16
= control target key start
LH: loop header
LB: loop body
LE: loop exit
PB: predicated region body
PF: predicated region fallthrough
CT: control target
= control target key end

     0   :  { %v184_v0 = vmov 0.0   ;;  %vm185_vm0 = vmmov 0   ;;  %v186_v2 = vmov 0   ;;  %vm129_vm1 = vcmask 58368   ;;  %s240_s1 = inlined_call_operand.vmem [shape: bf16[128,8], index: 1, kind: input, shape index: {}]   ;;  %s241_s2 = inlined_call_operand.vmem [shape: f32[4,1], index: 2, kind: input, shape index: {}]   ;;  %s242_s0 = inlined_call_operand.vmem [shape: bf16[4,128], index: 0, kind: input, shape index: {}]   ;;  %s243_s3 = inlined_call_operand.vmem [shape: bf16[4,8], index: 3, kind: output, shape index: {}]  }
   0x1   :  { %152 = vmatprep.subr.bf16.mxu0 %v184_v0  ;;  %v176_v1 = vld [vmem:[%s240_s1] sm:$0xff]   ;;  %168 = vmatprep.mubr.msk.bf16.mxu0 %vm185_vm0, %v184_v0  ;;  %v177_v3 = vld [vmem:[%s240_s1 + $0x8] sm:$0xff]   ;;  %v178_v4 = vld [vmem:[%s240_s1 + $0x10] sm:$0xff]  }
   0x2   :  { %175 = vset.pattern.permute.xlu0 %v186_v2  ;;  %153 = vmatpush3.bf16.msra.mxu0 %v176_v1  ;;  %v32_v5 = vld [vmem:[%s241_s2] sm:$0xf]  ;;  %v179_v6 = vld [vmem:[%s240_s1 + $0x18] sm:$0xff]   ;;  %v181_v8 = vld [vmem:[%s240_s1 + $0x28] sm:$0xff]  }
   0x3   :  { %154 = vmatprep.subr.bf16.mxu0 %v184_v0  ;;  %35 = vperm.xlu0 %175, %v32_v5   ;;  %v180_v7 = vld [vmem:[%s240_s1 + $0x20] sm:$0xff]   ;;  %v182_v9 = vld [vmem:[%s240_s1 + $0x30] sm:$0xff]   ;;  %v183_v10 = vld [vmem:[%s240_s1 + $0x38] sm:$0xff]  }
   0x4   :  { %v15_v11 = vld [vmem:[%s242_s0] sm:$0x3] }
   0x6   :  { %155 = vmatpush3.bf16.msra.mxu0 %v177_v3 }
   0x7   :  { %156 = vmatprep.subr.bf16.mxu0 %v184_v0 }
   0xa   :  { %157 = vmatpush3.bf16.msra.mxu0 %v178_v4 }
   0xb   :  { %158 = vmatprep.subr.bf16.mxu0 %v184_v0 }
   0xe   :  { %159 = vmatpush3.bf16.msra.mxu0 %v179_v6 }
   0xf   :  { %160 = vmatprep.subr.bf16.mxu0 %v184_v0 }
  0x12   :  { %161 = vmatpush3.bf16.msra.mxu0 %v180_v7 }
  0x13   :  { %162 = vmatprep.subr.bf16.mxu0 %v184_v0 }
  0x16   :  { %163 = vmatpush3.bf16.msra.mxu0 %v181_v8 }
  0x17   :  { %164 = vmatprep.subr.bf16.mxu0 %v184_v0 }
  0x1a   :  { %165 = vmatpush3.bf16.msra.mxu0 %v182_v9 }
  0x1b   :  { %166 = vmatprep.subr.bf16.mxu0 %v184_v0 }
  0x1e   :  { %167 = vmatpush3.bf16.msra.mxu0 %v183_v10 }
  0x21   :  { %169 = vmatmul.mubr.bf16.vlgmr.msra.gmra.mrb[0].mxu0 %v15_v11 }
  0x82   :  { %v36_v12 = vpop.permute.xlu0 %35 }
  0xf4   :  { %v120_v13 = vpop.f32.mrb[0].mxu0 }
  0xf5   :  { %v121_v14 = vadd.f32 %v120_v13, %v36_v12  ;;  %v170_v15 = vpop.f32.mrb[1].mxu0 }
  0xf6   :  { %v123_v16 = vpop.f32.mrb[2].mxu0 }
  0xf7   :  { %v126_v17 = vmul.f32 0.2, %v121_v14  ;;  %v171_v18 = vpop.f32.mrb[3].mxu0 }
  0xf9   :  { %v127_v19 = vmax.f32 %v121_v14, %v126_v17 }
  0xfb   :  { %v128_v20 = vpack.c.bf16 %v127_v19, %v127_v19 }
  0xfd   :  { %130 = vst.msk [vmem:[%s243_s3] sm:$0x3] %vm129_vm1, %v128_v20 }

// kernel: generator_forward.17
= control target key start
LH: loop header
LB: loop body
LE: loop exit
PB: predicated region body
PF: predicated region fallthrough
CT: control target
= control target key end

     0   :  { %v137_v0 = vmov 0.0   ;;  %vm138_vm0 = vmmov 0   ;;  %v139_v2 = vmov 0   ;;  %vm54_vm1 = vcmask 523264   ;;  %s181_s1 = inlined_call_operand.vmem [shape: bf16[64,2], index: 1, kind: input, shape index: {}]   ;;  %s182_s2 = inlined_call_operand.vmem [shape: f32[3,1], index: 2, kind: input, shape index: {}]   ;;  %s183_s0 = inlined_call_operand.vmem [shape: bf16[3,64], index: 0, kind: input, shape index: {}]   ;;  %s184_s3 = inlined_call_operand.vmem [shape: f32[3,2], index: 3, kind: output, shape index: {}]  }
   0x1   :  { %115 = vmatprep.subr.bf16.mxu0 %v137_v0  ;;  %v131_v1 = vld [vmem:[%s181_s1] sm:$0xff]   ;;  %123 = vmatprep.mubr.msk.bf16.mxu0 %vm138_vm0, %v137_v0  ;;  %v132_v3 = vld [vmem:[%s181_s1 + $0x8] sm:$0xff]   ;;  %v133_v5 = vld [vmem:[%s181_s1 + $0x10] sm:$0xff]   ;;  %vm99_vm2 = vcmask 10240  }
   0x2   :  { %130 = vset.pattern.permute.xlu0 %v139_v2  ;;  %116 = vmatpush3.bf16.msra.mxu0 %v131_v1  ;;  %v24_v4 = vld [vmem:[%s182_s2] sm:$0x7]  ;;  %v134_v6 = vld [vmem:[%s181_s1 + $0x18] sm:$0xff]  }
   0x3   :  { %117 = vmatprep.subr.bf16.mxu0 %v137_v0  ;;  %27 = vperm.xlu0 %130, %v24_v4   ;;  %v15_v7 = vld [vmem:[%s183_s0] sm:$0x3] }
   0x6   :  { %118 = vmatpush3.bf16.msra.mxu0 %v132_v3 }
   0x7   :  { %119 = vmatprep.subr.bf16.mxu0 %v137_v0 }
   0xa   :  { %120 = vmatpush3.bf16.msra.mxu0 %v133_v5 }
   0xb   :  { %121 = vmatprep.subr.bf16.mxu0 %v137_v0 }
   0xe   :  { %122 = vmatpush3.bf16.msra.mxu0 %v134_v6 }
  0x11   :  { %124 = vmatmul.mubr.msk.bf16.vlgmr.msra.gmra.mrb[0].mxu0 %vm54_vm1, %v15_v7 }
  0x82   :  { %v28_v8 = vpop.permute.xlu0 %27 }
  0xe4   :  { %v92_v9 = vpop.f32.mrb[0].mxu0 }
  0xe5   :  { %v93_v10 = vadd.f32 %v92_v9, %v28_v8  ;;  %v125_v11 = vpop.f32.mrb[1].mxu0 }
  0xe6   :  { %v95_v12 = vpop.f32.mrb[2].mxu0 }
  0xe7   :  { %135 = vtanh.f32 %v93_v10  ;;  %v126_v13 = vpop.f32.mrb[3].mxu0 }
  0xf1   :  { %v136_v14 = vpop.eup %135 }
  0xf2   :  { %100 = vst.msk [vmem:[%s184_s3] sm:$0x7] %vm99_vm2, %v136_v14 }

</bundles_post_ra>
